<compile_context>
chip_gen: v6e
topology: v6e:2x2x1
jax: 0.10.0
libtpu: 0.0.40
codegen_flags: <defaults>
</compile_context>

<pallas_src>
import math
from functools import partial

import jax
import jax.numpy as jnp
import numpy as np
from jax.experimental import pallas as pl
from jax.experimental.pallas import tpu as pltpu

ALPHA = 0.5        # SeedTransConv residual mixing
LN_EPS = 1e-5
BN_EPS = 1e-5
BN_SCALE = 1.0 / math.sqrt(1.0 + BN_EPS)   # eval BN with running_mean=0, running_var=1

# rows of the packed [9, Hp] vector array
R_BIP, R_LN0G, R_LN0B, R_LN1G, R_LN1B, R_BC0, R_BC1, R_XNEW, R_MASK = range(9)
NUM_VEC_ROWS = 9


# ----------------------------------------------------------------- small helpers
def _rup(v, m):
    return (v + m - 1) // m * m


def _pad2(a, r, c):
    return jnp.pad(a, ((0, r - a.shape[0]), (0, c - a.shape[1])))


def _layernorm(h, gamma, beta):
    mu = jnp.mean(h, axis=-1, keepdims=True)
    var = jnp.mean((h - mu) ** 2, axis=-1, keepdims=True)
    return (h - mu) * jax.lax.rsqrt(var + LN_EPS) * gamma + beta


def _bn_eval(h, gamma, beta):
    return h * BN_SCALE * gamma + beta


def _ln_masked(h, gamma, beta, mask, inv_h):
    """LayerNorm over the real hidden columns of a zero-padded [R, Hp] tile."""
    mu = jnp.sum(h, axis=-1, keepdims=True) * inv_h
    c = (h - mu) * mask
    var = jnp.sum(c * c, axis=-1, keepdims=True) * inv_h
    return c * jax.lax.rsqrt(var + LN_EPS) * gamma + beta


# ----------------------------------------------------------------- Pallas kernels
def gproj_kernel(x_ref, w_ref, b_ref, g32_ref, g16_ref):
    """G = relu(X @ [wf0|wf1] + [bf0|bf1]); emitted once, in f32 and bf16."""
    g = jnp.maximum(
        jnp.dot(x_ref[...], w_ref[...], preferred_element_type=jnp.float32)
        + b_ref[...], 0.0)
    g32_ref[...] = g
    g16_ref[...] = g.astype(jnp.bfloat16)


def main_kernel(x_i_ref, g_i_ref, g_k_ref, a_ref,
                wip_ref, wc0_ref, wc1_ref,
                wfc0_ref, wfc14_ref, wfc2_ref,
                vec_ref, bfc_ref,
                out_ref,
                acc0_ref, acc1_ref,
                *, hp, inv_h):
    k = pl.program_id(1)
    nk = pl.num_programs(1)

    @pl.when(k == 0)
    def _():
        acc0_ref[...] = jnp.zeros_like(acc0_ref)
        acc1_ref[...] = jnp.zeros_like(acc1_ref)

    # ---- streamed A @ G accumulation (bf16 operands, f32 accumulation) ----
    g_k = g_k_ref[...]                                            # [TK, 2Hp] bf16
    acc0_ref[...] += jnp.dot(a_ref[0], g_k[:, :hp],
                             preferred_element_type=jnp.float32)
    acc1_ref[...] += jnp.dot(a_ref[1], g_k[:, hp:],
                             preferred_element_type=jnp.float32)

    @pl.when(k == nk - 1)
    def _():
        mask = vec_ref[R_MASK:R_MASK + 1, :]
        bip = vec_ref[R_BIP:R_BIP + 1, :]
        ln0g = vec_ref[R_LN0G:R_LN0G + 1, :]
        ln0b = vec_ref[R_LN0B:R_LN0B + 1, :]
        ln1g = vec_ref[R_LN1G:R_LN1G + 1, :]
        ln1b = vec_ref[R_LN1B:R_LN1B + 1, :]
        bc0 = vec_ref[R_BC0:R_BC0 + 1, :]
        bc1 = vec_ref[R_BC1:R_BC1 + 1, :]
        x_new = vec_ref[R_XNEW:R_XNEW + 1, :]      # hoisted seed-attention output

        g_i = g_i_ref[...]                          # [TM, 2Hp] f32 (exact residual)
        g0 = g_i[:, :hp]
        g1 = g_i[:, hp:]

        # -------- GraphConv finalize (conv weight + folded BN + relu + residual) ----
        m0 = jnp.maximum(
            jnp.dot(acc0_ref[...], wc0_ref[...], preferred_element_type=jnp.float32)
            + bc0, 0.0)
        m1 = jnp.maximum(
            jnp.dot(acc1_ref[...], wc1_ref[...], preferred_element_type=jnp.float32)
            + bc1, 0.0)
        xg0 = m0 + g0
        xg1 = m1 + g1

        # -------- SeedTransConv for this row tile (single-key attention) --------
        h_i = jnp.maximum(
            _ln_masked(jnp.dot(x_i_ref[...], wip_ref[...],
                               preferred_element_type=jnp.float32) + bip,
                       ln0g, ln0b, mask, inv_h), 0.0)
        xt = ALPHA * x_new + (1.0 - ALPHA) * h_i
        x_trans = jnp.maximum(_ln_masked(xt, ln1g, ln1b, mask, inv_h), 0.0)

        # -------- final fc (seed-embedding term pre-folded into bfc) + tanh --------
        pre = (jnp.dot(x_trans, wfc0_ref[...], preferred_element_type=jnp.float32)
               + jnp.dot(xg0, wfc14_ref[...], preferred_element_type=jnp.float32)
               + jnp.dot(xg1, wfc2_ref[...], preferred_element_type=jnp.float32)
               + bfc_ref[...])
        out_ref[...] = jnp.tanh(pre)


# ----------------------------------------------------------------- JAX glue
def build_dense_adj(edge_index, edge_weight, edge_type, type_id, num_nodes):
    """Dense normalized adjacency for edges of a given type (GraphConvLayer norm)."""
    row, col = edge_index[0], edge_index[1]
    maskf = (edge_type == type_id).astype(jnp.float32)
    w = edge_weight * maskf
    deg = jnp.zeros((num_nodes,), jnp.float32).at[col].add(maskf)
    d_norm_in = jnp.sqrt(1.0 / deg[col])
    d_norm_out = jnp.sqrt(1.0 / deg[row])
    value = jnp.nan_to_num(w * d_norm_in * d_norm_out, nan=0.0, posinf=0.0, neginf=0.0)
    value = value * maskf
    return jnp.zeros((num_nodes, num_nodes), jnp.float32).at[col, row].add(value)


def init_params(key, fin, hid, out_ch):
    def lin(k, i, o):
        kw, kb = jax.random.split(k)
        return (jax.random.normal(kw, (i, o), jnp.float32) * 0.1,
                jax.random.normal(kb, (1, o), jnp.float32) * 0.01)

    ks = jax.random.split(key, 8)
    p = {}
    p["wip"], p["bip"] = lin(ks[0], fin, hid)
    p["ln0_g"], p["ln0_b"] = jnp.ones((1, hid)), jnp.zeros((1, hid))
    p["wv"], p["bv"] = lin(ks[1], hid, hid)
    p["wo"], p["bo"] = lin(ks[2], hid, hid)
    p["ln1_g"], p["ln1_b"] = jnp.ones((1, hid)), jnp.zeros((1, hid))
    p["wf0"], p["bf0"] = lin(ks[3], fin, hid)
    p["bn00_g"], p["bn00_b"] = jnp.ones((1, hid)), jnp.zeros((1, hid))
    p["wc0"], p["bc0"] = lin(ks[4], hid, hid)
    p["bn01_g"], p["bn01_b"] = jnp.ones((1, hid)), jnp.zeros((1, hid))
    p["wf1"], p["bf1"] = lin(ks[5], fin, hid)
    p["bn10_g"], p["bn10_b"] = jnp.ones((1, hid)), jnp.zeros((1, hid))
    p["wc1"], p["bc1"] = lin(ks[6], hid, hid)
    p["bn11_g"], p["bn11_b"] = jnp.ones((1, hid)), jnp.zeros((1, hid))
    p["wfc"], p["bfc"] = lin(ks[7], 5 * hid, out_ch)
    return p


@jax.jit
def sgformer_seed_forward(x, edge_index, edge_type, edge_weight, seed_node_id, params):
    p = params
    n, fin = x.shape
    hid = p["wip"].shape[1]
    out_ch = p["wfc"].shape[1]

    # 128-aligned tiles; larger tiles for larger graphs (MXU depth / DMA segments /
    # per-step overhead).  For v7x megacore, an even number of row tiles is ideal.
    if n >= 4096:
        blk = 512
    elif n >= 1024:
        blk = 256
    else:
        blk = 128
    tm = tk = blk
    np_ = _rup(n, blk)
    fp, hp, op = _rup(fin, 128), _rup(hid, 128), _rup(out_ch, 128)
    ni, nk = np_ // tm, np_ // tk

    # dense normalized adjacencies (f32 for exact normalization), packed + bf16 stream copy
    a0 = build_dense_adj(edge_index, edge_weight, edge_type, 0, np_)
    a1 = build_dense_adj(edge_index, edge_weight, edge_type, 1, np_)
    a_pk = jnp.stack([a0, a1], axis=0).astype(jnp.bfloat16)          # [2, Np, Np]

    x_p = _pad2(x, np_, fp)

    # fold eval-mode BatchNorm into the preceding Linear layers
    s = BN_SCALE
    wf0 = p["wf0"] * (s * p["bn00_g"]); bf0 = p["bf0"] * s * p["bn00_g"] + p["bn00_b"]
    wf1 = p["wf1"] * (s * p["bn10_g"]); bf1 = p["bf1"] * s * p["bn10_g"] + p["bn10_b"]
    wc0 = p["wc0"] * (s * p["bn01_g"]); bc0 = p["bc0"] * s * p["bn01_g"] + p["bn01_b"]
    wc1 = p["wc1"] * (s * p["bn11_g"]); bc1 = p["bc1"] * s * p["bn11_g"] + p["bn11_b"]

    wf01 = jnp.concatenate([_pad2(wf0, fp, hp), _pad2(wf1, fp, hp)], axis=1)   # [Fp, 2Hp]
    bf01 = jnp.concatenate([_pad2(bf0, 1, hp), _pad2(bf1, 1, hp)], axis=1)     # [1, 2Hp]

    # ---- kernel 1: G = relu(X @ [wf0|wf1] + b) computed once (f32 + bf16 copies) ----
    g_f32, g_bf16 = pl.pallas_call(
        gproj_kernel,
        out_shape=(jax.ShapeDtypeStruct((np_, 2 * hp), jnp.float32),
                   jax.ShapeDtypeStruct((np_, 2 * hp), jnp.bfloat16)),
        grid_spec=pltpu.PrefetchScalarGridSpec(
            num_scalar_prefetch=0,
            grid=(ni,),
            in_specs=[pl.BlockSpec((tm, fp), lambda i: (i, 0)),
                      pl.BlockSpec((fp, 2 * hp), lambda i: (0, 0)),
                      pl.BlockSpec((1, 2 * hp), lambda i: (0, 0))],
            out_specs=(pl.BlockSpec((tm, 2 * hp), lambda i: (i, 0)),
                       pl.BlockSpec((tm, 2 * hp), lambda i: (i, 0)))),
        compiler_params=pltpu.CompilerParams(dimension_semantics=("parallel",)),
    )(x_p, wf01, bf01)

    # ---- seed branch of SeedTransConv hoisted out of the kernel (tiny [1,.] matmuls) ----
    x_seed = x[seed_node_id][None, :]                                           # [1, Fin]
    h_s = jnp.maximum(_layernorm(x_seed @ p["wip"] + p["bip"],
                                 p["ln0_g"], p["ln0_b"]), 0.0)
    x_new = (h_s @ p["wv"] + p["bv"]) @ p["wo"] + p["bo"]                       # [1, hid]

    # ---- final fc folding: node_emb == xg0 -> sum blocks 1 and 4;
    #      seed_embedding term computed once here and folded into the fc bias ----
    wfc = p["wfc"]
    wfc0 = _pad2(wfc[0 * hid:1 * hid], hp, op)
    wfc14 = _pad2(wfc[1 * hid:2 * hid] + wfc[4 * hid:5 * hid], hp, op)
    wfc2 = _pad2(wfc[2 * hid:3 * hid], hp, op)
    wfc3 = _pad2(wfc[3 * hid:4 * hid], hp, op)

    wc0p = _pad2(wc0, hp, hp)
    wc1p = _pad2(wc1, hp, hp)
    bc0p = _pad2(bc0, 1, hp)
    bc1p = _pad2(bc1, 1, hp)

    a0_seed = a0[seed_node_id][None, :]                                         # [1, Np]
    g0_f32 = g_f32[:, :hp]
    m0_seed = a0_seed @ g0_f32                                                  # [1, Hp]
    g0_seed = g0_f32[seed_node_id][None, :]
    xg0_seed = jnp.maximum(m0_seed @ wc0p + bc0p, 0.0) + g0_seed
    seed_term = xg0_seed @ wfc3                                                 # [1, Op]
    bfc_eff = _pad2(p["bfc"], 1, op) + seed_term

    # ---- packed [9, Hp] small vectors (one DMA instead of nine), incl. mask & x_new ----
    col_mask = (jnp.arange(hp) < hid).astype(jnp.float32)[None, :]
    vecs = jnp.concatenate([
        _pad2(p["bip"], 1, hp), _pad2(p["ln0_g"], 1, hp), _pad2(p["ln0_b"], 1, hp),
        _pad2(p["ln1_g"], 1, hp), _pad2(p["ln1_b"], 1, hp),
        bc0p, bc1p, _pad2(x_new, 1, hp), col_mask], axis=0)

    wip = _pad2(p["wip"], fp, hp)

    def full(shape):
        return pl.BlockSpec(shape, lambda i, k: (0,) * len(shape))

    # ---- kernel 2: stream A/G tiles, accumulate A@G, finalize everything per row tile ----
    grid_spec = pltpu.PrefetchScalarGridSpec(
        num_scalar_prefetch=0,
        grid=(ni, nk),
        in_specs=[
            pl.BlockSpec((tm, fp), lambda i, k: (i, 0)),           # X rows (tile i)
            pl.BlockSpec((tm, 2 * hp), lambda i, k: (i, 0)),       # G rows f32 (tile i)
            pl.BlockSpec((tk, 2 * hp), lambda i, k: (k, 0)),       # G rows bf16 (stream k)
            pl.BlockSpec((2, tm, tk), lambda i, k: (0, i, k)),     # packed A0/A1 bf16 tiles
            full((fp, hp)),                                        # wip
            full((hp, hp)), full((hp, hp)),                        # wc0, wc1 (BN folded)
            full((hp, op)), full((hp, op)), full((hp, op)),        # wfc0, wfc14, wfc2
            full((NUM_VEC_ROWS, hp)),                              # packed vectors
            full((1, op)),                                         # fc bias (+ seed term)
        ],
        out_specs=pl.BlockSpec((tm, op), lambda i, k: (i, 0)),
        scratch_shapes=[pltpu.VMEM((tm, hp), jnp.float32),
                        pltpu.VMEM((tm, hp), jnp.float32)],
    )
    out = pl.pallas_call(
        partial(main_kernel, hp=hp, inv_h=1.0 / hid),
        out_shape=jax.ShapeDtypeStruct((np_, op), jnp.float32),
        grid_spec=grid_spec,
        compiler_params=pltpu.CompilerParams(
            dimension_semantics=("parallel", "arbitrary")),
    )(x_p, g_f32, g_bf16, a_pk, wip, wc0p, wc1p, wfc0, wfc14, wfc2, vecs, bfc_eff)

    return out[:n, :out_ch]


# ----------------------------------------------------------------- pure-JAX reference
def reference_forward(x, edge_index, edge_type, edge_weight, seed_node_id, params):
    p = params
    n = x.shape[0]
    a0 = build_dense_adj(edge_index, edge_weight, edge_type, 0, n)
    a1 = build_dense_adj(edge_index, edge_weight, edge_type, 1, n)

    h = x @ p["wip"] + p["bip"]
    h = _layernorm(h, p["ln0_g"], p["ln0_b"])
    h = jnp.maximum(h, 0.0)
    seed_h = h[seed_node_id][None, :]
    v = seed_h @ p["wv"] + p["bv"]
    x_new = jnp.broadcast_to(v @ p["wo"] + p["bo"], h.shape)
    xt = ALPHA * x_new + (1.0 - ALPHA) * h
    xt = _layernorm(xt, p["ln1_g"], p["ln1_b"])
    x_trans = jnp.maximum(xt, 0.0)

    def graph_branch(a, wf, bf, bn0g, bn0b, wc, bc, bn1g, bn1b):
        g = jnp.maximum(_bn_eval(x @ wf + bf, bn0g, bn0b), 0.0)
        m = a @ g
        m = jnp.maximum(_bn_eval(m @ wc + bc, bn1g, bn1b), 0.0)
        return m + g

    xg0 = graph_branch(a0, p["wf0"], p["bf0"], p["bn00_g"], p["bn00_b"],
                       p["wc0"], p["bc0"], p["bn01_g"], p["bn01_b"])
    xg1 = graph_branch(a1, p["wf1"], p["bf1"], p["bn10_g"], p["bn10_b"],
                       p["wc1"], p["bc1"], p["bn11_g"], p["bn11_b"])

    seed_emb = jnp.broadcast_to(xg0[seed_node_id][None, :], xg0.shape)
    cat = jnp.concatenate([x_trans, xg0, xg1, seed_emb, xg0], axis=1)
    return jnp.tanh(cat @ p["wfc"] + p["bfc"])


# ----------------------------------------------------------------- main
if __name__ == "__main__":
    N, FIN, HID, OUT, E = 300, 16, 32, 8, 1200

    key = jax.random.PRNGKey(0)
    kx, ke, kt, kw, kp = jax.random.split(key, 5)

    x = jax.random.normal(kx, (N, FIN), jnp.float32)
    edge_index = jax.random.randint(ke, (2, E), 0, N, dtype=jnp.int32)
    edge_type = jax.random.randint(kt, (E,), 0, 2, dtype=jnp.int32)
    edge_weight = jax.random.uniform(kw, (E,), jnp.float32, 0.1, 1.0)
    seed_node_id = jnp.int32(17)

    params = init_params(kp, FIN, HID, OUT)

    out = sgformer_seed_forward(x, edge_index, edge_type, edge_weight,
                                seed_node_id, params)
    out = jax.block_until_ready(out)

    ref = reference_forward(x, edge_index, edge_type, edge_weight, seed_node_id, params)
    # tolerance relaxed for the bf16 A/G streaming path (f32 accumulation)
    np.testing.assert_allclose(np.asarray(out), np.asarray(ref), rtol=2e-2, atol=1e-2)

    print("KERNEL_OK")
</pallas_src>

<mosaic_0001>
module attributes {stable_mosaic.version = 11 : i64} {
  func.func private @main(%arg0: i32) attributes {dimension_semantics = [#tpu.dimension_semantics<core_parallel>], iteration_bounds = array<i64: 2>, tpu.core_type = #tpu.core_type<sc_scalar_subcore>, window_params = []} {
    return
  }
}

module attributes {stable_mosaic.version = 11 : i64} {
  func.func private @main(%arg0: i32) attributes {dimension_semantics = [#tpu.dimension_semantics<core_parallel>], iteration_bounds = array<i64: 2>, tpu.core_type = #tpu.core_type<sc_scalar_subcore>, window_params = []} {
    return
  }
}

module attributes {stable_mosaic.version = 11 : i64} {
  func.func @gproj_kernel(%arg0: i32, %arg1: memref<128x128xf32, #tpu.memory_space<vmem>>, %arg2: memref<128x256xf32, #tpu.memory_space<vmem>>, %arg3: memref<1x256xf32, #tpu.memory_space<vmem>>, %arg4: memref<128x256xf32, #tpu.memory_space<vmem>>, %arg5: memref<128x256xbf16, #tpu.memory_space<vmem>>) attributes {dimension_semantics = [#tpu.dimension_semantics<parallel>], iteration_bounds = array<i64: 3>, scalar_prefetch = 0 : i64, scratch_operands = 0 : i64, tpu.core_type = #tpu.core_type<tc>, window_params = [{transform_indices = @transform_0, window_bounds = array<i64: 128, 128>}, {pipeline_mode = #tpu.pipeline_mode<synchronous>, transform_indices = @transform_1, window_bounds = array<i64: 128, 256>}, {pipeline_mode = #tpu.pipeline_mode<synchronous>, transform_indices = @transform_2, window_bounds = array<i64: 1, 256>}, {transform_indices = @transform_3, window_bounds = array<i64: 128, 256>}, {transform_indices = @transform_4, window_bounds = array<i64: 128, 256>}]} {
    %c0 = arith.constant 0 : index
    %c0_0 = arith.constant 0 : index
    %0 = vector.load %arg1[%c0, %c0_0] : memref<128x128xf32, #tpu.memory_space<vmem>>, vector<128x128xf32>
    %c0_1 = arith.constant 0 : index
    %c0_2 = arith.constant 0 : index
    %1 = vector.load %arg2[%c0_1, %c0_2] : memref<128x256xf32, #tpu.memory_space<vmem>>, vector<128x256xf32>
    %cst = arith.constant dense<0.000000e+00> : vector<128x256xf32>
    %2 = tpu.matmul %0, %1, %cst {dimension_numbers = #tpu.dot_dimension_numbers<[1], [0], [0], [1], [0, 0, 1, 1], [], []>} : vector<128x128xf32>, vector<128x256xf32>, vector<128x256xf32> -> vector<128x256xf32>
    %c0_3 = arith.constant 0 : index
    %c0_4 = arith.constant 0 : index
    %3 = vector.load %arg3[%c0_3, %c0_4] : memref<1x256xf32, #tpu.memory_space<vmem>>, vector<1x256xf32>
    %4 = vector.broadcast %3 : vector<1x256xf32> to vector<128x256xf32>
    %5 = arith.addf %2, %4 : vector<128x256xf32>
    %cst_5 = arith.constant 0.000000e+00 : f32
    %6 = vector.broadcast %cst_5 : f32 to vector<128x256xf32>
    %7 = arith.maximumf %5, %6 : vector<128x256xf32>
    %c0_6 = arith.constant 0 : index
    %c0_7 = arith.constant 0 : index
    %8 = vector.load %arg4[%c0_6, %c0_7] : memref<128x256xf32, #tpu.memory_space<vmem>>, vector<128x256xf32>
    tpu.vector_store %arg4[%c0_6, %c0_7], %7 {strides = array<i32>} : memref<128x256xf32, #tpu.memory_space<vmem>>, vector<128x256xf32>,
    %9 = arith.truncf %7 : vector<128x256xf32> to vector<128x256xbf16>
    %c0_8 = arith.constant 0 : index
    %c0_9 = arith.constant 0 : index
    %10 = vector.load %arg5[%c0_8, %c0_9] : memref<128x256xbf16, #tpu.memory_space<vmem>>, vector<128x256xbf16>
    tpu.vector_store %arg5[%c0_8, %c0_9], %9 {strides = array<i32>} : memref<128x256xbf16, #tpu.memory_space<vmem>>, vector<128x256xbf16>,
    return
  }
  func.func @transform_0(%arg0: i32) -> (i32, i32) {
    %c0_i32 = arith.constant 0 : i32
    %c0_i32_0 = arith.constant 0 : i32
    return %arg0, %c0_i32 : i32, i32
  }
  func.func @transform_1(%arg0: i32) -> (i32, i32) {
    %c0_i32 = arith.constant 0 : i32
    %c0_i32_0 = arith.constant 0 : i32
    %c0_i32_1 = arith.constant 0 : i32
    return %c0_i32, %c0_i32_0 : i32, i32
  }
  func.func @transform_2(%arg0: i32) -> (i32, i32) {
    %c0_i32 = arith.constant 0 : i32
    %c0_i32_0 = arith.constant 0 : i32
    %c0_i32_1 = arith.constant 0 : i32
    return %c0_i32, %c0_i32_0 : i32, i32
  }
  func.func @transform_3(%arg0: i32) -> (i32, i32) {
    %c0_i32 = arith.constant 0 : i32
    %c0_i32_0 = arith.constant 0 : i32
    return %arg0, %c0_i32 : i32, i32
  }
  func.func @transform_4(%arg0: i32) -> (i32, i32) {
    %c0_i32 = arith.constant 0 : i32
    %c0_i32_0 = arith.constant 0 : i32
    return %arg0, %c0_i32 : i32, i32
  }
}

module attributes {stable_mosaic.version = 11 : i64} {
  func.func @main_kernel(%arg0: i32, %arg1: i32, %arg2: memref<128x128xf32, #tpu.memory_space<vmem>>, %arg3: memref<128x256xf32, #tpu.memory_space<vmem>>, %arg4: memref<128x256xbf16, #tpu.memory_space<vmem>>, %arg5: memref<2x128x128xbf16, #tpu.memory_space<vmem>>, %arg6: memref<128x128xf32, #tpu.memory_space<vmem>>, %arg7: memref<128x128xf32, #tpu.memory_space<vmem>>, %arg8: memref<128x128xf32, #tpu.memory_space<vmem>>, %arg9: memref<128x128xf32, #tpu.memory_space<vmem>>, %arg10: memref<128x128xf32, #tpu.memory_space<vmem>>, %arg11: memref<128x128xf32, #tpu.memory_space<vmem>>, %arg12: memref<9x128xf32, #tpu.memory_space<vmem>>, %arg13: memref<1x128xf32, #tpu.memory_space<vmem>>, %arg14: memref<128x128xf32, #tpu.memory_space<vmem>>, %arg15: memref<128x128xf32, #tpu.memory_space<vmem>>, %arg16: memref<128x128xf32, #tpu.memory_space<vmem>>) attributes {dimension_semantics = [#tpu.dimension_semantics<parallel>, #tpu.dimension_semantics<arbitrary>], iteration_bounds = array<i64: 3, 3>, scalar_prefetch = 0 : i64, scratch_operands = 2 : i64, tpu.core_type = #tpu.core_type<tc>, window_params = [{transform_indices = @transform_0, window_bounds = array<i64: 128, 128>}, {transform_indices = @transform_1, window_bounds = array<i64: 128, 256>}, {transform_indices = @transform_2, window_bounds = array<i64: 128, 256>}, {transform_indices = @transform_3, window_bounds = array<i64: 2, 128, 128>}, {pipeline_mode = #tpu.pipeline_mode<synchronous>, transform_indices = @transform_4, window_bounds = array<i64: 128, 128>}, {pipeline_mode = #tpu.pipeline_mode<synchronous>, transform_indices = @transform_5, window_bounds = array<i64: 128, 128>}, {pipeline_mode = #tpu.pipeline_mode<synchronous>, transform_indices = @transform_6, window_bounds = array<i64: 128, 128>}, {pipeline_mode = #tpu.pipeline_mode<synchronous>, transform_indices = @transform_7, window_bounds = array<i64: 128, 128>}, {pipeline_mode = #tpu.pipeline_mode<synchronous>, transform_indices = @transform_8, window_bounds = array<i64: 128, 128>}, {pipeline_mode = #tpu.pipeline_mode<synchronous>, transform_indices = @transform_9, window_bounds = array<i64: 128, 128>}, {pipeline_mode = #tpu.pipeline_mode<synchronous>, transform_indices = @transform_10, window_bounds = array<i64: 9, 128>}, {pipeline_mode = #tpu.pipeline_mode<synchronous>, transform_indices = @transform_11, window_bounds = array<i64: 1, 128>}, {transform_indices = @transform_12, window_bounds = array<i64: 128, 128>}]} {
    %c0_i32 = arith.constant 0 : i32
    %0 = arith.cmpi eq, %arg1, %c0_i32 : i32
    %1 = arith.extui %0 : i1 to i32
    %c0_i32_0 = arith.constant 0 : i32
    %2 = arith.cmpi ne, %1, %c0_i32_0 : i32
    scf.if %2 {
      %cst_17 = arith.constant 0.000000e+00 : f32
      %21 = vector.broadcast %cst_17 : f32 to vector<128x128xf32>
      %c0_18 = arith.constant 0 : index
      %c0_19 = arith.constant 0 : index
      %22 = vector.load %arg15[%c0_18, %c0_19] : memref<128x128xf32, #tpu.memory_space<vmem>>, vector<128x128xf32>
      tpu.vector_store %arg15[%c0_18, %c0_19], %21 {strides = array<i32>} : memref<128x128xf32, #tpu.memory_space<vmem>>, vector<128x128xf32>,
      %cst_20 = arith.constant 0.000000e+00 : f32
      %23 = vector.broadcast %cst_20 : f32 to vector<128x128xf32>
      %c0_21 = arith.constant 0 : index
      %c0_22 = arith.constant 0 : index
      %24 = vector.load %arg16[%c0_21, %c0_22] : memref<128x128xf32, #tpu.memory_space<vmem>>, vector<128x128xf32>
      tpu.vector_store %arg16[%c0_21, %c0_22], %23 {strides = array<i32>} : memref<128x128xf32, #tpu.memory_space<vmem>>, vector<128x128xf32>,
    } else {
    }
    %c0 = arith.constant 0 : index
    %c0_1 = arith.constant 0 : index
    %3 = vector.load %arg4[%c0, %c0_1] : memref<128x256xbf16, #tpu.memory_space<vmem>>, vector<128x256xbf16>
    %c0_2 = arith.constant 0 : index
    %c0_3 = arith.constant 0 : index
    %4 = vector.load %arg15[%c0_2, %c0_3] : memref<128x128xf32, #tpu.memory_space<vmem>>, vector<128x128xf32>
    %c0_4 = arith.constant 0 : index
    %c0_5 = arith.constant 0 : index
    %c0_6 = arith.constant 0 : index
    %5 = vector.load %arg5[%c0_4, %c0_5, %c0_6] : memref<2x128x128xbf16, #tpu.memory_space<vmem>>, vector<1x128x128xbf16>
    %6 = vector.shape_cast %5 : vector<1x128x128xbf16> to vector<128x128xbf16>
    %7 = vector.extract_strided_slice %3 {offsets = [0, 0], sizes = [128, 128], strides = [1, 1]} : vector<128x256xbf16> to vector<128x128xbf16>
    %cst = arith.constant dense<0.000000e+00> : vector<128x128xf32>
    %8 = tpu.matmul %6, %7, %cst {dimension_numbers = #tpu.dot_dimension_numbers<[1], [0], [0], [1], [0, 0, 1, 1], [], []>} : vector<128x128xbf16>, vector<128x128xbf16>, vector<128x128xf32> -> vector<128x128xf32>
    %9 = arith.addf %4, %8 : vector<128x128xf32>
    %c0_7 = arith.constant 0 : index
    %c0_8 = arith.constant 0 : index
    %10 = vector.load %arg15[%c0_7, %c0_8] : memref<128x128xf32, #tpu.memory_space<vmem>>, vector<128x128xf32>
    tpu.vector_store %arg15[%c0_7, %c0_8], %9 {strides = array<i32>} : memref<128x128xf32, #tpu.memory_space<vmem>>, vector<128x128xf32>,
    %c0_9 = arith.constant 0 : index
    %c0_10 = arith.constant 0 : index
    %11 = vector.load %arg16[%c0_9, %c0_10] : memref<128x128xf32, #tpu.memory_space<vmem>>, vector<128x128xf32>
    %c1 = arith.constant 1 : index
    %c0_11 = arith.constant 0 : index
    %c0_12 = arith.constant 0 : index
    %12 = vector.load %arg5[%c1, %c0_11, %c0_12] : memref<2x128x128xbf16, #tpu.memory_space<vmem>>, vector<1x128x128xbf16>
    %13 = vector.shape_cast %12 : vector<1x128x128xbf16> to vector<128x128xbf16>
    %14 = vector.extract_strided_slice %3 {offsets = [0, 128], sizes = [128, 128], strides = [1, 1]} : vector<128x256xbf16> to vector<128x128xbf16>
    %cst_13 = arith.constant dense<0.000000e+00> : vector<128x128xf32>
    %15 = tpu.matmul %13, %14, %cst_13 {dimension_numbers = #tpu.dot_dimension_numbers<[1], [0], [0], [1], [0, 0, 1, 1], [], []>} : vector<128x128xbf16>, vector<128x128xbf16>, vector<128x128xf32> -> vector<128x128xf32>
    %16 = arith.addf %11, %15 : vector<128x128xf32>
    %c0_14 = arith.constant 0 : index
    %c0_15 = arith.constant 0 : index
    %17 = vector.load %arg16[%c0_14, %c0_15] : memref<128x128xf32, #tpu.memory_space<vmem>>, vector<128x128xf32>
    tpu.vector_store %arg16[%c0_14, %c0_15], %16 {strides = array<i32>} : memref<128x128xf32, #tpu.memory_space<vmem>>, vector<128x128xf32>,
    %c2_i32 = arith.constant 2 : i32
    %18 = arith.cmpi eq, %arg1, %c2_i32 : i32
    %19 = arith.extui %18 : i1 to i32
    %c0_i32_16 = arith.constant 0 : i32
    %20 = arith.cmpi ne, %19, %c0_i32_16 : i32
    scf.if %20 {
      %c8 = arith.constant 8 : index
      %c0_17 = arith.constant 0 : index
      %21 = vector.load %arg12[%c8, %c0_17] : memref<9x128xf32, #tpu.memory_space<vmem>>, vector<1x128xf32>
      %c0_18 = arith.constant 0 : index
      %c0_19 = arith.constant 0 : index
      %22 = vector.load %arg12[%c0_18, %c0_19] : memref<9x128xf32, #tpu.memory_space<vmem>>, vector<1x128xf32>
      %c1_20 = arith.constant 1 : index
      %c0_21 = arith.constant 0 : index
      %23 = vector.load %arg12[%c1_20, %c0_21] : memref<9x128xf32, #tpu.memory_space<vmem>>, vector<1x128xf32>
      %c2 = arith.constant 2 : index
      %c0_22 = arith.constant 0 : index
      %24 = vector.load %arg12[%c2, %c0_22] : memref<9x128xf32, #tpu.memory_space<vmem>>, vector<1x128xf32>
      %c3 = arith.constant 3 : index
      %c0_23 = arith.constant 0 : index
      %25 = vector.load %arg12[%c3, %c0_23] : memref<9x128xf32, #tpu.memory_space<vmem>>, vector<1x128xf32>
      %c4 = arith.constant 4 : index
      %c0_24 = arith.constant 0 : index
      %26 = vector.load %arg12[%c4, %c0_24] : memref<9x128xf32, #tpu.memory_space<vmem>>, vector<1x128xf32>
      %c5 = arith.constant 5 : index
      %c0_25 = arith.constant 0 : index
      %27 = vector.load %arg12[%c5, %c0_25] : memref<9x128xf32, #tpu.memory_space<vmem>>, vector<1x128xf32>
      %c6 = arith.constant 6 : index
      %c0_26 = arith.constant 0 : index
      %28 = vector.load %arg12[%c6, %c0_26] : memref<9x128xf32, #tpu.memory_space<vmem>>, vector<1x128xf32>
      %c7 = arith.constant 7 : index
      %c0_27 = arith.constant 0 : index
      %29 = vector.load %arg12[%c7, %c0_27] : memref<9x128xf32, #tpu.memory_space<vmem>>, vector<1x128xf32>
      %c0_28 = arith.constant 0 : index
      %c0_29 = arith.constant 0 : index
      %30 = vector.load %arg3[%c0_28, %c0_29] : memref<128x256xf32, #tpu.memory_space<vmem>>, vector<128x256xf32>
      %31 = vector.extract_strided_slice %30 {offsets = [0, 0], sizes = [128, 128], strides = [1, 1]} : vector<128x256xf32> to vector<128x128xf32>
      %32 = vector.extract_strided_slice %30 {offsets = [0, 128], sizes = [128, 128], strides = [1, 1]} : vector<128x256xf32> to vector<128x128xf32>
      %c0_30 = arith.constant 0 : index
      %c0_31 = arith.constant 0 : index
      %33 = vector.load %arg15[%c0_30, %c0_31] : memref<128x128xf32, #tpu.memory_space<vmem>>, vector<128x128xf32>
      %c0_32 = arith.constant 0 : index
      %c0_33 = arith.constant 0 : index
      %34 = vector.load %arg7[%c0_32, %c0_33] : memref<128x128xf32, #tpu.memory_space<vmem>>, vector<128x128xf32>
      %cst_34 = arith.constant dense<0.000000e+00> : vector<128x128xf32>
      %35 = tpu.matmul %33, %34, %cst_34 {dimension_numbers = #tpu.dot_dimension_numbers<[1], [0], [0], [1], [0, 0, 1, 1], [], []>} : vector<128x128xf32>, vector<128x128xf32>, vector<128x128xf32> -> vector<128x128xf32>
      %36 = vector.broadcast %27 : vector<1x128xf32> to vector<128x128xf32>
      %37 = arith.addf %35, %36 : vector<128x128xf32>
      %cst_35 = arith.constant 0.000000e+00 : f32
      %38 = vector.broadcast %cst_35 : f32 to vector<128x128xf32>
      %39 = arith.maximumf %37, %38 : vector<128x128xf32>
      %c0_36 = arith.constant 0 : index
      %c0_37 = arith.constant 0 : index
      %40 = vector.load %arg16[%c0_36, %c0_37] : memref<128x128xf32, #tpu.memory_space<vmem>>, vector<128x128xf32>
      %c0_38 = arith.constant 0 : index
      %c0_39 = arith.constant 0 : index
      %41 = vector.load %arg8[%c0_38, %c0_39] : memref<128x128xf32, #tpu.memory_space<vmem>>, vector<128x128xf32>
      %cst_40 = arith.constant dense<0.000000e+00> : vector<128x128xf32>
      %42 = tpu.matmul %40, %41, %cst_40 {dimension_numbers = #tpu.dot_dimension_numbers<[1], [0], [0], [1], [0, 0, 1, 1], [], []>} : vector<128x128xf32>, vector<128x128xf32>, vector<128x128xf32> -> vector<128x128xf32>
      %43 = vector.broadcast %28 : vector<1x128xf32> to vector<128x128xf32>
      %44 = arith.addf %42, %43 : vector<128x128xf32>
      %cst_41 = arith.constant 0.000000e+00 : f32
      %45 = vector.broadcast %cst_41 : f32 to vector<128x128xf32>
      %46 = arith.maximumf %44, %45 : vector<128x128xf32>
      %47 = arith.addf %39, %31 : vector<128x128xf32>
      %48 = arith.addf %46, %32 : vector<128x128xf32>
      %c0_42 = arith.constant 0 : index
      %c0_43 = arith.constant 0 : index
      %49 = vector.load %arg2[%c0_42, %c0_43] : memref<128x128xf32, #tpu.memory_space<vmem>>, vector<128x128xf32>
      %c0_44 = arith.constant 0 : index
      %c0_45 = arith.constant 0 : index
      %50 = vector.load %arg6[%c0_44, %c0_45] : memref<128x128xf32, #tpu.memory_space<vmem>>, vector<128x128xf32>
      %cst_46 = arith.constant dense<0.000000e+00> : vector<128x128xf32>
      %51 = tpu.matmul %49, %50, %cst_46 {dimension_numbers = #tpu.dot_dimension_numbers<[1], [0], [0], [1], [0, 0, 1, 1], [], []>} : vector<128x128xf32>, vector<128x128xf32>, vector<128x128xf32> -> vector<128x128xf32>
      %52 = vector.broadcast %22 : vector<1x128xf32> to vector<128x128xf32>
      %53 = arith.addf %51, %52 : vector<128x128xf32>
      %cst_47 = arith.constant dense<0.000000e+00> : vector<128xf32>
      %54 = vector.multi_reduction <add>, %53, %cst_47 [1] : vector<128x128xf32> to vector<128xf32>
      %55 = vector.shape_cast %54 : vector<128xf32> to vector<128x1xf32>
      %cst_48 = arith.constant 3.125000e-02 : f32
      %56 = vector.broadcast %cst_48 : f32 to vector<128x1xf32>
      %57 = arith.mulf %55, %56 : vector<128x1xf32>
      %58 = vector.broadcast %57 : vector<128x1xf32> to vector<128x128xf32>
      %59 = arith.subf %53, %58 : vector<128x128xf32>
      %60 = vector.broadcast %21 : vector<1x128xf32> to vector<128x128xf32>
      %61 = arith.mulf %59, %60 : vector<128x128xf32>
      %62 = arith.mulf %61, %61 : vector<128x128xf32>
      %cst_49 = arith.constant dense<0.000000e+00> : vector<128xf32>
      %63 = vector.multi_reduction <add>, %62, %cst_49 [1] : vector<128x128xf32> to vector<128xf32>
      %64 = vector.shape_cast %63 : vector<128xf32> to vector<128x1xf32>
      %cst_50 = arith.constant 3.125000e-02 : f32
      %65 = vector.broadcast %cst_50 : f32 to vector<128x1xf32>
      %66 = arith.mulf %64, %65 : vector<128x1xf32>
      %cst_51 = arith.constant 9.99999974E-6 : f32
      %67 = vector.broadcast %cst_51 : f32 to vector<128x1xf32>
      %68 = arith.addf %66, %67 : vector<128x1xf32>
      %69 = math.rsqrt %68 : vector<128x1xf32>
      %70 = vector.broadcast %69 : vector<128x1xf32> to vector<128x128xf32>
      %71 = arith.mulf %61, %70 : vector<128x128xf32>
      %72 = vector.broadcast %23 : vector<1x128xf32> to vector<128x128xf32>
      %73 = arith.mulf %71, %72 : vector<128x128xf32>
      %74 = vector.broadcast %24 : vector<1x128xf32> to vector<128x128xf32>
      %75 = arith.addf %73, %74 : vector<128x128xf32>
      %cst_52 = arith.constant 0.000000e+00 : f32
      %76 = vector.broadcast %cst_52 : f32 to vector<128x128xf32>
      %77 = arith.maximumf %75, %76 : vector<128x128xf32>
      %cst_53 = arith.constant 5.000000e-01 : f32
      %78 = vector.broadcast %cst_53 : f32 to vector<1x128xf32>
      %79 = arith.mulf %78, %29 : vector<1x128xf32>
      %cst_54 = arith.constant 5.000000e-01 : f32
      %80 = vector.broadcast %cst_54 : f32 to vector<128x128xf32>
      %81 = arith.mulf %80, %77 : vector<128x128xf32>
      %82 = vector.broadcast %79 : vector<1x128xf32> to vector<128x128xf32>
      %83 = arith.addf %82, %81 : vector<128x128xf32>
      %cst_55 = arith.constant dense<0.000000e+00> : vector<128xf32>
      %84 = vector.multi_reduction <add>, %83, %cst_55 [1] : vector<128x128xf32> to vector<128xf32>
      %85 = vector.shape_cast %84 : vector<128xf32> to vector<128x1xf32>
      %cst_56 = arith.constant 3.125000e-02 : f32
      %86 = vector.broadcast %cst_56 : f32 to vector<128x1xf32>
      %87 = arith.mulf %85, %86 : vector<128x1xf32>
      %88 = vector.broadcast %87 : vector<128x1xf32> to vector<128x128xf32>
      %89 = arith.subf %83, %88 : vector<128x128xf32>
      %90 = vector.broadcast %21 : vector<1x128xf32> to vector<128x128xf32>
      %91 = arith.mulf %89, %90 : vector<128x128xf32>
      %92 = arith.mulf %91, %91 : vector<128x128xf32>
      %cst_57 = arith.constant dense<0.000000e+00> : vector<128xf32>
      %93 = vector.multi_reduction <add>, %92, %cst_57 [1] : vector<128x128xf32> to vector<128xf32>
      %94 = vector.shape_cast %93 : vector<128xf32> to vector<128x1xf32>
      %cst_58 = arith.constant 3.125000e-02 : f32
      %95 = vector.broadcast %cst_58 : f32 to vector<128x1xf32>
      %96 = arith.mulf %94, %95 : vector<128x1xf32>
      %cst_59 = arith.constant 9.99999974E-6 : f32
      %97 = vector.broadcast %cst_59 : f32 to vector<128x1xf32>
      %98 = arith.addf %96, %97 : vector<128x1xf32>
      %99 = math.rsqrt %98 : vector<128x1xf32>
      %100 = vector.broadcast %99 : vector<128x1xf32> to vector<128x128xf32>
      %101 = arith.mulf %91, %100 : vector<128x128xf32>
      %102 = vector.broadcast %25 : vector<1x128xf32> to vector<128x128xf32>
      %103 = arith.mulf %101, %102 : vector<128x128xf32>
      %104 = vector.broadcast %26 : vector<1x128xf32> to vector<128x128xf32>
      %105 = arith.addf %103, %104 : vector<128x128xf32>
      %cst_60 = arith.constant 0.000000e+00 : f32
      %106 = vector.broadcast %cst_60 : f32 to vector<128x128xf32>
      %107 = arith.maximumf %105, %106 : vector<128x128xf32>
      %c0_61 = arith.constant 0 : index
      %c0_62 = arith.constant 0 : index
      %108 = vector.load %arg9[%c0_61, %c0_62] : memref<128x128xf32, #tpu.memory_space<vmem>>, vector<128x128xf32>
      %cst_63 = arith.constant dense<0.000000e+00> : vector<128x128xf32>
      %109 = tpu.matmul %107, %108, %cst_63 {dimension_numbers = #tpu.dot_dimension_numbers<[1], [0], [0], [1], [0, 0, 1, 1], [], []>} : vector<128x128xf32>, vector<128x128xf32>, vector<128x128xf32> -> vector<128x128xf32>
      %c0_64 = arith.constant 0 : index
      %c0_65 = arith.constant 0 : index
      %110 = vector.load %arg10[%c0_64, %c0_65] : memref<128x128xf32, #tpu.memory_space<vmem>>, vector<128x128xf32>
      %cst_66 = arith.constant dense<0.000000e+00> : vector<128x128xf32>
      %111 = tpu.matmul %47, %110, %cst_66 {dimension_numbers = #tpu.dot_dimension_numbers<[1], [0], [0], [1], [0, 0, 1, 1], [], []>} : vector<128x128xf32>, vector<128x128xf32>, vector<128x128xf32> -> vector<128x128xf32>
      %112 = arith.addf %109, %111 : vector<128x128xf32>
      %c0_67 = arith.constant 0 : index
      %c0_68 = arith.constant 0 : index
      %113 = vector.load %arg11[%c0_67, %c0_68] : memref<128x128xf32, #tpu.memory_space<vmem>>, vector<128x128xf32>
      %cst_69 = arith.constant dense<0.000000e+00> : vector<128x128xf32>
      %114 = tpu.matmul %48, %113, %cst_69 {dimension_numbers = #tpu.dot_dimension_numbers<[1], [0], [0], [1], [0, 0, 1, 1], [], []>} : vector<128x128xf32>, vector<128x128xf32>, vector<128x128xf32> -> vector<128x128xf32>
      %115 = arith.addf %112, %114 : vector<128x128xf32>
      %c0_70 = arith.constant 0 : index
      %c0_71 = arith.constant 0 : index
      %116 = vector.load %arg13[%c0_70, %c0_71] : memref<1x128xf32, #tpu.memory_space<vmem>>, vector<1x128xf32>
      %117 = vector.broadcast %116 : vector<1x128xf32> to vector<128x128xf32>
      %118 = arith.addf %115, %117 : vector<128x128xf32>
      %119 = math.tanh %118 : vector<128x128xf32>
      %c0_72 = arith.constant 0 : index
      %c0_73 = arith.constant 0 : index
      %120 = vector.load %arg14[%c0_72, %c0_73] : memref<128x128xf32, #tpu.memory_space<vmem>>, vector<128x128xf32>
      tpu.vector_store %arg14[%c0_72, %c0_73], %119 {strides = array<i32>} : memref<128x128xf32, #tpu.memory_space<vmem>>, vector<128x128xf32>,
    } else {
    }
    return
  }
  func.func @transform_0(%arg0: i32, %arg1: i32) -> (i32, i32) {
    %c0_i32 = arith.constant 0 : i32
    %c0_i32_0 = arith.constant 0 : i32
    return %arg0, %c0_i32 : i32, i32
  }
  func.func @transform_1(%arg0: i32, %arg1: i32) -> (i32, i32) {
    %c0_i32 = arith.constant 0 : i32
    %c0_i32_0 = arith.constant 0 : i32
    return %arg0, %c0_i32 : i32, i32
  }
  func.func @transform_2(%arg0: i32, %arg1: i32) -> (i32, i32) {
    %c0_i32 = arith.constant 0 : i32
    %c0_i32_0 = arith.constant 0 : i32
    return %arg1, %c0_i32 : i32, i32
  }
  func.func @transform_3(%arg0: i32, %arg1: i32) -> (i32, i32, i32) {
    %c0_i32 = arith.constant 0 : i32
    %c0_i32_0 = arith.constant 0 : i32
    return %c0_i32, %arg0, %arg1 : i32, i32, i32
  }
  func.func @transform_4(%arg0: i32, %arg1: i32) -> (i32, i32) {
    %c0_i32 = arith.constant 0 : i32
    %c0_i32_0 = arith.constant 0 : i32
    %c0_i32_1 = arith.constant 0 : i32
    return %c0_i32, %c0_i32_0 : i32, i32
  }
  func.func @transform_5(%arg0: i32, %arg1: i32) -> (i32, i32) {
    %c0_i32 = arith.constant 0 : i32
    %c0_i32_0 = arith.constant 0 : i32
    %c0_i32_1 = arith.constant 0 : i32
    return %c0_i32, %c0_i32_0 : i32, i32
  }
  func.func @transform_6(%arg0: i32, %arg1: i32) -> (i32, i32) {
    %c0_i32 = arith.constant 0 : i32
    %c0_i32_0 = arith.constant 0 : i32
    %c0_i32_1 = arith.constant 0 : i32
    return %c0_i32, %c0_i32_0 : i32, i32
  }
  func.func @transform_7(%arg0: i32, %arg1: i32) -> (i32, i32) {
    %c0_i32 = arith.constant 0 : i32
    %c0_i32_0 = arith.constant 0 : i32
    %c0_i32_1 = arith.constant 0 : i32
    return %c0_i32, %c0_i32_0 : i32, i32
  }
  func.func @transform_8(%arg0: i32, %arg1: i32) -> (i32, i32) {
    %c0_i32 = arith.constant 0 : i32
    %c0_i32_0 = arith.constant 0 : i32
    %c0_i32_1 = arith.constant 0 : i32
    return %c0_i32, %c0_i32_0 : i32, i32
  }
  func.func @transform_9(%arg0: i32, %arg1: i32) -> (i32, i32) {
    %c0_i32 = arith.constant 0 : i32
    %c0_i32_0 = arith.constant 0 : i32
    %c0_i32_1 = arith.constant 0 : i32
    return %c0_i32, %c0_i32_0 : i32, i32
  }
  func.func @transform_10(%arg0: i32, %arg1: i32) -> (i32, i32) {
    %c0_i32 = arith.constant 0 : i32
    %c0_i32_0 = arith.constant 0 : i32
    %c0_i32_1 = arith.constant 0 : i32
    return %c0_i32, %c0_i32_0 : i32, i32
  }
  func.func @transform_11(%arg0: i32, %arg1: i32) -> (i32, i32) {
    %c0_i32 = arith.constant 0 : i32
    %c0_i32_0 = arith.constant 0 : i32
    %c0_i32_1 = arith.constant 0 : i32
    return %c0_i32, %c0_i32_0 : i32, i32
  }
  func.func @transform_12(%arg0: i32, %arg1: i32) -> (i32, i32) {
    %c0_i32 = arith.constant 0 : i32
    %c0_i32_0 = arith.constant 0 : i32
    return %arg0, %c0_i32 : i32, i32
  }
}

</mosaic_0001>

<bundles_post_ra>
// kernel: sgformer_seed_forward.2
= control target key start
LH: loop header
LB: loop body
LE: loop exit
PB: predicated region body
PF: predicated region fallthrough
CT: control target
= control target key end

     0   :  { %s834_s15 = smov 0   ;;  %s1069_s0 = inlined_call_operand.vmem [shape: f32[384,128], index: 0, kind: input, shape index: {}]   ;;  %s1070_s1 = inlined_call_operand.vmem [shape: f32[128,256], index: 1, kind: input, shape index: {}]   ;;  %s1071_s2 = inlined_call_operand.vmem [shape: f32[1,256], index: 2, kind: input, shape index: {}]   ;;  %s1072_s3 = inlined_call_operand.vmem [shape: f32[384,256], index: 3, kind: output, shape index: {0}]   ;;  %s1073_s4 = inlined_call_operand.vmem [shape: bf16[384,256], index: 4, kind: output, shape index: {1}]  }
   0x1 LB: > { %s710_s16 = sadd.s32 4294967295, %s806_s15   ;;  %p714_p0 = scmp.ge.s32.totalorder %s806_s15, 1  ;;  %s806_s15 = sphi %s834_s15, %s15_s15  }
   0x2   : > { %p166_p1 = scmp.lt.s32.totalorder %s806_s15, 4 }
   0x4   : > { %p167_p2 = pnand %p714_p0, %p166_p1 }
   0x5   : > { %s715_s27 = sshll.u32 (!%p167_p2), %s710_s16, 4 }
   0x6   : > { %170 = sbr.rel (%p167_p2) target bundleno = 276 (0x114), region = 32  ;;  %p200_p3 = scmp.lt.s32.totalorder (!%p167_p2), %s715_s27, 47 }
   0xb   : > { %v266_v0 = vld [vmem:[%s1070_s1 + $0xf8] sm:$0xff]  ;;  %v265_v1 = vld [vmem:[%s1070_s1 + $0xf0] sm:$0xff]  ;;  %v264_v2 = vld [vmem:[%s1070_s1 + $0xe8] sm:$0xff]  ;;  %s1075_s27 = smov (!%p200_p3, %s715_s27), 47  ;;  %v808_v34 = vmov 0.0   ;;  %v269_v49 = vlaneseq }
   0xc   : > { %279 = vmatprep.subr.mxu0 %v266_v0  ;;  %759 = vmatprep.subr.mxu1 %v266_v0  ;;  %v263_v3 = vld [vmem:[%s1070_s1 + $0xe0] sm:$0xff]  ;;  %v262_v4 = vld [vmem:[%s1070_s1 + $0xd8] sm:$0xff]  ;;  %v261_v5 = vld [vmem:[%s1070_s1 + $0xd0] sm:$0xff]  ;;  %s716_s25 = sshll.u32 %s1075_s27, 3  ;;  %s741_s13 = sshll.u32 %s1075_s27, 4 }
   0xd   : > { %280 = vmatpush1.msra.mxu0 %v265_v1  ;;  %775 = vmatpush1.msra.mxu1 %v265_v1  ;;  %v260_v6 = vld [vmem:[%s1070_s1 + $0xc8] sm:$0xff]  ;;  %v259_v7 = vld [vmem:[%s1070_s1 + $0xc0] sm:$0xff]  ;;  %v258_v8 = vld [vmem:[%s1070_s1 + $0xb8] sm:$0xff]  ;;  %s945_s8 = scalar_lea.vmem %s1069_s0, %s716_s25  ;;  %v270_v50 = vshrl.u32 %v269_v49, 7  ;;  %s979_s18 = scalar_lea.vmem %s1072_s3, %s741_s13 }
   0xe   : > { %281 = vmatprep.subr.mxu0 %v264_v2  ;;  %760 = vmatprep.subr.mxu1 %v264_v2  ;;  %v257_v9 = vld [vmem:[%s1070_s1 + $0xb0] sm:$0xff]  ;;  %v256_v10 = vld [vmem:[%s1070_s1 + $0xa8] sm:$0xff]  ;;  %v255_v11 = vld [vmem:[%s1070_s1 + $0xa0] sm:$0xff]  ;;  %s992_s21 = scalar_lea.vmem %s1073_s4, %s716_s25 }
   0xf   : > { %282 = vmatpush1.msra.mxu0 %v263_v3  ;;  %776 = vmatpush1.msra.mxu1 %v263_v3  ;;  %v254_v12 = vld [vmem:[%s1070_s1 + $0x98] sm:$0xff]  ;;  %v253_v13 = vld [vmem:[%s1070_s1 + $0x90] sm:$0xff]  ;;  %v252_v14 = vld [vmem:[%s1070_s1 + $0x88] sm:$0xff]  ;;  %v271_v51 = vsub.s32 0, %v270_v50  ;;  %v275_v53 = vsub.s32 1, %v270_v50 }
  0x10   : > { %283 = vmatprep.subr.mxu0 %v262_v4  ;;  %761 = vmatprep.subr.mxu1 %v262_v4  ;;  %v251_v15 = vld [vmem:[%s1070_s1 + $0x80] sm:$0xff]  ;;  %v250_v16 = vld [vmem:[%s1070_s1 + $0x78] sm:$0xff]  ;;  %v249_v17 = vld [vmem:[%s1070_s1 + $0x70] sm:$0xff] }
  0x11   : > { %284 = vmatpush1.msra.mxu0 %v261_v5  ;;  %777 = vmatpush1.msra.mxu1 %v261_v5  ;;  %v248_v18 = vld [vmem:[%s1070_s1 + $0x68] sm:$0xff]  ;;  %v247_v19 = vld [vmem:[%s1070_s1 + $0x60] sm:$0xff]  ;;  %v246_v20 = vld [vmem:[%s1070_s1 + $0x58] sm:$0xff] }
  0x12   : > { %285 = vmatprep.subr.mxu0 %v260_v6  ;;  %762 = vmatprep.subr.mxu1 %v260_v6  ;;  %v245_v21 = vld [vmem:[%s1070_s1 + $0x50] sm:$0xff]  ;;  %v244_v22 = vld [vmem:[%s1070_s1 + $0x48] sm:$0xff]  ;;  %v243_v23 = vld [vmem:[%s1070_s1 + $0x40] sm:$0xff] }
  0x13   : > { %286 = vmatpush1.msra.mxu0 %v259_v7  ;;  %778 = vmatpush1.msra.mxu1 %v259_v7  ;;  %v242_v24 = vld [vmem:[%s1070_s1 + $0x38] sm:$0xff]  ;;  %v241_v25 = vld [vmem:[%s1070_s1 + $0x30] sm:$0xff]  ;;  %v240_v26 = vld [vmem:[%s1070_s1 + $0x28] sm:$0xff] }
  0x14   : > { %287 = vmatprep.subr.mxu0 %v258_v8  ;;  %763 = vmatprep.subr.mxu1 %v258_v8  ;;  %v239_v27 = vld [vmem:[%s1070_s1 + $0x20] sm:$0xff]  ;;  %v238_v28 = vld [vmem:[%s1070_s1 + $0x18] sm:$0xff]  ;;  %v237_v29 = vld [vmem:[%s1070_s1 + $0x10] sm:$0xff] }
  0x15   : > { %288 = vmatpush1.msra.mxu0 %v257_v9  ;;  %779 = vmatpush1.msra.mxu1 %v257_v9  ;;  %v236_v30 = vld [vmem:[%s1070_s1 + $0x8] sm:$0xff]  ;;  %v235_v31 = vld [vmem:[%s1070_s1] sm:$0xff]  ;;  %v221_v37 = vld [vmem:[%s945_s8 + $0x10] sm:$0xff] }
  0x16   : > { %289 = vmatprep.subr.mxu0 %v256_v10  ;;  %764 = vmatprep.subr.mxu1 %v256_v10  ;;  %v219_v32 = vld [vmem:[%s945_s8] sm:$0xff]  ;;  %v220_v35 = vld [vmem:[%s945_s8 + $0x8] sm:$0xff]  ;;  %v229_v38 = vld [vmem:[%s945_s8 + $0x50] sm:$0xff] }
  0x17   : > { %290 = vmatpush1.msra.mxu0 %v255_v11  ;;  %780 = vmatpush1.msra.mxu1 %v255_v11  ;;  %v227_v33 = vld [vmem:[%s945_s8 + $0x40] sm:$0xff]  ;;  %v228_v36 = vld [vmem:[%s945_s8 + $0x48] sm:$0xff]  ;;  %v222_v39 = vld [vmem:[%s945_s8 + $0x18] sm:$0xff] }
  0x18   : > { %291 = vmatprep.subr.mxu0 %v254_v12  ;;  %765 = vmatprep.subr.mxu1 %v254_v12  ;;  %v230_v40 = vld [vmem:[%s945_s8 + $0x58] sm:$0xff]  ;;  %v223_v41 = vld [vmem:[%s945_s8 + $0x20] sm:$0xff]  ;;  %v224_v43 = vld [vmem:[%s945_s8 + $0x28] sm:$0xff] }
  0x19   : > { %292 = vmatpush1.msra.mxu0 %v253_v13  ;;  %781 = vmatpush1.msra.mxu1 %v253_v13  ;;  %v231_v42 = vld [vmem:[%s945_s8 + $0x60] sm:$0xff]  ;;  %v232_v44 = vld [vmem:[%s945_s8 + $0x68] sm:$0xff]  ;;  %v225_v45 = vld [vmem:[%s945_s8 + $0x30] sm:$0xff] }
  0x1a   : > { %293 = vmatprep.subr.mxu0 %v252_v14  ;;  %766 = vmatprep.subr.mxu1 %v252_v14  ;;  %v233_v46 = vld [vmem:[%s945_s8 + $0x70] sm:$0xff]  ;;  %v226_v47 = vld [vmem:[%s945_s8 + $0x38] sm:$0xff]  ;;  %v267_v52 = vld [vmem:[%s1071_s2] sm:$0x3] }
  0x1b   : > { %294 = vmatpush1.msra.mxu0 %v251_v15  ;;  %782 = vmatpush1.msra.mxu1 %v251_v15  ;;  %v234_v48 = vld [vmem:[%s945_s8 + $0x78] sm:$0xff]  ;;  %v969_v54 = vrot.slane %v267_v52, %v271_v51  ;;  %v972_v55 = vrot.slane %v267_v52, %v275_v53 }
  0x1c   : > { %295 = vmatprep.subr.mxu0 %v250_v16  ;;  %767 = vmatprep.subr.mxu1 %v250_v16 }
  0x1d   : > { %296 = vmatpush1.msra.mxu0 %v249_v17  ;;  %783 = vmatpush1.msra.mxu1 %v249_v17 }
  0x1e   : > { %297 = vmatprep.subr.mxu0 %v248_v18  ;;  %768 = vmatprep.subr.mxu1 %v248_v18 }
  0x1f   : > { %298 = vmatpush1.msra.mxu0 %v247_v19  ;;  %784 = vmatpush1.msra.mxu1 %v247_v19 }
  0x20   : > { %299 = vmatprep.subr.mxu0 %v246_v20  ;;  %769 = vmatprep.subr.mxu1 %v246_v20 }
  0x21   : > { %300 = vmatpush1.msra.mxu0 %v245_v21  ;;  %785 = vmatpush1.msra.mxu1 %v245_v21 }
  0x22   : > { %301 = vmatprep.subr.mxu0 %v244_v22  ;;  %770 = vmatprep.subr.mxu1 %v244_v22 }
  0x23   : > { %302 = vmatpush1.msra.mxu0 %v243_v23  ;;  %786 = vmatpush1.msra.mxu1 %v243_v23 }
  0x24   : > { %303 = vmatprep.subr.mxu0 %v242_v24  ;;  %771 = vmatprep.subr.mxu1 %v242_v24 }
  0x25   : > { %304 = vmatpush1.msra.mxu0 %v241_v25  ;;  %787 = vmatpush1.msra.mxu1 %v241_v25 }
  0x26   : > { %305 = vmatprep.subr.mxu0 %v240_v26  ;;  %772 = vmatprep.subr.mxu1 %v240_v26 }
  0x27   : > { %306 = vmatpush1.msra.mxu0 %v239_v27  ;;  %788 = vmatpush1.msra.mxu1 %v239_v27 }
  0x28   : > { %307 = vmatprep.subr.mxu0 %v238_v28  ;;  %773 = vmatprep.subr.mxu1 %v238_v28 }
  0x29   : > { %308 = vmatpush1.msra.mxu0 %v237_v29  ;;  %789 = vmatpush1.msra.mxu1 %v237_v29 }
  0x2a   : > { %309 = vmatprep.subr.mxu0 %v236_v30  ;;  %774 = vmatprep.subr.mxu1 %v236_v30 }
  0x2b   : > { %310 = vmatpush1.msra.mxu0 %v235_v31  ;;  %790 = vmatpush1.msra.mxu1 %v235_v31 }
  0x2c   : > { %343 = vmatprep.mubr.f32.mxu0 %v808_v34  ;;  %391 = vmatprep.mubr.f32.mxu1 %v808_v34 }
  0x2d   : > { %344 = vmatmul.mubr.f32.vlgmr.msra.gmra.mxu0 %v219_v32  ;;  %392 = vmatmul.mubr.f32.vlgmr.msra.gmra.mxu1 %v227_v33 }
  0x2e   : > { %349 = vmatprep.mubr.f32.mxu0 %v808_v34  ;;  %397 = vmatprep.mubr.f32.mxu1 %v808_v34 }
  0x31   : > { %350 = vmatmul.mubr.f32.gmra.mxu0 %v220_v35  ;;  %398 = vmatmul.mubr.f32.gmra.mxu1 %v228_v36 }
  0x32   : > { %355 = vmatprep.mubr.f32.mxu0 %v808_v34  ;;  %403 = vmatprep.mubr.f32.mxu1 %v808_v34 }
  0x35   : > { %356 = vmatmul.mubr.f32.gmra.mxu0 %v221_v37  ;;  %404 = vmatmul.mubr.f32.gmra.mxu1 %v229_v38 }
  0x36   : > { %361 = vmatprep.mubr.f32.mxu0 %v808_v34  ;;  %409 = vmatprep.mubr.f32.mxu1 %v808_v34 }
  0x39   : > { %362 = vmatmul.mubr.f32.gmra.mxu0 %v222_v39  ;;  %410 = vmatmul.mubr.f32.gmra.mxu1 %v230_v40 }
  0x3a   : > { %367 = vmatprep.mubr.f32.mxu0 %v808_v34  ;;  %415 = vmatprep.mubr.f32.mxu1 %v808_v34 }
  0x3d   : > { %368 = vmatmul.mubr.f32.gmra.mxu0 %v223_v41  ;;  %416 = vmatmul.mubr.f32.gmra.mxu1 %v231_v42 }
  0x3e   : > { %373 = vmatprep.mubr.f32.mxu0 %v808_v34  ;;  %421 = vmatprep.mubr.f32.mxu1 %v808_v34 }
  0x41   : > { %374 = vmatmul.mubr.f32.gmra.mxu0 %v224_v43  ;;  %422 = vmatmul.mubr.f32.gmra.mxu1 %v232_v44 }
  0x42   : > { %379 = vmatprep.mubr.f32.mxu0 %v808_v34  ;;  %427 = vmatprep.mubr.f32.mxu1 %v808_v34 }
  0x45   : > { %380 = vmatmul.mubr.f32.gmra.mxu0 %v225_v45  ;;  %428 = vmatmul.mubr.f32.gmra.mxu1 %v233_v46 }
  0x46   : > { %385 = vmatprep.mubr.f32.mxu0 %v808_v34  ;;  %433 = vmatprep.mubr.f32.mxu1 %v808_v34 }
  0x49   : > { %386 = vmatmul.mubr.f32.gmra.mxu0 %v226_v47  ;;  %434 = vmatmul.mubr.f32.gmra.mxu1 %v234_v48 }
  0xed   : > { %v345_v56 = vpop.f32.mrf.mxu0  ;;  %v393_v57 = vpop.f32.mrf.mxu1 }
  0xee   : > { %v346_v58 = vadd.f32 %v345_v56, %v969_v54  ;;  %v394_v59 = vadd.f32 %v393_v57, %v969_v54 }
  0xef   : > { %v347_v60 = vpop.f32.mrf.mxu0  ;;  %v395_v61 = vpop.f32.mrf.mxu1 }
  0xf0   : > { %v440_v62 = vmax.f32 %v346_v58, 0.0  ;;  %v456_v63 = vmax.f32 %v394_v59, 0.0  ;;  %v348_v0 = vadd.f32 %v347_v60, %v972_v55  ;;  %v396_v1 = vadd.f32 %v395_v61, %v972_v55 }
  0xf1   : > { %v351_v2 = vpop.f32.mrf.mxu0  ;;  %v399_v3 = vpop.f32.mrf.mxu1 }
  0xf2   : > { %472 = vst [vmem:[%s979_s18] sm:$0xff] %v440_v62  ;;  %488 = vst [vmem:[%s979_s18 + $0x80] sm:$0xff] %v456_v63  ;;  %v441_v4 = vmax.f32 %v348_v0, 0.0  ;;  %v457_v5 = vmax.f32 %v396_v1, 0.0  ;;  %v352_v6 = vadd.f32 %v351_v2, %v969_v54  ;;  %v400_v7 = vadd.f32 %v399_v3, %v969_v54 }
  0xf3   : > { %v353_v8 = vpop.f32.mrf.mxu0  ;;  %v401_v9 = vpop.f32.mrf.mxu1 }
  0xf4   : > { %473 = vst [vmem:[%s979_s18 + $0x8] sm:$0xff] %v441_v4  ;;  %v743_v10 = vpack.c.bf16 %v441_v4, %v440_v62  ;;  %489 = vst [vmem:[%s979_s18 + $0x88] sm:$0xff] %v457_v5  ;;  %v751_v11 = vpack.c.bf16 %v457_v5, %v456_v63  ;;  %v442_v12 = vmax.f32 %v352_v6, 0.0  ;;  %v458_v13 = vmax.f32 %v400_v7, 0.0 }
  0xf5   : > { %v354_v14 = vadd.f32 %v353_v8, %v972_v55  ;;  %v402_v15 = vadd.f32 %v401_v9, %v972_v55  ;;  %v357_v16 = vpop.f32.mrf.mxu0  ;;  %v405_v17 = vpop.f32.mrf.mxu1 }
  0xf6   : > { %600 = vst [vmem:[%s992_s21] sm:$0xff] %v743_v10  ;;  %608 = vst [vmem:[%s992_s21 + $0x40] sm:$0xff] %v751_v11  ;;  %v358_v18 = vadd.f32 %v357_v16, %v969_v54  ;;  %v406_v19 = vadd.f32 %v405_v17, %v969_v54 }
  0xf7   : > { %474 = vst [vmem:[%s979_s18 + $0x10] sm:$0xff] %v442_v12  ;;  %490 = vst [vmem:[%s979_s18 + $0x90] sm:$0xff] %v458_v13  ;;  %v443_v20 = vmax.f32 %v354_v14, 0.0  ;;  %v459_v21 = vmax.f32 %v402_v15, 0.0  ;;  %v359_v22 = vpop.f32.mrf.mxu0  ;;  %v407_v23 = vpop.f32.mrf.mxu1 }
  0xf8   : > { %v444_v24 = vmax.f32 %v358_v18, 0.0  ;;  %v460_v25 = vmax.f32 %v406_v19, 0.0  ;;  %v360_v26 = vadd.f32 %v359_v22, %v972_v55  ;;  %v408_v27 = vadd.f32 %v407_v23, %v972_v55 }
  0xf9   : > { %475 = vst [vmem:[%s979_s18 + $0x18] sm:$0xff] %v443_v20  ;;  %v744_v28 = vpack.c.bf16 %v443_v20, %v442_v12  ;;  %491 = vst [vmem:[%s979_s18 + $0x98] sm:$0xff] %v459_v21  ;;  %v752_v29 = vpack.c.bf16 %v459_v21, %v458_v13  ;;  %v363_v30 = vpop.f32.mrf.mxu0  ;;  %v411_v31 = vpop.f32.mrf.mxu1 }
  0xfa   : > { %476 = vst [vmem:[%s979_s18 + $0x20] sm:$0xff] %v444_v24  ;;  %492 = vst [vmem:[%s979_s18 + $0xa0] sm:$0xff] %v460_v25  ;;  %v445_v32 = vmax.f32 %v360_v26, 0.0  ;;  %v461_v33 = vmax.f32 %v408_v27, 0.0  ;;  %v364_v34 = vadd.f32 %v363_v30, %v969_v54  ;;  %v412_v35 = vadd.f32 %v411_v31, %v969_v54 }
  0xfb   : > { %601 = vst [vmem:[%s992_s21 + $0x8] sm:$0xff] %v744_v28  ;;  %609 = vst [vmem:[%s992_s21 + $0x48] sm:$0xff] %v752_v29  ;;  %v365_v36 = vpop.f32.mrf.mxu0  ;;  %v413_v37 = vpop.f32.mrf.mxu1 }
  0xfc   : > { %477 = vst [vmem:[%s979_s18 + $0x28] sm:$0xff] %v445_v32  ;;  %v745_v38 = vpack.c.bf16 %v445_v32, %v444_v24  ;;  %493 = vst [vmem:[%s979_s18 + $0xa8] sm:$0xff] %v461_v33  ;;  %v753_v39 = vpack.c.bf16 %v461_v33, %v460_v25  ;;  %v446_v40 = vmax.f32 %v364_v34, 0.0  ;;  %v462_v41 = vmax.f32 %v412_v35, 0.0 }
  0xfd   : > { %v366_v42 = vadd.f32 %v365_v36, %v972_v55  ;;  %v414_v43 = vadd.f32 %v413_v37, %v972_v55  ;;  %v369_v44 = vpop.f32.mrf.mxu0  ;;  %v417_v45 = vpop.f32.mrf.mxu1 }
  0xfe   : > { %602 = vst [vmem:[%s992_s21 + $0x10] sm:$0xff] %v745_v38  ;;  %610 = vst [vmem:[%s992_s21 + $0x50] sm:$0xff] %v753_v39  ;;  %v370_v46 = vadd.f32 %v369_v44, %v969_v54  ;;  %v418_v47 = vadd.f32 %v417_v45, %v969_v54 }
  0xff   : > { %478 = vst [vmem:[%s979_s18 + $0x30] sm:$0xff] %v446_v40  ;;  %494 = vst [vmem:[%s979_s18 + $0xb0] sm:$0xff] %v462_v41  ;;  %v447_v48 = vmax.f32 %v366_v42, 0.0  ;;  %v463_v49 = vmax.f32 %v414_v43, 0.0  ;;  %v371_v50 = vpop.f32.mrf.mxu0  ;;  %v419_v51 = vpop.f32.mrf.mxu1 }
 0x100   : > { %v448_v52 = vmax.f32 %v370_v46, 0.0  ;;  %v464_v53 = vmax.f32 %v418_v47, 0.0  ;;  %v372_v56 = vadd.f32 %v371_v50, %v972_v55  ;;  %v420_v57 = vadd.f32 %v419_v51, %v972_v55 }
 0x101   : > { %479 = vst [vmem:[%s979_s18 + $0x38] sm:$0xff] %v447_v48  ;;  %v746_v58 = vpack.c.bf16 %v447_v48, %v446_v40  ;;  %495 = vst [vmem:[%s979_s18 + $0xb8] sm:$0xff] %v463_v49  ;;  %v754_v59 = vpack.c.bf16 %v463_v49, %v462_v41  ;;  %v375_v60 = vpop.f32.mrf.mxu0  ;;  %v423_v61 = vpop.f32.mrf.mxu1 }
 0x102   : > { %480 = vst [vmem:[%s979_s18 + $0x40] sm:$0xff] %v448_v52  ;;  %496 = vst [vmem:[%s979_s18 + $0xc0] sm:$0xff] %v464_v53  ;;  %v449_v62 = vmax.f32 %v372_v56, 0.0  ;;  %v465_v63 = vmax.f32 %v420_v57, 0.0  ;;  %v376_v0 = vadd.f32 %v375_v60, %v969_v54  ;;  %v424_v1 = vadd.f32 %v423_v61, %v969_v54 }
 0x103   : > { %603 = vst [vmem:[%s992_s21 + $0x18] sm:$0xff] %v746_v58  ;;  %611 = vst [vmem:[%s992_s21 + $0x58] sm:$0xff] %v754_v59  ;;  %v377_v2 = vpop.f32.mrf.mxu0  ;;  %v425_v3 = vpop.f32.mrf.mxu1 }
 0x104   : > { %481 = vst [vmem:[%s979_s18 + $0x48] sm:$0xff] %v449_v62  ;;  %v747_v4 = vpack.c.bf16 %v449_v62, %v448_v52  ;;  %497 = vst [vmem:[%s979_s18 + $0xc8] sm:$0xff] %v465_v63  ;;  %v755_v5 = vpack.c.bf16 %v465_v63, %v464_v53  ;;  %v450_v6 = vmax.f32 %v376_v0, 0.0  ;;  %v466_v7 = vmax.f32 %v424_v1, 0.0 }
 0x105   : > { %v378_v8 = vadd.f32 %v377_v2, %v972_v55  ;;  %v426_v9 = vadd.f32 %v425_v3, %v972_v55  ;;  %v381_v10 = vpop.f32.mrf.mxu0  ;;  %v429_v11 = vpop.f32.mrf.mxu1 }
 0x106   : > { %604 = vst [vmem:[%s992_s21 + $0x20] sm:$0xff] %v747_v4  ;;  %612 = vst [vmem:[%s992_s21 + $0x60] sm:$0xff] %v755_v5  ;;  %v382_v12 = vadd.f32 %v381_v10, %v969_v54  ;;  %v430_v13 = vadd.f32 %v429_v11, %v969_v54 }
 0x107   : > { %482 = vst [vmem:[%s979_s18 + $0x50] sm:$0xff] %v450_v6  ;;  %498 = vst [vmem:[%s979_s18 + $0xd0] sm:$0xff] %v466_v7  ;;  %v451_v14 = vmax.f32 %v378_v8, 0.0  ;;  %v467_v15 = vmax.f32 %v426_v9, 0.0  ;;  %v383_v16 = vpop.f32.mrf.mxu0  ;;  %v431_v17 = vpop.f32.mrf.mxu1 }
 0x108   : > { %v452_v18 = vmax.f32 %v382_v12, 0.0  ;;  %v468_v19 = vmax.f32 %v430_v13, 0.0  ;;  %v384_v20 = vadd.f32 %v383_v16, %v972_v55  ;;  %v432_v21 = vadd.f32 %v431_v17, %v972_v55 }
 0x109   : > { %483 = vst [vmem:[%s979_s18 + $0x58] sm:$0xff] %v451_v14  ;;  %v748_v22 = vpack.c.bf16 %v451_v14, %v450_v6  ;;  %499 = vst [vmem:[%s979_s18 + $0xd8] sm:$0xff] %v467_v15  ;;  %v756_v23 = vpack.c.bf16 %v467_v15, %v466_v7  ;;  %v387_v24 = vpop.f32.mrf.mxu0  ;;  %v435_v25 = vpop.f32.mrf.mxu1 }
 0x10a   : > { %484 = vst [vmem:[%s979_s18 + $0x60] sm:$0xff] %v452_v18  ;;  %500 = vst [vmem:[%s979_s18 + $0xe0] sm:$0xff] %v468_v19  ;;  %v453_v26 = vmax.f32 %v384_v20, 0.0  ;;  %v469_v27 = vmax.f32 %v432_v21, 0.0  ;;  %v388_v28 = vadd.f32 %v387_v24, %v969_v54  ;;  %v436_v29 = vadd.f32 %v435_v25, %v969_v54 }
 0x10b   : > { %605 = vst [vmem:[%s992_s21 + $0x28] sm:$0xff] %v748_v22  ;;  %613 = vst [vmem:[%s992_s21 + $0x68] sm:$0xff] %v756_v23  ;;  %v389_v30 = vpop.f32.mrf.mxu0  ;;  %v437_v31 = vpop.f32.mrf.mxu1 }
 0x10c   : > { %485 = vst [vmem:[%s979_s18 + $0x68] sm:$0xff] %v453_v26  ;;  %v749_v32 = vpack.c.bf16 %v453_v26, %v452_v18  ;;  %501 = vst [vmem:[%s979_s18 + $0xe8] sm:$0xff] %v469_v27  ;;  %v757_v33 = vpack.c.bf16 %v469_v27, %v468_v19  ;;  %v454_v34 = vmax.f32 %v388_v28, 0.0  ;;  %v470_v35 = vmax.f32 %v436_v29, 0.0 }
 0x10d   : > { %v390_v36 = vadd.f32 %v389_v30, %v972_v55  ;;  %v438_v37 = vadd.f32 %v437_v31, %v972_v55 }
 0x10e   : > { %606 = vst [vmem:[%s992_s21 + $0x30] sm:$0xff] %v749_v32  ;;  %614 = vst [vmem:[%s992_s21 + $0x70] sm:$0xff] %v757_v33 }
 0x10f   : > { %486 = vst [vmem:[%s979_s18 + $0x70] sm:$0xff] %v454_v34  ;;  %502 = vst [vmem:[%s979_s18 + $0xf0] sm:$0xff] %v470_v35  ;;  %v455_v54 = vmax.f32 %v390_v36, 0.0  ;;  %v471_v38 = vmax.f32 %v438_v37, 0.0 }
 0x111   : > { %487 = vst [vmem:[%s979_s18 + $0x78] sm:$0xff] %v455_v54  ;;  %v750_v39 = vpack.c.bf16 %v455_v54, %v454_v34  ;;  %503 = vst [vmem:[%s979_s18 + $0xf8] sm:$0xff] %v471_v38  ;;  %v758_v40 = vpack.c.bf16 %v471_v38, %v470_v35 }
 0x113   : > { %607 = vst [vmem:[%s992_s21 + $0x38] sm:$0xff] %v750_v39  ;;  %615 = vst [vmem:[%s992_s21 + $0x78] sm:$0xff] %v758_v40 }
 0x114 PF: > { %s15_s15 = sadd.s32 1, %s806_s15  }
 0x115   : > { %p12_p4 = scmp.ge.s32.totalorder %s15_s15, 5  }
 0x117   :  { %14 = sbr.rel (!%p12_p4) target bundleno = 1 (0x1), region = 74 }

// kernel: sgformer_seed_forward.3
= control target key start
LH: loop header
LB: loop body
LE: loop exit
PB: predicated region body
PF: predicated region fallthrough
CT: control target
= control target key end

     0   :  { %s5207_s0 = inlined_call_operand.vmem [shape: f32[384,128], index: 0, kind: input, shape index: {}]   ;;  %s5208_s1 = inlined_call_operand.vmem [shape: f32[384,256], index: 1, kind: input, shape index: {}]   ;;  %s5209_s2 = inlined_call_operand.vmem [shape: bf16[384,256], index: 2, kind: input, shape index: {}]   ;;  %s5210_s3 = inlined_call_operand.vmem [shape: bf16[2,384,384], index: 3, kind: input, shape index: {}]   ;;  %s5211_s4 = inlined_call_operand.vmem [shape: f32[128,128], index: 4, kind: input, shape index: {}]   ;;  %s5212_s5 = inlined_call_operand.vmem [shape: f32[128,128], index: 5, kind: input, shape index: {}]   ;;  %s5213_s6 = inlined_call_operand.vmem [shape: f32[128,128], index: 6, kind: input, shape index: {}]   ;;  %s5214_s7 = inlined_call_operand.vmem [shape: f32[128,128], index: 7, kind: input, shape index: {}]   ;;  %s5215_s8 = inlined_call_operand.vmem [shape: f32[128,128], index: 8, kind: input, shape index: {}]   ;;  %s5216_s9 = inlined_call_operand.vmem [shape: f32[128,128], index: 9, kind: input, shape index: {}]   ;;  %s5217_s10 = inlined_call_operand.vmem [shape: f32[9,128], index: 10, kind: input, shape index: {}]   ;;  %s5218_s11 = inlined_call_operand.vmem [shape: f32[1,128], index: 11, kind: input, shape index: {}]   ;;  %s5219_s12 = inlined_call_operand.vmem [shape: f32[384,128], index: 12, kind: output, shape index: {}]  }
   0x1   :  { %5225 = sst [smem:[#allocation9_spill]] %s5210_s3 }
   0x2   :  { %5226 = sst [smem:[#allocation10_spill]] %s5214_s7 }
   0x3   :  { %5227 = sst [smem:[#allocation11_spill]] %s5218_s11 }
   0x4   :  { %s4103_s21 = smov 0   ;;  %s4105_s22 = smov 0  }
   0x5   :  { %s4107_s23 = smov 0   ;;  %s4109_s24 = smov 0  }
   0x6   :  { %s4111_s25 = smov 0   ;;  %s4113_s26 = smov 0  }
   0x7   :  { %s4115_s27 = smov 0  }
   0x8 LB: > { %5228 = sst [smem:[#allocation5_spill]] %s4027_s25  ;;  %s31_s28 = sadd.s32 1, %s4027_s25  ;;  %s4035_s27 = sphi %s4115_s27, %s22_s27   ;;  %s4031_s26 = sphi %s4113_s26, %s5238_s26   ;;  %s4027_s25 = sphi %s4111_s25, %s5237_s25   ;;  %s4023_s24 = sphi %s4109_s24, %s5236_s24   ;;  %s4019_s23 = sphi %s4107_s23, %s5235_s23   ;;  %s4015_s22 = sphi %s4105_s22, %s5240_s22   ;;  %s4011_s21 = sphi %s4103_s21, %s5239_s21  }
   0x9   : > { %5229 = sst [smem:[#allocation6_spill]] %s4031_s26  ;;  %p32_p0 = scmp.ge.s32.totalorder %s31_s28, 3 }
   0xa   : > { %s34_s29 = sadd.s32 1, %s4031_s26  ;;  %p128_p1 = scmp.ne.s32.totalorder %s4015_s22, %s4011_s21 }
   0xb   : > { %p129_p2 = scmp.eq.s32.totalorder %s4035_s27, 0  ;;  %s5242_s28 = smov (%p32_p0, %s31_s28), 0 }
   0xc   : > { %5230 = sst [smem:[#allocation7_spill]] %s5242_s28  ;;  %s5244_s29 = smov (!%p32_p0, %s34_s29), %s4031_s26 }
   0xd   : > { %p130_p3 = por %p129_p2, %p128_p1  ;;  %p36_p4 = scmp.ge.s32.totalorder %s5244_s29, 3 }
   0xe   : > { %s117_s30 = ssub.s32 %s4027_s25, %s5242_s28  ;;  %s121_s15 = sadd.s32 1, %s4015_s22 }
   0xf   : > { %s5246_s29 = smov (%p36_p4, %s5244_s29), 0  ;;  %p3082_p6 = scmp.ge.s32.totalorder %s4035_s27, 9 }
  0x10   : > { %5231 = sst [smem:[#allocation8_spill]] %s5246_s29  ;;  %s116_s13 = ssub.s32 %s4031_s26, %s5246_s29 }
  0x11   : > { %s118_s14 = sor.u32 %s117_s30, %s116_s13  ;;  %372 = sbr.rel (%p3082_p6) target bundleno = 53 (0x35), region = 48 }
  0x12   : > { %p119_p5 = scmp.eq.s32.totalorder %s118_s14, 0 }
  0x14   : > { %s4154_s16 = scalar_select %p119_p5, %s4015_s22, %s121_s15  }
  0x16   : > { %404 = sbr.rel (!%p130_p3) target bundleno = 53 (0x35), region = 64  ;;  %s406_s17 = sand.u32 (%p130_p3), 1, %s4015_s22  }
  0x17   : > { %s3786_s18 = smul.u32 (%p130_p3), 48, %s4031_s26  ;;  %s3083_s19 = sshll.u32 (%p130_p3), %s406_s17, 7 }
  0x18   : > { %s5232_s3 = sld [smem:[#allocation9_spill]] (%p130_p3)  ;;  %s4168_s13 = scalar_lea.vmem (%p130_p3), [#allocation4], %s3083_s19 }
  0x19   : > { %s411_s20 = sadd.s32 (%p130_p3), %s4027_s25, %s3786_s18 }
  0x1a   : > { %s3086_s28 = sshll.u32 (%p130_p3), %s411_s20, 2 }
  0x1e   : > { %s4163_s30 = scalar_lea.vmem %s5232_s3, %s3086_s28 }
  0x1f   : > { %v430_v0 = vld [vmem:[%s4163_s30] sm:$0xf]  ;;  %v432_v1 = vld [vmem:[%s4163_s30 + $0xc] sm:$0xf]  ;;  %v434_v2 = vld [vmem:[%s4163_s30 + $0x18] sm:$0xf] }
  0x20   : > { %431 = vst [vmem:[%s4168_s13] sm:$0xf] %v430_v0  ;;  %433 = vst [vmem:[%s4168_s13 + $0x4] sm:$0xf] %v432_v1  ;;  %v436_v3 = vld [vmem:[%s4163_s30 + $0x24] sm:$0xf] }
  0x21   : > { %435 = vst [vmem:[%s4168_s13 + $0x8] sm:$0xf] %v434_v2  ;;  %v438_v4 = vld [vmem:[%s4163_s30 + $0x30] sm:$0xf]  ;;  %v440_v5 = vld [vmem:[%s4163_s30 + $0x3c] sm:$0xf] }
  0x22   : > { %437 = vst [vmem:[%s4168_s13 + $0xc] sm:$0xf] %v436_v3  ;;  %439 = vst [vmem:[%s4168_s13 + $0x10] sm:$0xf] %v438_v4  ;;  %v442_v6 = vld [vmem:[%s4163_s30 + $0x48] sm:$0xf] }
  0x23   : > { %441 = vst [vmem:[%s4168_s13 + $0x14] sm:$0xf] %v440_v5  ;;  %v444_v7 = vld [vmem:[%s4163_s30 + $0x54] sm:$0xf]  ;;  %v446_v8 = vld [vmem:[%s4163_s30 + $0x60] sm:$0xf] }
  0x24   : > { %443 = vst [vmem:[%s4168_s13 + $0x18] sm:$0xf] %v442_v6  ;;  %445 = vst [vmem:[%s4168_s13 + $0x1c] sm:$0xf] %v444_v7  ;;  %v448_v9 = vld [vmem:[%s4163_s30 + $0x6c] sm:$0xf] }
  0x25   : > { %447 = vst [vmem:[%s4168_s13 + $0x20] sm:$0xf] %v446_v8  ;;  %v450_v10 = vld [vmem:[%s4163_s30 + $0x78] sm:$0xf]  ;;  %v452_v11 = vld [vmem:[%s4163_s30 + $0x84] sm:$0xf] }
  0x26   : > { %449 = vst [vmem:[%s4168_s13 + $0x24] sm:$0xf] %v448_v9  ;;  %451 = vst [vmem:[%s4168_s13 + $0x28] sm:$0xf] %v450_v10  ;;  %v454_v12 = vld [vmem:[%s4163_s30 + $0x90] sm:$0xf] }
  0x27   : > { %453 = vst [vmem:[%s4168_s13 + $0x2c] sm:$0xf] %v452_v11  ;;  %v456_v13 = vld [vmem:[%s4163_s30 + $0x9c] sm:$0xf]  ;;  %v458_v14 = vld [vmem:[%s4163_s30 + $0xa8] sm:$0xf] }
  0x28   : > { %455 = vst [vmem:[%s4168_s13 + $0x30] sm:$0xf] %v454_v12  ;;  %457 = vst [vmem:[%s4168_s13 + $0x34] sm:$0xf] %v456_v13  ;;  %v460_v15 = vld [vmem:[%s4163_s30 + $0xb4] sm:$0xf] }
  0x29   : > { %459 = vst [vmem:[%s4168_s13 + $0x38] sm:$0xf] %v458_v14  ;;  %v462_v16 = vld [vmem:[%s4163_s30 + $0x240] sm:$0xf]  ;;  %v464_v17 = vld [vmem:[%s4163_s30 + $0x24c] sm:$0xf] }
  0x2a   : > { %461 = vst [vmem:[%s4168_s13 + $0x3c] sm:$0xf] %v460_v15  ;;  %463 = vst [vmem:[%s4168_s13 + $0x40] sm:$0xf] %v462_v16  ;;  %v466_v18 = vld [vmem:[%s4163_s30 + $0x258] sm:$0xf] }
  0x2b   : > { %465 = vst [vmem:[%s4168_s13 + $0x44] sm:$0xf] %v464_v17  ;;  %v468_v19 = vld [vmem:[%s4163_s30 + $0x264] sm:$0xf]  ;;  %v470_v20 = vld [vmem:[%s4163_s30 + $0x270] sm:$0xf] }
  0x2c   : > { %467 = vst [vmem:[%s4168_s13 + $0x48] sm:$0xf] %v466_v18  ;;  %469 = vst [vmem:[%s4168_s13 + $0x4c] sm:$0xf] %v468_v19  ;;  %v472_v21 = vld [vmem:[%s4163_s30 + $0x27c] sm:$0xf] }
  0x2d   : > { %471 = vst [vmem:[%s4168_s13 + $0x50] sm:$0xf] %v470_v20  ;;  %v474_v22 = vld [vmem:[%s4163_s30 + $0x288] sm:$0xf]  ;;  %v476_v23 = vld [vmem:[%s4163_s30 + $0x294] sm:$0xf] }
  0x2e   : > { %473 = vst [vmem:[%s4168_s13 + $0x54] sm:$0xf] %v472_v21  ;;  %475 = vst [vmem:[%s4168_s13 + $0x58] sm:$0xf] %v474_v22  ;;  %v478_v24 = vld [vmem:[%s4163_s30 + $0x2a0] sm:$0xf] }
  0x2f   : > { %477 = vst [vmem:[%s4168_s13 + $0x5c] sm:$0xf] %v476_v23  ;;  %v480_v25 = vld [vmem:[%s4163_s30 + $0x2ac] sm:$0xf]  ;;  %v482_v26 = vld [vmem:[%s4163_s30 + $0x2b8] sm:$0xf] }
  0x30   : > { %479 = vst [vmem:[%s4168_s13 + $0x60] sm:$0xf] %v478_v24  ;;  %481 = vst [vmem:[%s4168_s13 + $0x64] sm:$0xf] %v480_v25  ;;  %v484_v27 = vld [vmem:[%s4163_s30 + $0x2c4] sm:$0xf] }
  0x31   : > { %483 = vst [vmem:[%s4168_s13 + $0x68] sm:$0xf] %v482_v26  ;;  %v486_v28 = vld [vmem:[%s4163_s30 + $0x2d0] sm:$0xf]  ;;  %v488_v29 = vld [vmem:[%s4163_s30 + $0x2dc] sm:$0xf] }
  0x32   : > { %485 = vst [vmem:[%s4168_s13 + $0x6c] sm:$0xf] %v484_v27  ;;  %487 = vst [vmem:[%s4168_s13 + $0x70] sm:$0xf] %v486_v28  ;;  %v490_v30 = vld [vmem:[%s4163_s30 + $0x2e8] sm:$0xf] }
  0x33   : > { %489 = vst [vmem:[%s4168_s13 + $0x74] sm:$0xf] %v488_v29  ;;  %v492_v31 = vld [vmem:[%s4163_s30 + $0x2f4] sm:$0xf]  ;;  %491 = vst [vmem:[%s4168_s13 + $0x78] sm:$0xf] %v490_v30 }
  0x34   : > { %493 = vst [vmem:[%s4168_s13 + $0x7c] sm:$0xf] %v492_v31 }
  0x35 PF: > { %p3087_p7 = scmp.ge.s32.totalorder %s4035_s27, 1  ;;  %p580_p8 = scmp.lt.s32.totalorder %s4035_s27, 10 }
  0x37   : > { %p581_p9 = pnand %p3087_p7, %p580_p8 }
  0x38   : > { %s587_s7 = sand.u32 (!%p581_p9), 1, %s4011_s21   ;;  %s3089_s11 = sshll.u32 (!%p581_p9), %s4023_s24, 4 }
  0x39   : > { %584 = sbr.rel (%p581_p9) target bundleno = 1482 (0x5ca), region = 105  ;;  %s3088_s28 = sshll.u32 (!%p581_p9), %s587_s7, 7 }
  0x3a   : > { %p646_p10 = scmp.lt.s32.totalorder (!%p581_p9), %s3089_s11, 47  ;;  %s3094_s14 = sshll.u32 (!%p581_p9), %s4019_s23, 4 }
  0x3b   : > { %p659_p11 = scmp.lt.s32.totalorder (!%p581_p9), %s3094_s14, 47  ;;  %s4256_s18 = scalar_lea.vmem (!%p581_p9), [#allocation4], %s3088_s28 }
  0x3c   : > { %p3099_p12 = scmp.ne.s32.totalorder (!%p581_p9), %s4019_s23, 0 }
  0x3e   : > { %s5248_s11 = smov (!%p646_p10, %s3089_s11), 47  ;;  %s5250_s14 = smov (!%p659_p11, %s3094_s14), 47 }
  0x3f   : > { %s3090_s15 = sshll.u32 %s5248_s11, 3  ;;  %s3160_s17 = sshll.u32 %s5248_s11, 4 }
  0x40   : > { %s4239_s20 = scalar_lea.vmem %s5207_s0, %s3090_s15  ;;  %s4244_s3 = scalar_lea.vmem %s5208_s1, %s3160_s17 }
  0x41   : > { %s4249_s7 = scalar_lea.vmem %s5219_s12, %s3090_s15  ;;  %s3161_s29 = sshll.u32 %s5250_s14, 3 }
  0x42   : > { %s4254_s11 = scalar_lea.vmem %s5209_s2, %s3161_s29  ;;  %676 = sbr.rel (%p3099_p12) target bundleno = 88 (0x58), region = 113 }
  0x47   : > { %v4037_v32 = vmov 0.0  }
  0x48   : > { %677 = vst [vmem:[#allocation2 + $0x30] sm:$0xff] %v4037_v32  ;;  %678 = vst [vmem:[#allocation2] sm:$0xff] %v4037_v32 }
  0x49   : > { %679 = vst [vmem:[#allocation2 + $0x58] sm:$0xff] %v4037_v32  ;;  %680 = vst [vmem:[#allocation2 + $0x18] sm:$0xff] %v4037_v32 }
  0x4a   : > { %681 = vst [vmem:[#allocation2 + $0x50] sm:$0xff] %v4037_v32  ;;  %682 = vst [vmem:[#allocation2 + $0x68] sm:$0xff] %v4037_v32 }
  0x4b   : > { %683 = vst [vmem:[#allocation2 + $0x8] sm:$0xff] %v4037_v32  ;;  %684 = vst [vmem:[#allocation2 + $0x48] sm:$0xff] %v4037_v32 }
  0x4c   : > { %685 = vst [vmem:[#allocation2 + $0x40] sm:$0xff] %v4037_v32  ;;  %686 = vst [vmem:[#allocation2 + $0x20] sm:$0xff] %v4037_v32 }
  0x4d   : > { %687 = vst [vmem:[#allocation2 + $0x10] sm:$0xff] %v4037_v32  ;;  %688 = vst [vmem:[#allocation2 + $0x38] sm:$0xff] %v4037_v32 }
  0x4e   : > { %689 = vst [vmem:[#allocation2 + $0x60] sm:$0xff] %v4037_v32  ;;  %690 = vst [vmem:[#allocation2 + $0x70] sm:$0xff] %v4037_v32 }
  0x4f   : > { %691 = vst [vmem:[#allocation2 + $0x78] sm:$0xff] %v4037_v32  ;;  %692 = vst [vmem:[#allocation2 + $0x28] sm:$0xff] %v4037_v32 }
  0x50   : > { %693 = vst [vmem:[#allocation3 + $0x28] sm:$0xff] %v4037_v32  ;;  %694 = vst [vmem:[#allocation3 + $0x68] sm:$0xff] %v4037_v32 }
  0x51   : > { %695 = vst [vmem:[#allocation3 + $0x10] sm:$0xff] %v4037_v32  ;;  %696 = vst [vmem:[#allocation3 + $0x40] sm:$0xff] %v4037_v32 }
  0x52   : > { %697 = vst [vmem:[#allocation3 + $0x48] sm:$0xff] %v4037_v32  ;;  %698 = vst [vmem:[#allocation3 + $0x30] sm:$0xff] %v4037_v32 }
  0x53   : > { %699 = vst [vmem:[#allocation3 + $0x70] sm:$0xff] %v4037_v32  ;;  %700 = vst [vmem:[#allocation3 + $0x38] sm:$0xff] %v4037_v32 }
  0x54   : > { %701 = vst [vmem:[#allocation3 + $0x20] sm:$0xff] %v4037_v32  ;;  %702 = vst [vmem:[#allocation3 + $0x78] sm:$0xff] %v4037_v32 }
  0x55   : > { %703 = vst [vmem:[#allocation3 + $0x18] sm:$0xff] %v4037_v32  ;;  %704 = vst [vmem:[#allocation3 + $0x58] sm:$0xff] %v4037_v32 }
  0x56   : > { %705 = vst [vmem:[#allocation3] sm:$0xff] %v4037_v32  ;;  %706 = vst [vmem:[#allocation3 + $0x8] sm:$0xff] %v4037_v32 }
  0x57   : > { %707 = vst [vmem:[#allocation3 + $0x60] sm:$0xff] %v4037_v32  ;;  %708 = vst [vmem:[#allocation3 + $0x50] sm:$0xff] %v4037_v32 }
  0x58 PF: > { %v3844_v33 = vld [vmem:[%s4254_s11 + $0x70] ss:$8 sps:$4 sm:$0xff]   ;;  %v3846_v34 = vld [vmem:[%s4254_s11 + $0x74] ss:$8 sps:$4 sm:$0xff]   ;;  %v3847_v35 = vld [vmem:[%s4254_s11 + $0x60] ss:$8 sps:$4 sm:$0xff]  }
  0x59   : > { %3386 = vmatprep.subr.bf16.mxu0 %v3844_v33  ;;  %v3849_v36 = vld [vmem:[%s4254_s11 + $0x64] ss:$8 sps:$4 sm:$0xff]   ;;  %3418 = vmatprep.subr.bf16.mxu1 %v3846_v34  ;;  %v3850_v37 = vld [vmem:[%s4254_s11 + $0x50] ss:$8 sps:$4 sm:$0xff]   ;;  %v3852_v38 = vld [vmem:[%s4254_s11 + $0x54] ss:$8 sps:$4 sm:$0xff]  }
  0x5a   : > { %3387 = vmatpush3.bf16.msra.mxu0 %v3844_v33  ;;  %3419 = vmatpush3.bf16.msra.mxu1 %v3846_v34  ;;  %v3853_v39 = vld [vmem:[%s4254_s11 + $0x40] ss:$8 sps:$4 sm:$0xff]   ;;  %v3855_v40 = vld [vmem:[%s4254_s11 + $0x44] ss:$8 sps:$4 sm:$0xff]   ;;  %v3856_v41 = vld [vmem:[%s4254_s11 + $0x30] ss:$8 sps:$4 sm:$0xff]  }
  0x5b   : > { %3388 = vmatprep.subr.bf16.mxu0 %v3847_v35  ;;  %3420 = vmatprep.subr.bf16.mxu1 %v3849_v36  ;;  %v3868_v42 = vld [vmem:[%s4256_s18] sm:$0xff]   ;;  %v3858_v44 = vld [vmem:[%s4254_s11 + $0x34] ss:$8 sps:$4 sm:$0xff]   ;;  %v3862_v47 = vld [vmem:[%s4254_s11 + $0x10] ss:$8 sps:$4 sm:$0xff]   ;;  %p3148_p13 = scmp.ne.s32.totalorder %s4019_s23, 2 }
  0x5c   : > { %v3869_v43 = vld [vmem:[%s4256_s18 + $0x40] sm:$0xff]   ;;  %3402 = vmatprep.mubr.bf16.mxu0 %v3868_v42  ;;  %v3864_v48 = vld [vmem:[%s4254_s11 + $0x14] ss:$8 sps:$4 sm:$0xff]   ;;  %v3870_v51 = vld [vmem:[%s4256_s18 + $0x8] sm:$0xff]   ;;  %s5233_s30 = sld [smem:[#allocation10_spill]] (!%p3148_p13) }
  0x5d   : > { %3434 = vmatprep.mubr.bf16.mxu1 %v3869_v43  ;;  %v3859_v45 = vld [vmem:[%s4254_s11 + $0x20] ss:$8 sps:$4 sm:$0xff]   ;;  %v3861_v46 = vld [vmem:[%s4254_s11 + $0x24] ss:$8 sps:$4 sm:$0xff]   ;;  %v3872_v53 = vld [vmem:[%s4256_s18 + $0x10] sm:$0xff]  }
  0x5e   : > { %3389 = vmatpush3.bf16.msra.mxu0 %v3847_v35  ;;  %3421 = vmatpush3.bf16.msra.mxu1 %v3849_v36  ;;  %v3865_v49 = vld [vmem:[%s4254_s11] ss:$8 sps:$4 sm:$0xff]   ;;  %v3867_v50 = vld [vmem:[%s4254_s11 + $0x4] ss:$8 sps:$4 sm:$0xff]   ;;  %v3873_v54 = vld [vmem:[%s4256_s18 + $0x50] sm:$0xff]  }
  0x5f   : > { %3390 = vmatprep.subr.bf16.mxu0 %v3850_v37  ;;  %3422 = vmatprep.subr.bf16.mxu1 %v3852_v38  ;;  %v3871_v52 = vld [vmem:[%s4256_s18 + $0x48] sm:$0xff]   ;;  %v3874_v55 = vld [vmem:[%s4256_s18 + $0x18] sm:$0xff]   ;;  %v3876_v57 = vld [vmem:[%s4256_s18 + $0x20] sm:$0xff]  }
  0x60   : > { %v3875_v56 = vld [vmem:[%s4256_s18 + $0x58] sm:$0xff]   ;;  %v3877_v58 = vld [vmem:[%s4256_s18 + $0x60] sm:$0xff]   ;;  %v3878_v59 = vld [vmem:[%s4256_s18 + $0x28] sm:$0xff]  }
  0x61   : > { %v3879_v60 = vld [vmem:[%s4256_s18 + $0x68] sm:$0xff]   ;;  %v3880_v61 = vld [vmem:[%s4256_s18 + $0x30] sm:$0xff]   ;;  %v3882_v63 = vld [vmem:[%s4256_s18 + $0x38] sm:$0xff]  }
  0x62   : > { %3391 = vmatpush3.bf16.msra.mxu0 %v3850_v37  ;;  %3423 = vmatpush3.bf16.msra.mxu1 %v3852_v38  ;;  %v3881_v62 = vld [vmem:[%s4256_s18 + $0x70] sm:$0xff]   ;;  %v3883_v0 = vld [vmem:[%s4256_s18 + $0x78] sm:$0xff]   ;;  %v982_v7 = vld [vmem:[#allocation3 + $0x28] sm:$0xff] }
  0x63   : > { %3392 = vmatprep.subr.bf16.mxu0 %v3853_v39  ;;  %3424 = vmatprep.subr.bf16.mxu1 %v3855_v40  ;;  %v727_v1 = vld [vmem:[#allocation2 + $0x58] sm:$0xff]  ;;  %v984_v2 = vld [vmem:[#allocation3 + $0x10] sm:$0xff]  ;;  %v985_v13 = vld [vmem:[#allocation3 + $0x40] sm:$0xff] }
  0x64   : > { %v725_v4 = vld [vmem:[#allocation2 + $0x30] sm:$0xff]  ;;  %v728_v10 = vld [vmem:[#allocation2 + $0x18] sm:$0xff]  ;;  %v726_v16 = vld [vmem:[#allocation2] sm:$0xff] }
  0x65   : > { %v983_v19 = vld [vmem:[#allocation3 + $0x68] sm:$0xff]  ;;  %v988_v25 = vld [vmem:[#allocation3 + $0x70] sm:$0xff]  ;;  %v989_v37 = vld [vmem:[#allocation3 + $0x38] sm:$0xff] }
  0x66   : > { %3393 = vmatpush3.bf16.msra.mxu0 %v3853_v39  ;;  %3425 = vmatpush3.bf16.msra.mxu1 %v3855_v40  ;;  %v731_v22 = vld [vmem:[#allocation2 + $0x8] sm:$0xff]  ;;  %v729_v28 = vld [vmem:[#allocation2 + $0x50] sm:$0xff] }
  0x67   : > { %3394 = vmatprep.subr.bf16.mxu0 %v3856_v41  ;;  %3426 = vmatprep.subr.bf16.mxu1 %v3858_v44  ;;  %v986_v31 = vld [vmem:[#allocation3 + $0x48] sm:$0xff]  ;;  %v987_v43 = vld [vmem:[#allocation3 + $0x30] sm:$0xff] }
  0x68   : > { %v732_v34 = vld [vmem:[#allocation2 + $0x48] sm:$0xff] }
  0x69   : > { %v730_v40 = vld [vmem:[#allocation2 + $0x68] sm:$0xff] }
  0x6a   : > { %3395 = vmatpush3.bf16.msra.mxu0 %v3856_v41  ;;  %3427 = vmatpush3.bf16.msra.mxu1 %v3858_v44 }
  0x6b   : > { %3396 = vmatprep.subr.bf16.mxu0 %v3859_v45  ;;  %3428 = vmatprep.subr.bf16.mxu1 %v3861_v46 }
  0x6e   : > { %3397 = vmatpush3.bf16.msra.mxu0 %v3859_v45  ;;  %3429 = vmatpush3.bf16.msra.mxu1 %v3861_v46  ;;  %v735_v46 = vld [vmem:[#allocation2 + $0x10] sm:$0xff] }
  0x6f   : > { %3398 = vmatprep.subr.bf16.mxu0 %v3862_v47  ;;  %3430 = vmatprep.subr.bf16.mxu1 %v3864_v48 }
  0x72   : > { %3399 = vmatpush3.bf16.msra.mxu0 %v3862_v47  ;;  %3431 = vmatpush3.bf16.msra.mxu1 %v3864_v48 }
  0x73   : > { %3400 = vmatprep.subr.bf16.mxu0 %v3865_v49  ;;  %3432 = vmatprep.subr.bf16.mxu1 %v3867_v50 }
  0x76   : > { %3401 = vmatpush3.bf16.msra.mxu0 %v3865_v49  ;;  %3433 = vmatpush3.bf16.msra.mxu1 %v3867_v50  ;;  %v992_v49 = vld [vmem:[#allocation3 + $0x18] sm:$0xff] }
  0x79   : > { %3403 = vmatmul.mubr.bf16.vlgmr.msra.gmra.mxu0 %v3870_v51  ;;  %3435 = vmatmul.mubr.bf16.vlgmr.msra.gmra.mxu1 %v3871_v52  ;;  %v733_v52 = vld [vmem:[#allocation2 + $0x40] sm:$0xff] }
  0x7a   : > { %3406 = vmatprep.mubr.bf16.mxu0 %v3872_v53  ;;  %3438 = vmatprep.mubr.bf16.mxu1 %v3873_v54 }
  0x81   : > { %3407 = vmatmul.mubr.bf16.gmra.mxu0 %v3874_v55  ;;  %3439 = vmatmul.mubr.bf16.gmra.mxu1 %v3875_v56  ;;  %v990_v55 = vld [vmem:[#allocation3 + $0x20] sm:$0xff] }
  0x82   : > { %3410 = vmatprep.mubr.bf16.mxu0 %v3876_v57  ;;  %3442 = vmatprep.mubr.bf16.mxu1 %v3877_v58  ;;  %v736_v58 = vld [vmem:[#allocation2 + $0x38] sm:$0xff] }
  0x89   : > { %3411 = vmatmul.mubr.bf16.gmra.mxu0 %v3878_v59  ;;  %3443 = vmatmul.mubr.bf16.gmra.mxu1 %v3879_v60 }
  0x8a   : > { %3414 = vmatprep.mubr.bf16.mxu0 %v3880_v61  ;;  %3446 = vmatprep.mubr.bf16.mxu1 %v3881_v62  ;;  %v993_v61 = vld [vmem:[#allocation3 + $0x58] sm:$0xff] }
  0x91   : > { %3415 = vmatmul.mubr.bf16.gmra.mxu0 %v3882_v63  ;;  %3447 = vmatmul.mubr.bf16.gmra.mxu1 %v3883_v0  ;;  %v734_v0 = vld [vmem:[#allocation2 + $0x20] sm:$0xff] }
 0x139   : > { %v3404_v3 = vpop.f32.mrf.mxu0  ;;  %v3436_v6 = vpop.f32.mrf.mxu1 }
 0x13a   : > { %v952_v5 = vadd.f32 %v3404_v3, %v727_v1  ;;  %v1194_v8 = vadd.f32 %v3436_v6, %v984_v2  ;;  %v991_v3 = vld [vmem:[#allocation3 + $0x78] sm:$0xff] }
 0x13b   : > { %v887_v9 = vpop.f32.mrf.mxu0  ;;  %v1129_v12 = vpop.f32.mrf.mxu1  ;;  %v739_v6 = vld [vmem:[#allocation2 + $0x78] sm:$0xff] }
 0x13c   : > { %968 = vst [vmem:[#allocation2 + $0x58] sm:$0xff] %v952_v5  ;;  %v950_v11 = vadd.f32 %v887_v9, %v725_v4  ;;  %1210 = vst [vmem:[#allocation3 + $0x10] sm:$0xff] %v1194_v8  ;;  %v1192_v14 = vadd.f32 %v1129_v12, %v982_v7  ;;  %v996_v9 = vld [vmem:[#allocation3 + $0x60] sm:$0xff] }
 0x13d   : > { %v3405_v15 = vpop.f32.mrf.mxu0  ;;  %v3437_v18 = vpop.f32.mrf.mxu1  ;;  %v737_v12 = vld [vmem:[#allocation2 + $0x60] sm:$0xff] }
 0x13e   : > { %966 = vst [vmem:[#allocation2 + $0x30] sm:$0xff] %v950_v11  ;;  %v953_v17 = vadd.f32 %v3405_v15, %v728_v10  ;;  %1208 = vst [vmem:[#allocation3 + $0x28] sm:$0xff] %v1192_v14  ;;  %v1195_v20 = vadd.f32 %v3437_v18, %v985_v13  ;;  %v994_v15 = vld [vmem:[#allocation3] sm:$0xff]  ;;  %v740_v18 = vld [vmem:[#allocation2 + $0x28] sm:$0xff] }
 0x13f   : > { %v890_v21 = vpop.f32.mrf.mxu0  ;;  %v1132_v24 = vpop.f32.mrf.mxu1 }
 0x140   : > { %969 = vst [vmem:[#allocation2 + $0x18] sm:$0xff] %v953_v17  ;;  %v951_v23 = vadd.f32 %v890_v21, %v726_v16  ;;  %1211 = vst [vmem:[#allocation3 + $0x40] sm:$0xff] %v1195_v20  ;;  %v1193_v26 = vadd.f32 %v1132_v24, %v983_v19  ;;  %v997_v21 = vld [vmem:[#allocation3 + $0x50] sm:$0xff] }
 0x141   : > { %v3408_v27 = vpop.f32.mrf.mxu0  ;;  %v3440_v30 = vpop.f32.mrf.mxu1  ;;  %v738_v24 = vld [vmem:[#allocation2 + $0x70] sm:$0xff] }
 0x142   : > { %967 = vst [vmem:[#allocation2] sm:$0xff] %v951_v23  ;;  %v956_v29 = vadd.f32 %v3408_v27, %v731_v22  ;;  %1209 = vst [vmem:[#allocation3 + $0x68] sm:$0xff] %v1193_v26  ;;  %v1198_v32 = vadd.f32 %v3440_v30, %v988_v25  ;;  %v995_v27 = vld [vmem:[#allocation3 + $0x8] sm:$0xff] }
 0x143   : > { %v903_v33 = vpop.f32.mrf.mxu0  ;;  %v1145_v36 = vpop.f32.mrf.mxu1 }
 0x144   : > { %972 = vst [vmem:[#allocation2 + $0x8] sm:$0xff] %v956_v29  ;;  %v954_v35 = vadd.f32 %v903_v33, %v729_v28  ;;  %1214 = vst [vmem:[#allocation3 + $0x70] sm:$0xff] %v1198_v32  ;;  %v1196_v38 = vadd.f32 %v1145_v36, %v986_v31 }
 0x145   : > { %v3409_v39 = vpop.f32.mrf.mxu0  ;;  %v3441_v42 = vpop.f32.mrf.mxu1 }
 0x146   : > { %970 = vst [vmem:[#allocation2 + $0x50] sm:$0xff] %v954_v35  ;;  %v957_v41 = vadd.f32 %v3409_v39, %v732_v34  ;;  %1212 = vst [vmem:[#allocation3 + $0x48] sm:$0xff] %v1196_v38  ;;  %v1199_v44 = vadd.f32 %v3441_v42, %v989_v37 }
 0x147   : > { %v906_v45 = vpop.f32.mrf.mxu0  ;;  %v1148_v48 = vpop.f32.mrf.mxu1 }
 0x148   : > { %973 = vst [vmem:[#allocation2 + $0x48] sm:$0xff] %v957_v41  ;;  %v955_v47 = vadd.f32 %v906_v45, %v730_v40  ;;  %1215 = vst [vmem:[#allocation3 + $0x38] sm:$0xff] %v1199_v44  ;;  %v1197_v50 = vadd.f32 %v1148_v48, %v987_v43 }
 0x149   : > { %v3412_v51 = vpop.f32.mrf.mxu0  ;;  %v3444_v54 = vpop.f32.mrf.mxu1 }
 0x14a   : > { %971 = vst [vmem:[#allocation2 + $0x68] sm:$0xff] %v955_v47  ;;  %v960_v53 = vadd.f32 %v3412_v51, %v735_v46  ;;  %1213 = vst [vmem:[#allocation3 + $0x30] sm:$0xff] %v1197_v50  ;;  %v1202_v56 = vadd.f32 %v3444_v54, %v992_v49 }
 0x14b   : > { %v919_v57 = vpop.f32.mrf.mxu0  ;;  %v1161_v60 = vpop.f32.mrf.mxu1 }
 0x14c   : > { %976 = vst [vmem:[#allocation2 + $0x10] sm:$0xff] %v960_v53  ;;  %v958_v59 = vadd.f32 %v919_v57, %v733_v52  ;;  %1218 = vst [vmem:[#allocation3 + $0x18] sm:$0xff] %v1202_v56  ;;  %v1200_v62 = vadd.f32 %v1161_v60, %v990_v55 }
 0x14d   : > { %v3413_v63 = vpop.f32.mrf.mxu0  ;;  %v3445_v2 = vpop.f32.mrf.mxu1 }
 0x14e   : > { %974 = vst [vmem:[#allocation2 + $0x40] sm:$0xff] %v958_v59  ;;  %v961_v1 = vadd.f32 %v3413_v63, %v736_v58  ;;  %1216 = vst [vmem:[#allocation3 + $0x20] sm:$0xff] %v1200_v62  ;;  %v1203_v4 = vadd.f32 %v3445_v2, %v993_v61 }
 0x14f   : > { %v922_v5 = vpop.f32.mrf.mxu0  ;;  %v1164_v8 = vpop.f32.mrf.mxu1 }
 0x150   : > { %977 = vst [vmem:[#allocation2 + $0x38] sm:$0xff] %v961_v1  ;;  %v959_v7 = vadd.f32 %v922_v5, %v734_v0  ;;  %1219 = vst [vmem:[#allocation3 + $0x58] sm:$0xff] %v1203_v4  ;;  %v1201_v10 = vadd.f32 %v1164_v8, %v991_v3 }
 0x151   : > { %v3416_v11 = vpop.f32.mrf.mxu0  ;;  %v3448_v14 = vpop.f32.mrf.mxu1 }
 0x152   : > { %975 = vst [vmem:[#allocation2 + $0x20] sm:$0xff] %v959_v7  ;;  %v964_v13 = vadd.f32 %v3416_v11, %v739_v6  ;;  %1217 = vst [vmem:[#allocation3 + $0x78] sm:$0xff] %v1201_v10  ;;  %v1206_v16 = vadd.f32 %v3448_v14, %v996_v9 }
 0x153   : > { %v935_v17 = vpop.f32.mrf.mxu0  ;;  %v1177_v20 = vpop.f32.mrf.mxu1 }
 0x154   : > { %980 = vst [vmem:[#allocation2 + $0x78] sm:$0xff] %v964_v13  ;;  %v962_v19 = vadd.f32 %v935_v17, %v737_v12  ;;  %1222 = vst [vmem:[#allocation3 + $0x60] sm:$0xff] %v1206_v16  ;;  %v1204_v22 = vadd.f32 %v1177_v20, %v994_v15 }
 0x155   : > { %v3417_v23 = vpop.f32.mrf.mxu0  ;;  %v3449_v26 = vpop.f32.mrf.mxu1 }
 0x156   : > { %978 = vst [vmem:[#allocation2 + $0x60] sm:$0xff] %v962_v19  ;;  %v965_v25 = vadd.f32 %v3417_v23, %v740_v18  ;;  %1220 = vst [vmem:[#allocation3] sm:$0xff] %v1204_v22  ;;  %v1207_v28 = vadd.f32 %v3449_v26, %v997_v21  ;;  %1227 = sbr.rel (%p3148_p13) target bundleno = 1482 (0x5ca), region = 117 }
 0x157   : > { %v938_v29 = vpop.f32.mrf.mxu0  ;;  %v1180_v31 = vpop.f32.mrf.mxu1 }
 0x158   : > { %981 = vst [vmem:[#allocation2 + $0x28] sm:$0xff] %v965_v25  ;;  %v963_v30 = vadd.f32 %v938_v29, %v738_v24  ;;  %1223 = vst [vmem:[#allocation3 + $0x50] sm:$0xff] %v1207_v28  ;;  %v1205_v32 = vadd.f32 %v1180_v31, %v995_v27 }
 0x15a   : > { %979 = vst [vmem:[#allocation2 + $0x70] sm:$0xff] %v963_v30  ;;  %1221 = vst [vmem:[#allocation3 + $0x8] sm:$0xff] %v1205_v32 }
 0x15b   : > { %v1300_v33 = vld [vmem:[%s5212_s5 + $0x78] sm:$0xff]  ;;  %v1299_v34 = vld [vmem:[%s5212_s5 + $0x70] sm:$0xff]  ;;  %v1298_v35 = vld [vmem:[%s5212_s5 + $0x68] sm:$0xff] }
 0x15c   : > { %3450 = vmatprep.subr.mxu0 %v1300_v33  ;;  %v1297_v36 = vld [vmem:[%s5212_s5 + $0x60] sm:$0xff]  ;;  %v1269_v37 = vld [vmem:[#allocation2 + $0x30] sm:$0xff]  ;;  %v1296_v38 = vld [vmem:[%s5212_s5 + $0x58] sm:$0xff] }
 0x15d   : > { %3451 = vmatpush3.msra.mxu0 %v1300_v33  ;;  %3482 = vmatprep.mubr.f32.mxu0 %v1269_v37  ;;  %v1295_v39 = vld [vmem:[%s5212_s5 + $0x50] sm:$0xff]  ;;  %v1294_v40 = vld [vmem:[%s5212_s5 + $0x48] sm:$0xff]  ;;  %v1293_v41 = vld [vmem:[%s5212_s5 + $0x40] sm:$0xff] }
 0x15e   : > { %3452 = vmatprep.subr.mxu0 %v1299_v34  ;;  %v1292_v42 = vld [vmem:[%s5212_s5 + $0x38] sm:$0xff]  ;;  %v1291_v43 = vld [vmem:[%s5212_s5 + $0x30] sm:$0xff]  ;;  %v1290_v44 = vld [vmem:[%s5212_s5 + $0x28] sm:$0xff] }
 0x15f   : > { %3453 = vmatpush3.msra.mxu0 %v1299_v34  ;;  %v1289_v45 = vld [vmem:[%s5212_s5 + $0x20] sm:$0xff]  ;;  %v1497_v46 = vld [vmem:[%s5213_s6 + $0x78] sm:$0xff]  ;;  %v1496_v47 = vld [vmem:[%s5213_s6 + $0x70] sm:$0xff] }
 0x160   : > { %3454 = vmatprep.subr.mxu0 %v1298_v35  ;;  %v1288_v48 = vld [vmem:[%s5212_s5 + $0x18] sm:$0xff]  ;;  %3506 = vmatprep.subr.mxu1 %v1497_v46  ;;  %v1495_v49 = vld [vmem:[%s5213_s6 + $0x68] sm:$0xff]  ;;  %v1287_v50 = vld [vmem:[%s5212_s5 + $0x10] sm:$0xff] }
 0x161   : > { %3455 = vmatpush3.msra.mxu0 %v1298_v35  ;;  %3507 = vmatpush3.msra.mxu1 %v1497_v46  ;;  %v1494_v51 = vld [vmem:[%s5213_s6 + $0x60] sm:$0xff]  ;;  %v1286_v52 = vld [vmem:[%s5212_s5 + $0x8] sm:$0xff]  ;;  %v1493_v53 = vld [vmem:[%s5213_s6 + $0x58] sm:$0xff] }
 0x162   : > { %3456 = vmatprep.subr.mxu0 %v1297_v36  ;;  %3508 = vmatprep.subr.mxu1 %v1496_v47  ;;  %v1285_v54 = vld [vmem:[%s5212_s5] sm:$0xff]  ;;  %v1492_v55 = vld [vmem:[%s5213_s6 + $0x50] sm:$0xff]  ;;  %v1726_v57 = vld [vmem:[%s5211_s4 + $0x78] sm:$0xff] }
 0x163   : > { %3457 = vmatpush3.msra.mxu0 %v1297_v36  ;;  %3509 = vmatpush3.msra.mxu1 %v1496_v47  ;;  %v1270_v56 = vld [vmem:[#allocation2] sm:$0xff]  ;;  %v1271_v58 = vld [vmem:[#allocation2 + $0x58] sm:$0xff]  ;;  %v1725_v59 = vld [vmem:[%s5211_s4 + $0x70] sm:$0xff] }
 0x164   : > { %3458 = vmatprep.subr.mxu0 %v1296_v38  ;;  %3510 = vmatprep.subr.mxu1 %v1495_v49  ;;  %v1491_v60 = vld [vmem:[%s5213_s6 + $0x48] sm:$0xff]  ;;  %v1272_v61 = vld [vmem:[#allocation2 + $0x18] sm:$0xff]  ;;  %v1273_v63 = vld [vmem:[#allocation2 + $0x50] sm:$0xff] }
 0x165   : > { %3459 = vmatpush3.msra.mxu0 %v1296_v38  ;;  %3511 = vmatpush3.msra.mxu1 %v1495_v49  ;;  %v1724_v62 = vld [vmem:[%s5211_s4 + $0x68] sm:$0xff]  ;;  %v1723_v0 = vld [vmem:[%s5211_s4 + $0x60] sm:$0xff]  ;;  %v1722_v3 = vld [vmem:[%s5211_s4 + $0x58] sm:$0xff] }
 0x166   : > { %3460 = vmatprep.subr.mxu0 %v1295_v39  ;;  %3512 = vmatprep.subr.mxu1 %v1494_v51  ;;  %v1490_v1 = vld [vmem:[%s5213_s6 + $0x40] sm:$0xff]  ;;  %v1274_v2 = vld [vmem:[#allocation2 + $0x68] sm:$0xff]  ;;  %v1721_v5 = vld [vmem:[%s5211_s4 + $0x50] sm:$0xff] }
 0x167   : > { %3461 = vmatpush3.msra.mxu0 %v1295_v39  ;;  %3513 = vmatpush3.msra.mxu1 %v1494_v51  ;;  %v1275_v4 = vld [vmem:[#allocation2 + $0x8] sm:$0xff]  ;;  %v1489_v6 = vld [vmem:[%s5213_s6 + $0x38] sm:$0xff]  ;;  %v1277_v9 = vld [vmem:[#allocation2 + $0x40] sm:$0xff] }
 0x168   : > { %3462 = vmatprep.subr.mxu0 %v1294_v40  ;;  %3514 = vmatprep.subr.mxu1 %v1493_v53  ;;  %v1276_v7 = vld [vmem:[#allocation2 + $0x48] sm:$0xff]  ;;  %v1719_v10 = vld [vmem:[%s5211_s4 + $0x40] sm:$0xff]  ;;  %v1488_v11 = vld [vmem:[%s5213_s6 + $0x30] sm:$0xff] }
 0x169   : > { %3463 = vmatpush3.msra.mxu0 %v1294_v40  ;;  %3515 = vmatpush3.msra.mxu1 %v1493_v53  ;;  %v1720_v8 = vld [vmem:[%s5211_s4 + $0x48] sm:$0xff]  ;;  %v1278_v12 = vld [vmem:[#allocation2 + $0x20] sm:$0xff]  ;;  %v1718_v13 = vld [vmem:[%s5211_s4 + $0x38] sm:$0xff] }
 0x16a   : > { %3464 = vmatprep.subr.mxu0 %v1293_v41  ;;  %3516 = vmatprep.subr.mxu1 %v1492_v55  ;;  %v1279_v14 = vld [vmem:[#allocation2 + $0x10] sm:$0xff]  ;;  %v1487_v16 = vld [vmem:[%s5213_s6 + $0x28] sm:$0xff]  ;;  %v1280_v17 = vld [vmem:[#allocation2 + $0x38] sm:$0xff] }
 0x16b   : > { %3465 = vmatpush3.msra.mxu0 %v1293_v41  ;;  %3517 = vmatpush3.msra.mxu1 %v1492_v55  ;;  %v1717_v15 = vld [vmem:[%s5211_s4 + $0x30] sm:$0xff]  ;;  %v1716_v18 = vld [vmem:[%s5211_s4 + $0x28] sm:$0xff]  ;;  %v1281_v19 = vld [vmem:[#allocation2 + $0x60] sm:$0xff] }
 0x16c   : > { %3466 = vmatprep.subr.mxu0 %v1292_v42  ;;  %3518 = vmatprep.subr.mxu1 %v1491_v60  ;;  %v1715_v20 = vld [vmem:[%s5211_s4 + $0x20] sm:$0xff]  ;;  %v1282_v22 = vld [vmem:[#allocation2 + $0x70] sm:$0xff]  ;;  %v1714_v23 = vld [vmem:[%s5211_s4 + $0x18] sm:$0xff] }
 0x16d   : > { %3467 = vmatpush3.msra.mxu0 %v1292_v42  ;;  %3519 = vmatpush3.msra.mxu1 %v1491_v60  ;;  %v1486_v21 = vld [vmem:[%s5213_s6 + $0x20] sm:$0xff]  ;;  %v1283_v24 = vld [vmem:[#allocation2 + $0x78] sm:$0xff]  ;;  %v1713_v25 = vld [vmem:[%s5211_s4 + $0x10] sm:$0xff] }
 0x16e   : > { %3468 = vmatprep.subr.mxu0 %v1291_v43  ;;  %3520 = vmatprep.subr.mxu1 %v1490_v1  ;;  %v1485_v26 = vld [vmem:[%s5213_s6 + $0x18] sm:$0xff]  ;;  %v1284_v27 = vld [vmem:[#allocation2 + $0x28] sm:$0xff]  ;;  %v1695_v29 = vld [vmem:[%s4239_s20] sm:$0xff] }
 0x16f   : > { %3469 = vmatpush3.msra.mxu0 %v1291_v43  ;;  %3521 = vmatpush3.msra.mxu1 %v1490_v1  ;;  %v1712_v28 = vld [vmem:[%s5211_s4 + $0x8] sm:$0xff]  ;;  %v1711_v30 = vld [vmem:[%s5211_s4] sm:$0xff]  ;;  %v1484_v31 = vld [vmem:[%s5213_s6 + $0x10] sm:$0xff] }
 0x170   : > { %3470 = vmatprep.subr.mxu0 %v1290_v44  ;;  %3522 = vmatprep.subr.mxu1 %v1489_v6  ;;  %v1696_v32 = vld [vmem:[%s4239_s20 + $0x8] sm:$0xff]  ;;  %v1697_v33 = vld [vmem:[%s4239_s20 + $0x10] sm:$0xff]  ;;  %v1482_v36 = vld [vmem:[%s5213_s6] sm:$0xff] }
 0x171   : > { %3471 = vmatpush3.msra.mxu0 %v1290_v44  ;;  %3523 = vmatpush3.msra.mxu1 %v1489_v6  ;;  %v1483_v34 = vld [vmem:[%s5213_s6 + $0x8] sm:$0xff]  ;;  %v1698_v37 = vld [vmem:[%s4239_s20 + $0x18] sm:$0xff]  ;;  %v1699_v38 = vld [vmem:[%s4239_s20 + $0x20] sm:$0xff] }
 0x172   : > { %3472 = vmatprep.subr.mxu0 %v1289_v45  ;;  %3524 = vmatprep.subr.mxu1 %v1488_v11  ;;  %v1466_v35 = vld [vmem:[#allocation3 + $0x28] sm:$0xff]  ;;  %v2444_v40 = vld [vmem:[%s5215_s8 + $0x78] sm:$0xff]  ;;  %v1468_v41 = vld [vmem:[#allocation3 + $0x10] sm:$0xff] }
 0x173   : > { %3473 = vmatpush3.msra.mxu0 %v1289_v45  ;;  %3525 = vmatpush3.msra.mxu1 %v1488_v11  ;;  %v1467_v39 = vld [vmem:[#allocation3 + $0x68] sm:$0xff]  ;;  %v2443_v43 = vld [vmem:[%s5215_s8 + $0x70] sm:$0xff]  ;;  %v1469_v45 = vld [vmem:[#allocation3 + $0x40] sm:$0xff] }
 0x174   : > { %3474 = vmatprep.subr.mxu0 %v1288_v48  ;;  %3526 = vmatprep.subr.mxu1 %v1487_v16  ;;  %v1700_v42 = vld [vmem:[%s4239_s20 + $0x28] sm:$0xff]  ;;  %v1701_v44 = vld [vmem:[%s4239_s20 + $0x30] sm:$0xff]  ;;  %v2441_v49 = vld [vmem:[%s5215_s8 + $0x60] sm:$0xff] }
 0x175   : > { %3475 = vmatpush3.msra.mxu0 %v1288_v48  ;;  %3527 = vmatpush3.msra.mxu1 %v1487_v16  ;;  %v2442_v46 = vld [vmem:[%s5215_s8 + $0x68] sm:$0xff]  ;;  %v1702_v48 = vld [vmem:[%s4239_s20 + $0x38] sm:$0xff]  ;;  %v1471_v51 = vld [vmem:[#allocation3 + $0x30] sm:$0xff] }
 0x176   : > { %3476 = vmatprep.subr.mxu0 %v1287_v50  ;;  %3528 = vmatprep.subr.mxu1 %v1486_v21  ;;  %v1470_v47 = vld [vmem:[#allocation3 + $0x48] sm:$0xff]  ;;  %v1472_v53 = vld [vmem:[#allocation3 + $0x70] sm:$0xff]  ;;  %v1706_v60 = vld [vmem:[%s4239_s20 + $0x58] sm:$0xff] }
 0x177   : > { %3477 = vmatpush3.msra.mxu0 %v1287_v50  ;;  %3529 = vmatpush3.msra.mxu1 %v1486_v21  ;;  %v1703_v50 = vld [vmem:[%s4239_s20 + $0x40] sm:$0xff]  ;;  %v2439_v55 = vld [vmem:[%s5215_s8 + $0x50] sm:$0xff]  ;;  %v1476_v1 = vld [vmem:[#allocation3 + $0x18] sm:$0xff] }
 0x178   : > { %3478 = vmatprep.subr.mxu0 %v1286_v52  ;;  %3530 = vmatprep.subr.mxu1 %v1485_v26  ;;  %v2434_v6 = vld [vmem:[%s5215_s8 + $0x28] sm:$0xff]  ;;  %v2432_v11 = vld [vmem:[%s5215_s8 + $0x18] sm:$0xff]  ;;  %v2429_v16 = vld [vmem:[%s5215_s8] sm:$0xff] }
 0x179   : > { %3479 = vmatpush3.msra.mxu0 %v1286_v52  ;;  %3531 = vmatpush3.msra.mxu1 %v1485_v26  ;;  %v2440_v52 = vld [vmem:[%s5215_s8 + $0x58] sm:$0xff] }
 0x17a   : > { %3480 = vmatprep.subr.mxu0 %v1285_v54  ;;  %3532 = vmatprep.subr.mxu1 %v1484_v31 }
 0x17b   : > { %3481 = vmatpush3.msra.mxu0 %v1285_v54  ;;  %3533 = vmatpush3.msra.mxu1 %v1484_v31  ;;  %v1704_v54 = vld [vmem:[%s4239_s20 + $0x48] sm:$0xff] }
 0x17c   : > { %3483 = vmatmul.mubr.f32.vlgmr.msra.gmra.mxu0 %v1270_v56  ;;  %3562 = vmatprep.subr.mxu0 %v1726_v57  ;;  %v1705_v56 = vld [vmem:[%s4239_s20 + $0x50] sm:$0xff] }
 0x17d   : > { %3563 = vmatpush3.msra.mxu0 %v1726_v57  ;;  %3485 = vmatprep.mubr.f32.mxu0 %v1271_v58  ;;  %v1473_v57 = vld [vmem:[#allocation3 + $0x38] sm:$0xff]  ;;  %v2438_v58 = vld [vmem:[%s5215_s8 + $0x48] sm:$0xff] }
 0x17e   : > { %3564 = vmatprep.subr.mxu0 %v1725_v59  ;;  %3534 = vmatprep.subr.mxu1 %v1483_v34 }
 0x17f   : > { %3565 = vmatpush3.msra.mxu0 %v1725_v59  ;;  %3535 = vmatpush3.msra.mxu1 %v1483_v34  ;;  %v1474_v59 = vld [vmem:[#allocation3 + $0x20] sm:$0xff] }
 0x180   : > { %3486 = vmatmul.mubr.f32.gmra.mxu0 %v1272_v61  ;;  %3566 = vmatprep.subr.mxu0 %v1724_v62  ;;  %v2437_v61 = vld [vmem:[%s5215_s8 + $0x40] sm:$0xff] }
 0x181   : > { %3567 = vmatpush3.msra.mxu0 %v1724_v62  ;;  %3488 = vmatprep.mubr.f32.mxu0 %v1273_v63  ;;  %v1707_v62 = vld [vmem:[%s4239_s20 + $0x60] sm:$0xff]  ;;  %v1475_v63 = vld [vmem:[#allocation3 + $0x78] sm:$0xff] }
 0x182   : > { %3568 = vmatprep.subr.mxu0 %v1723_v0  ;;  %3538 = vmatprep.mubr.f32.mxu1 %v1466_v35  ;;  %v1243_v35 = vld [vmem:[%s4244_s3 + $0x30] sm:$0xff] }
 0x183   : > { %3569 = vmatpush3.msra.mxu0 %v1723_v0  ;;  %3536 = vmatprep.subr.mxu1 %v1482_v36  ;;  %v2436_v0 = vld [vmem:[%s5215_s8 + $0x38] sm:$0xff] }
 0x184   : > { %3489 = vmatmul.mubr.f32.gmra.mxu0 %v1274_v2  ;;  %3570 = vmatprep.subr.mxu0 %v1722_v3  ;;  %v1708_v2 = vld [vmem:[%s4239_s20 + $0x68] sm:$0xff] }
 0x185   : > { %3571 = vmatpush3.msra.mxu0 %v1722_v3  ;;  %3491 = vmatprep.mubr.f32.mxu0 %v1275_v4  ;;  %v2435_v3 = vld [vmem:[%s5215_s8 + $0x30] sm:$0xff] }
 0x186   : > { %3572 = vmatprep.subr.mxu0 %v1721_v5  ;;  %3537 = vmatpush3.msra.mxu1 %v1482_v36  ;;  %v1709_v4 = vld [vmem:[%s4239_s20 + $0x70] sm:$0xff] }
 0x187   : > { %3573 = vmatpush3.msra.mxu0 %v1721_v5  ;;  %3539 = vmatmul.mubr.f32.vlgmr.msra.gmra.mxu1 %v1467_v39  ;;  %v1477_v5 = vld [vmem:[#allocation3 + $0x58] sm:$0xff] }
 0x188   : > { %3492 = vmatmul.mubr.f32.gmra.mxu0 %v1276_v7  ;;  %3574 = vmatprep.subr.mxu0 %v1720_v8  ;;  %v1710_v7 = vld [vmem:[%s4239_s20 + $0x78] sm:$0xff]  ;;  %s5234_s20 = sld [smem:[#allocation11_spill]] }
 0x189   : > { %3575 = vmatpush3.msra.mxu0 %v1720_v8  ;;  %3494 = vmatprep.mubr.f32.mxu0 %v1277_v9  ;;  %v2433_v8 = vld [vmem:[%s5215_s8 + $0x20] sm:$0xff] }
 0x18a   : > { %3576 = vmatprep.subr.mxu0 %v1719_v10  ;;  %3618 = vmatprep.subr.mxu1 %v2444_v40  ;;  %v1478_v9 = vld [vmem:[#allocation3] sm:$0xff] }
 0x18b   : > { %3577 = vmatpush3.msra.mxu0 %v1719_v10  ;;  %3541 = vmatprep.mubr.f32.mxu1 %v1468_v41  ;;  %v1479_v10 = vld [vmem:[#allocation3 + $0x8] sm:$0xff] }
 0x18c   : > { %3495 = vmatmul.mubr.f32.gmra.mxu0 %v1278_v12  ;;  %3578 = vmatprep.subr.mxu0 %v1718_v13  ;;  %v2431_v12 = vld [vmem:[%s5215_s8 + $0x10] sm:$0xff] }
 0x18d   : > { %3579 = vmatpush3.msra.mxu0 %v1718_v13  ;;  %3497 = vmatprep.mubr.f32.mxu0 %v1279_v14  ;;  %v1480_v13 = vld [vmem:[#allocation3 + $0x60] sm:$0xff]  ;;  %v1481_v14 = vld [vmem:[#allocation3 + $0x50] sm:$0xff] }
 0x18e   : > { %3580 = vmatprep.subr.mxu0 %v1717_v15  ;;  %3619 = vmatpush3.msra.mxu1 %v2444_v40 }
 0x18f   : > { %3581 = vmatpush3.msra.mxu0 %v1717_v15  ;;  %3620 = vmatprep.subr.mxu1 %v2443_v43  ;;  %v2430_v15 = vld [vmem:[%s5215_s8 + $0x8] sm:$0xff] }
 0x190   : > { %3498 = vmatmul.mubr.f32.gmra.mxu0 %v1280_v17  ;;  %3582 = vmatprep.subr.mxu0 %v1716_v18  ;;  %v4503_v17 = vld [vmem:[%s5217_s10 + $0x5] ss:$0 sm:$0xff] }
 0x191   : > { %3583 = vmatpush3.msra.mxu0 %v1716_v18  ;;  %3500 = vmatprep.mubr.f32.mxu0 %v1281_v19 }
 0x192   : > { %3584 = vmatprep.subr.mxu0 %v1715_v20  ;;  %3621 = vmatpush3.msra.mxu1 %v2443_v43  ;;  %v1245_v43 = vld [vmem:[%s4244_s3 + $0x40] sm:$0xff] }
 0x193   : > { %3585 = vmatpush3.msra.mxu0 %v1715_v20  ;;  %3542 = vmatmul.mubr.f32.gmra.mxu1 %v1469_v45  ;;  %v1247_v45 = vld [vmem:[%s4244_s3 + $0x50] sm:$0xff] }
 0x194   : > { %3501 = vmatmul.mubr.f32.gmra.mxu0 %v1282_v22  ;;  %3586 = vmatprep.subr.mxu0 %v1714_v23 }
 0x195   : > { %3587 = vmatpush3.msra.mxu0 %v1714_v23  ;;  %3503 = vmatprep.mubr.f32.mxu0 %v1283_v24  ;;  %v1237_v23 = vld [vmem:[%s4244_s3] sm:$0xff] }
 0x196   : > { %3588 = vmatprep.subr.mxu0 %v1713_v25  ;;  %3622 = vmatprep.subr.mxu1 %v2442_v46 }
 0x197   : > { %3589 = vmatpush3.msra.mxu0 %v1713_v25  ;;  %3623 = vmatpush3.msra.mxu1 %v2442_v46  ;;  %v1239_v25 = vld [vmem:[%s4244_s3 + $0x10] sm:$0xff] }
 0x198   : > { %3504 = vmatmul.mubr.f32.gmra.mxu0 %v1284_v27  ;;  %3590 = vmatprep.subr.mxu0 %v1712_v28 }
 0x199   : > { %3591 = vmatpush3.msra.mxu0 %v1712_v28  ;;  %3594 = vmatprep.mubr.f32.mxu0 %v1695_v29 }
 0x19a   : > { %3592 = vmatprep.subr.mxu0 %v1711_v30  ;;  %3544 = vmatprep.mubr.f32.mxu1 %v1470_v47 }
 0x19b   : > { %3593 = vmatpush3.msra.mxu0 %v1711_v30  ;;  %3624 = vmatprep.subr.mxu1 %v2441_v49 }
 0x19c   : > { %3595 = vmatmul.mubr.f32.vlgmr.msra.gmra.mxu0 %v1696_v32  ;;  %3625 = vmatpush3.msra.mxu1 %v2441_v49 }
 0x19d   : > { %3597 = vmatprep.mubr.f32.mxu0 %v1697_v33  ;;  %3545 = vmatmul.mubr.f32.gmra.mxu1 %v1471_v51  ;;  %v1241_v33 = vld [vmem:[%s4244_s3 + $0x20] sm:$0xff] }
 0x19e   : > { %3626 = vmatprep.subr.mxu1 %v2440_v52  ;;  %3547 = vmatprep.mubr.f32.mxu1 %v1472_v53  ;;  %v1249_v53 = vld [vmem:[%s4244_s3 + $0x60] sm:$0xff] }
 0x19f   : > { %3627 = vmatpush3.msra.mxu1 %v2440_v52 }
 0x1a0   : > { %3598 = vmatmul.mubr.f32.gmra.mxu0 %v1698_v37  ;;  %3628 = vmatprep.subr.mxu1 %v2439_v55 }
 0x1a1   : > { %3600 = vmatprep.mubr.f32.mxu0 %v1699_v38  ;;  %3629 = vmatpush3.msra.mxu1 %v2439_v55  ;;  %v1251_v55 = vld [vmem:[%s4244_s3 + $0x70] sm:$0xff] }
 0x1a2   : > { %3548 = vmatmul.mubr.f32.gmra.mxu1 %v1473_v57  ;;  %3630 = vmatprep.subr.mxu1 %v2438_v58 }
 0x1a3   : > { %3631 = vmatpush3.msra.mxu1 %v2438_v58  ;;  %3550 = vmatprep.mubr.f32.mxu1 %v1474_v59 }
 0x1a4   : > { %3601 = vmatmul.mubr.f32.gmra.mxu0 %v1700_v42  ;;  %3632 = vmatprep.subr.mxu1 %v2437_v61 }
 0x1a5   : > { %3603 = vmatprep.mubr.f32.mxu0 %v1701_v44  ;;  %3633 = vmatpush3.msra.mxu1 %v2437_v61 }
 0x1a6   : > { %3551 = vmatmul.mubr.f32.gmra.mxu1 %v1475_v63  ;;  %3634 = vmatprep.subr.mxu1 %v2436_v0  ;;  %v1253_v63 = vld [vmem:[%s4244_s3 + $0x80] sm:$0xff] }
 0x1a7   : > { %3635 = vmatpush3.msra.mxu1 %v2436_v0  ;;  %3553 = vmatprep.mubr.f32.mxu1 %v1476_v1  ;;  %v1255_v1 = vld [vmem:[%s4244_s3 + $0x90] sm:$0xff] }
 0x1a8   : > { %3604 = vmatmul.mubr.f32.gmra.mxu0 %v1702_v48  ;;  %3636 = vmatprep.subr.mxu1 %v2435_v3 }
 0x1a9   : > { %3606 = vmatprep.mubr.f32.mxu0 %v1703_v50  ;;  %3637 = vmatpush3.msra.mxu1 %v2435_v3 }
 0x1aa   : > { %3554 = vmatmul.mubr.f32.gmra.mxu1 %v1477_v5  ;;  %3638 = vmatprep.subr.mxu1 %v2434_v6 }
 0x1ab   : > { %3639 = vmatpush3.msra.mxu1 %v2434_v6  ;;  %3556 = vmatprep.mubr.f32.mxu1 %v1478_v9  ;;  %v1257_v9 = vld [vmem:[%s4244_s3 + $0xa0] sm:$0xff] }
 0x1ac   : > { %3607 = vmatmul.mubr.f32.gmra.mxu0 %v1704_v54  ;;  %3640 = vmatprep.subr.mxu1 %v2433_v8 }
 0x1ad   : > { %3609 = vmatprep.mubr.f32.mxu0 %v1705_v56  ;;  %3641 = vmatpush3.msra.mxu1 %v2433_v8 }
 0x1ae   : > { %3557 = vmatmul.mubr.f32.gmra.mxu1 %v1479_v10  ;;  %3642 = vmatprep.subr.mxu1 %v2432_v11 }
 0x1af   : > { %3643 = vmatpush3.msra.mxu1 %v2432_v11  ;;  %3559 = vmatprep.mubr.f32.mxu1 %v1480_v13  ;;  %v1259_v11 = vld [vmem:[%s4244_s3 + $0xb0] sm:$0xff] }
 0x1b0   : > { %3610 = vmatmul.mubr.f32.gmra.mxu0 %v1706_v60  ;;  %3644 = vmatprep.subr.mxu1 %v2431_v12 }
 0x1b1   : > { %3612 = vmatprep.mubr.f32.mxu0 %v1707_v62  ;;  %3645 = vmatpush3.msra.mxu1 %v2431_v12 }
 0x1b2   : > { %3560 = vmatmul.mubr.f32.gmra.mxu1 %v1481_v14  ;;  %3646 = vmatprep.subr.mxu1 %v2430_v15 }
 0x1b3   : > { %3647 = vmatpush3.msra.mxu1 %v2430_v15 }
 0x1b4   : > { %3613 = vmatmul.mubr.f32.gmra.mxu0 %v1708_v2  ;;  %3648 = vmatprep.subr.mxu1 %v2429_v16 }
 0x1b5   : > { %3615 = vmatprep.mubr.f32.mxu0 %v1709_v4  ;;  %3649 = vmatpush3.msra.mxu1 %v2429_v16 }
 0x1b8   : > { %3616 = vmatmul.mubr.f32.gmra.mxu0 %v1710_v7 }
 0x23c   : > { %v3484_v18 = vpop.f32.mrf.mxu0 }
 0x23d   : > { %v1377_v19 = vadd.f32 %v3484_v18, %v4503_v17 }
 0x23e   : > { %v1371_v20 = vpop.f32.mrf.mxu0 }
 0x23f   : > { %v1372_v21 = vadd.f32 %v4503_v17, %v1371_v20  ;;  %v1451_v22 = vmax.f32 %v1377_v19, 0.0  ;;  %v1261_v20 = vld [vmem:[%s4244_s3 + $0xc0] sm:$0xff] }
 0x240   : > { %v3487_v24 = vpop.f32.mrf.mxu0 }
 0x241   : > { %v1450_v26 = vmax.f32 %v1372_v21, 0.0  ;;  %v1387_v27 = vadd.f32 %v3487_v24, %v4503_v17  ;;  %v1664_v31 = vadd.f32 %v1451_v22, %v1239_v25  ;;  %v1263_v22 = vld [vmem:[%s4244_s3 + $0xd0] sm:$0xff] }
 0x242   : > { %v1381_v28 = vpop.f32.mrf.mxu0 }
 0x243   : > { %v1663_v29 = vadd.f32 %v1450_v26, %v1237_v23  ;;  %v1382_v30 = vadd.f32 %v4503_v17, %v1381_v28  ;;  %v1453_v32 = vmax.f32 %v1387_v27, 0.0 }
 0x244   : > { %v3490_v34 = vpop.f32.mrf.mxu0 }
 0x245   : > { %v1452_v36 = vmax.f32 %v1382_v30, 0.0  ;;  %v1397_v37 = vadd.f32 %v3490_v34, %v4503_v17  ;;  %3650 = vmatprep.mubr.f32.mxu1 %v1663_v29  ;;  %v1666_v41 = vadd.f32 %v1453_v32, %v1243_v35  ;;  %v1265_v30 = vld [vmem:[%s4244_s3 + $0xe0] sm:$0xff]  ;;  %v1267_v32 = vld [vmem:[%s4244_s3 + $0xf0] sm:$0xff] }
 0x246   : > { %v1391_v38 = vpop.f32.mrf.mxu0  ;;  %3651 = vmatmul.mubr.f32.vlgmr.msra.gmra.mxu1 %v1664_v31  ;;  %v3151_v34 = vld [vmem:[%s5217_s10] ss:$0 sm:$0xff] }
 0x247   : > { %v1665_v39 = vadd.f32 %v1452_v36, %v1241_v33  ;;  %v1392_v40 = vadd.f32 %v4503_v17, %v1391_v38  ;;  %v1455_v42 = vmax.f32 %v1397_v37, 0.0 }
 0x248   : > { %v3493_v44 = vpop.f32.mrf.mxu0 }
 0x249   : > { %v1454_v46 = vmax.f32 %v1392_v40, 0.0  ;;  %v1407_v47 = vadd.f32 %v3493_v44, %v4503_v17  ;;  %3653 = vmatprep.mubr.f32.mxu1 %v1665_v39  ;;  %v1668_v51 = vadd.f32 %v1455_v42, %v1247_v45  ;;  %v3540_v40 = vpop.f32.mrf.mxu1 }
 0x24a   : > { %v1401_v48 = vpop.f32.mrf.mxu0  ;;  %3654 = vmatmul.mubr.f32.gmra.mxu1 %v1666_v41 }
 0x24b   : > { %v1667_v49 = vadd.f32 %v1454_v46, %v1245_v43  ;;  %v1402_v50 = vadd.f32 %v4503_v17, %v1401_v48  ;;  %v1457_v52 = vmax.f32 %v1407_v47, 0.0  ;;  %v1568_v45 = vpop.f32.mrf.mxu1  ;;  %v1238_v48 = vld [vmem:[%s4244_s3 + $0x8] sm:$0xff] }
 0x24c   : > { %v3496_v54 = vpop.f32.mrf.mxu0 }
 0x24d   : > { %v1456_v56 = vmax.f32 %v1402_v50, 0.0  ;;  %v1417_v57 = vadd.f32 %v3496_v54, %v4503_v17  ;;  %3656 = vmatprep.mubr.f32.mxu1 %v1667_v49  ;;  %v1670_v61 = vadd.f32 %v1457_v52, %v1251_v55 }
 0x24e   : > { %v1411_v58 = vpop.f32.mrf.mxu0  ;;  %3657 = vmatmul.mubr.f32.gmra.mxu1 %v1668_v51 }
 0x24f   : > { %v1669_v59 = vadd.f32 %v1456_v56, %v1249_v53  ;;  %v1412_v60 = vadd.f32 %v4503_v17, %v1411_v58  ;;  %v1459_v62 = vmax.f32 %v1417_v57, 0.0 }
 0x250   : > { %v3499_v0 = vpop.f32.mrf.mxu0 }
 0x251   : > { %v1458_v2 = vmax.f32 %v1412_v60, 0.0  ;;  %v1427_v3 = vadd.f32 %v3499_v0, %v4503_v17  ;;  %3659 = vmatprep.mubr.f32.mxu1 %v1669_v59  ;;  %v1672_v7 = vadd.f32 %v1459_v62, %v1255_v1 }
 0x252   : > { %v1421_v4 = vpop.f32.mrf.mxu0  ;;  %3660 = vmatmul.mubr.f32.gmra.mxu1 %v1670_v61 }
 0x253   : > { %v1671_v5 = vadd.f32 %v1458_v2, %v1253_v63  ;;  %v1422_v6 = vadd.f32 %v4503_v17, %v1421_v4  ;;  %v1461_v8 = vmax.f32 %v1427_v3, 0.0 }
 0x254   : > { %v3502_v10 = vpop.f32.mrf.mxu0 }
 0x255   : > { %v1460_v12 = vmax.f32 %v1422_v6, 0.0  ;;  %v1437_v13 = vadd.f32 %v3502_v10, %v4503_v17  ;;  %3662 = vmatprep.mubr.f32.mxu1 %v1671_v5  ;;  %v1674_v18 = vadd.f32 %v1461_v8, %v1259_v11 }
 0x256   : > { %v1431_v14 = vpop.f32.mrf.mxu0  ;;  %3663 = vmatmul.mubr.f32.gmra.mxu1 %v1672_v7 }
 0x257   : > { %v1673_v15 = vadd.f32 %v1460_v12, %v1257_v9  ;;  %v1432_v16 = vadd.f32 %v4503_v17, %v1431_v14  ;;  %v1463_v19 = vmax.f32 %v1437_v13, 0.0  ;;  %v4597_v13 = vld [vmem:[%s5217_s10 + $0x8] ss:$0 sm:$0xff] }
 0x258   : > { %v3505_v21 = vpop.f32.mrf.mxu0 }
 0x259   : > { %v1462_v23 = vmax.f32 %v1432_v16, 0.0  ;;  %v1447_v24 = vadd.f32 %v3505_v21, %v4503_v17  ;;  %3665 = vmatprep.mubr.f32.mxu1 %v1673_v15  ;;  %v1676_v28 = vadd.f32 %v1463_v19, %v1263_v22 }
 0x25a   : > { %v1441_v25 = vpop.f32.mrf.mxu0  ;;  %3666 = vmatmul.mubr.f32.gmra.mxu1 %v1674_v18 }
 0x25b   : > { %v1675_v26 = vadd.f32 %v1462_v23, %v1261_v20  ;;  %v1442_v27 = vadd.f32 %v4503_v17, %v1441_v25  ;;  %v1465_v29 = vmax.f32 %v1447_v24, 0.0  ;;  %v3150_v17 = vld [vmem:[%s5217_s10 + $0x6] ss:$0 sm:$0xff] }
 0x25c   : > { %v3596_v31 = vpop.f32.mrf.mxu0  ;;  %v4546_v42 = vadd.f32 %v3540_v40, %v3150_v17  ;;  %v1569_v47 = vadd.f32 %v3150_v17, %v1568_v45 }
 0x25d   : > { %v1464_v33 = vmax.f32 %v1442_v27, 0.0  ;;  %3668 = vmatprep.mubr.f32.mxu1 %v1675_v26  ;;  %v1678_v38 = vadd.f32 %v1465_v29, %v1267_v32  ;;  %v4548_v43 = vadd.f32 %v3596_v31, %v3151_v34 }
 0x25e   : > { %v1797_v35 = vpop.f32.mrf.mxu0  ;;  %3669 = vmatmul.mubr.f32.gmra.mxu1 %v1676_v28  ;;  %v1647_v50 = vmax.f32 %v1569_v47, 0.0 }
 0x25f   : > { %v1677_v36 = vadd.f32 %v1464_v33, %v1265_v30  ;;  %v4540_v37 = vadd.f32 %v3151_v34, %v1797_v35 }
 0x260   : > { %v3599_v39 = vpop.f32.mrf.mxu0  ;;  %v1679_v54 = vadd.f32 %v1647_v50, %v1238_v48 }
 0x261   : > { %1876 = vadd.xlane.f32.xlu0 %v4540_v37  ;;  %3671 = vmatprep.mubr.f32.mxu1 %v1677_v36  ;;  %v4555_v51 = vadd.f32 %v3599_v39, %v3151_v34 }
 0x262   : > { %v1807_v41 = vpop.f32.mrf.mxu0  ;;  %3672 = vmatmul.mubr.f32.gmra.mxu1 %v1678_v38 }
 0x263   : > { %v4550_v44 = vadd.f32 %v3151_v34, %v1807_v41  ;;  %3762 = vmatprep.mubr.f32.mxu1 %v1679_v54 }
 0x264   : > { %v3602_v46 = vpop.f32.mrf.mxu0 }
 0x265   : > { %1880 = vadd.xlane.f32.xlu1 %v4550_v44  ;;  %1878 = vadd.xlane.f32.xlu0 %v4548_v43  ;;  %v4561_v56 = vadd.f32 %v3602_v46, %v3151_v34 }
 0x266   : > { %v1817_v49 = vpop.f32.mrf.mxu0 }
 0x267   : > { %v4557_v52 = vadd.f32 %v3151_v34, %v1817_v49 }
 0x268   : > { %v3605_v53 = vpop.f32.mrf.mxu0 }
 0x269   : > { %1882 = vadd.xlane.f32.xlu1 %v4555_v51  ;;  %1884 = vadd.xlane.f32.xlu0 %v4557_v52  ;;  %v4567_v60 = vadd.f32 %v3605_v53, %v3151_v34 }
 0x26a   : > { %v1827_v55 = vpop.f32.mrf.mxu0 }
 0x26b   : > { %v4563_v57 = vadd.f32 %v3151_v34, %v1827_v55 }
 0x26c   : > { %v3608_v58 = vpop.f32.mrf.mxu0 }
 0x26d   : > { %1886 = vadd.xlane.f32.xlu1 %v4561_v56  ;;  %1888 = vadd.xlane.f32.xlu0 %v4563_v57  ;;  %v4573_v0 = vadd.f32 %v3608_v58, %v3151_v34 }
 0x26e   : > { %v1837_v59 = vpop.f32.mrf.mxu0 }
 0x26f   : > { %v4569_v61 = vadd.f32 %v3151_v34, %v1837_v59 }
 0x270   : > { %v3611_v62 = vpop.f32.mrf.mxu0 }
 0x271   : > { %1890 = vadd.xlane.f32.xlu1 %v4567_v60  ;;  %1892 = vadd.xlane.f32.xlu0 %v4569_v61  ;;  %v4579_v4 = vadd.f32 %v3611_v62, %v3151_v34 }
 0x272   : > { %v1847_v63 = vpop.f32.mrf.mxu0 }
 0x273   : > { %v4575_v1 = vadd.f32 %v3151_v34, %v1847_v63 }
 0x274   : > { %v3614_v2 = vpop.f32.mrf.mxu0 }
 0x275   : > { %1894 = vadd.xlane.f32.xlu1 %v4573_v0  ;;  %1896 = vadd.xlane.f32.xlu0 %v4575_v1  ;;  %v4585_v8 = vadd.f32 %v3614_v2, %v3151_v34 }
 0x276   : > { %v1857_v3 = vpop.f32.mrf.mxu0 }
 0x277   : > { %v4581_v5 = vadd.f32 %v3151_v34, %v1857_v3 }
 0x278   : > { %v3617_v6 = vpop.f32.mrf.mxu0 }
 0x279   : > { %1898 = vadd.xlane.f32.xlu1 %v4579_v4  ;;  %1900 = vadd.xlane.f32.xlu0 %v4581_v5  ;;  %v4591_v10 = vadd.f32 %v3617_v6, %v3151_v34 }
 0x27a   : > { %v1867_v7 = vpop.f32.mrf.mxu0 }
 0x27b   : > { %v4587_v9 = vadd.f32 %v3151_v34, %v1867_v7 }
 0x27d   : > { %1902 = vadd.xlane.f32.xlu1 %v4585_v8  ;;  %1904 = vadd.xlane.f32.xlu0 %v4587_v9 }
 0x281   : > { %1906 = vadd.xlane.f32.xlu1 %v4591_v10 }
 0x2ea   : > { %v1877_v11 = vpop.xlane.xlu0 %1876 }
 0x2eb   : > { %v1908_v12 = vmul.f32 0.03125, %v1877_v11 }
 0x2ed   : > { %v1924_v14 = vsub.f32 %v4540_v37, %v1908_v12 }
 0x2ee   : > { %v1881_v15 = vpop.xlane.xlu1 %1880  ;;  %v1879_v16 = vpop.xlane.xlu0 %1878 }
 0x2ef   : > { %v1910_v18 = vmul.f32 0.03125, %v1881_v15  ;;  %v1909_v19 = vmul.f32 0.03125, %v1879_v16  ;;  %v4601_v20 = vmul.f32 %v4597_v13, %v1924_v14 }
 0x2f1   : > { %v1926_v21 = vsub.f32 %v4550_v44, %v1910_v18  ;;  %v1925_v22 = vsub.f32 %v4548_v43, %v1909_v19  ;;  %v1960_v23 = vmul.f32 %v4601_v20, %v4601_v20 }
 0x2f2   : > { %v1883_v24 = vpop.xlane.xlu1 %1882  ;;  %v1885_v25 = vpop.xlane.xlu0 %1884 }
 0x2f3   : > { %v1911_v26 = vmul.f32 0.03125, %v1883_v24  ;;  %v1912_v27 = vmul.f32 0.03125, %v1885_v25  ;;  %1976 = vadd.xlane.f32.xlu0 %v1960_v23  ;;  %v4608_v28 = vmul.f32 %v4597_v13, %v1925_v22  ;;  %v4611_v29 = vmul.f32 %v4597_v13, %v1926_v21 }
 0x2f5   : > { %v1927_v30 = vsub.f32 %v4555_v51, %v1911_v26  ;;  %v1928_v31 = vsub.f32 %v4557_v52, %v1912_v27  ;;  %v1961_v32 = vmul.f32 %v4608_v28, %v4608_v28  ;;  %v1962_v33 = vmul.f32 %v4611_v29, %v4611_v29 }
 0x2f6   : > { %v1887_v34 = vpop.xlane.xlu1 %1886  ;;  %v1889_v35 = vpop.xlane.xlu0 %1888 }
 0x2f7   : > { %v1913_v36 = vmul.f32 0.03125, %v1887_v34  ;;  %v1914_v37 = vmul.f32 0.03125, %v1889_v35  ;;  %1978 = vadd.xlane.f32.xlu1 %v1961_v32  ;;  %1980 = vadd.xlane.f32.xlu0 %v1962_v33  ;;  %v4620_v17 = vmul.f32 %v4597_v13, %v1927_v30  ;;  %v4623_v38 = vmul.f32 %v4597_v13, %v1928_v31 }
 0x2f9   : > { %v1929_v39 = vsub.f32 %v4561_v56, %v1913_v36  ;;  %v1930_v40 = vsub.f32 %v4563_v57, %v1914_v37  ;;  %v1963_v41 = vmul.f32 %v4620_v17, %v4620_v17  ;;  %v1964_v43 = vmul.f32 %v4623_v38, %v4623_v38 }
 0x2fa   : > { %v1891_v44 = vpop.xlane.xlu1 %1890  ;;  %v1893_v45 = vpop.xlane.xlu0 %1892 }
 0x2fb   : > { %v1915_v46 = vmul.f32 0.03125, %v1891_v44  ;;  %v1916_v47 = vmul.f32 0.03125, %v1893_v45  ;;  %1982 = vadd.xlane.f32.xlu1 %v1963_v41  ;;  %1984 = vadd.xlane.f32.xlu0 %v1964_v43  ;;  %v4632_v48 = vmul.f32 %v4597_v13, %v1929_v39  ;;  %v4635_v49 = vmul.f32 %v4597_v13, %v1930_v40 }
 0x2fd   : > { %v1931_v50 = vsub.f32 %v4567_v60, %v1915_v46  ;;  %v1932_v51 = vsub.f32 %v4569_v61, %v1916_v47  ;;  %v1965_v52 = vmul.f32 %v4632_v48, %v4632_v48  ;;  %v1966_v53 = vmul.f32 %v4635_v49, %v4635_v49 }
 0x2fe   : > { %v1895_v54 = vpop.xlane.xlu1 %1894  ;;  %v1897_v55 = vpop.xlane.xlu0 %1896 }
 0x2ff   : > { %v1917_v56 = vmul.f32 0.03125, %v1895_v54  ;;  %v1918_v57 = vmul.f32 0.03125, %v1897_v55  ;;  %1986 = vadd.xlane.f32.xlu1 %v1965_v52  ;;  %1988 = vadd.xlane.f32.xlu0 %v1966_v53  ;;  %v4644_v58 = vmul.f32 %v4597_v13, %v1931_v50  ;;  %v4647_v59 = vmul.f32 %v4597_v13, %v1932_v51 }
 0x300   : > { %v2145_v55 = vlaneseq }
 0x301   : > { %v1933_v60 = vsub.f32 %v4573_v0, %v1917_v56  ;;  %v1934_v61 = vsub.f32 %v4575_v1, %v1918_v57  ;;  %v1967_v62 = vmul.f32 %v4644_v58, %v4644_v58  ;;  %v1968_v63 = vmul.f32 %v4647_v59, %v4647_v59 }
 0x302   : > { %v1899_v2 = vpop.xlane.xlu1 %1898  ;;  %v1901_v3 = vpop.xlane.xlu0 %1900 }
 0x303   : > { %v1919_v6 = vmul.f32 0.03125, %v1899_v2  ;;  %v1920_v7 = vmul.f32 0.03125, %v1901_v3  ;;  %1990 = vadd.xlane.f32.xlu1 %v1967_v62  ;;  %1992 = vadd.xlane.f32.xlu0 %v1968_v63  ;;  %v4656_v11 = vmul.f32 %v4597_v13, %v1933_v60  ;;  %v4659_v12 = vmul.f32 %v4597_v13, %v1934_v61 }
 0x304   : > { %v2146_v2 = vshrl.u32 %v2145_v55, 7 }
 0x305   : > { %v1935_v0 = vsub.f32 %v4579_v4, %v1919_v6  ;;  %v1936_v1 = vsub.f32 %v4581_v5, %v1920_v7  ;;  %v1969_v14 = vmul.f32 %v4656_v11, %v4656_v11  ;;  %v1970_v15 = vmul.f32 %v4659_v12, %v4659_v12  ;;  %v1236_v7 = vld [vmem:[%s5217_s10 + $0x7] sm:$0x1] }
 0x306   : > { %v1903_v16 = vpop.xlane.xlu1 %1902  ;;  %v1905_v18 = vpop.xlane.xlu0 %1904 }
 0x307   : > { %v1921_v19 = vmul.f32 0.03125, %v1903_v16  ;;  %v1922_v21 = vmul.f32 0.03125, %v1905_v18  ;;  %1994 = vadd.xlane.f32.xlu1 %v1969_v14  ;;  %1996 = vadd.xlane.f32.xlu0 %v1970_v15  ;;  %v4668_v22 = vmul.f32 %v4597_v13, %v1935_v0  ;;  %v4671_v23 = vmul.f32 %v4597_v13, %v1936_v1  ;;  %v4701_v1 = vld [vmem:[%s5217_s10 + $0x1] ss:$0 sm:$0xff] }
 0x309   : > { %v1937_v4 = vsub.f32 %v4585_v8, %v1921_v19  ;;  %v1938_v5 = vsub.f32 %v4587_v9, %v1922_v21  ;;  %v1971_v24 = vmul.f32 %v4668_v22, %v4668_v22  ;;  %v1972_v25 = vmul.f32 %v4671_v23, %v4671_v23  ;;  %v4707_v21 = vld [vmem:[%s5217_s10 + $0x2] ss:$0 sm:$0xff] }
 0x30a   : > { %v1907_v26 = vpop.xlane.xlu1 %1906 }
 0x30b   : > { %v1923_v27 = vmul.f32 0.03125, %v1907_v26  ;;  %1998 = vadd.xlane.f32.xlu1 %v1971_v24  ;;  %2000 = vadd.xlane.f32.xlu0 %v1972_v25  ;;  %v4680_v30 = vmul.f32 %v4597_v13, %v1937_v4  ;;  %v4683_v31 = vmul.f32 %v4597_v13, %v1938_v5  ;;  %v2128_v4 = vmul.f32 0.5, %v1236_v7 }
 0x30c   : > { %v2147_v5 = vsub.s32 0, %v2146_v2 }
 0x30d   : > { %v1939_v8 = vsub.f32 %v4591_v10, %v1923_v27  ;;  %v1973_v9 = vmul.f32 %v4680_v30, %v4680_v30  ;;  %v1974_v32 = vmul.f32 %v4683_v31, %v4683_v31 }
 0x30f   : > { %2002 = vadd.xlane.f32.xlu1 %v1973_v9  ;;  %2004 = vadd.xlane.f32.xlu0 %v1974_v32  ;;  %v4691_v33 = vmul.f32 %v4597_v13, %v1939_v8 }
 0x311   : > { %v1975_v34 = vmul.f32 %v4691_v33, %v4691_v33 }
 0x313   : > { %2006 = vadd.xlane.f32.xlu1 %v1975_v34 }
 0x37c   : > { %v1977_v35 = vpop.xlane.xlu0 %1976 }
 0x37d   : > { %v2008_v36 = vmul.f32 0.03125, %v1977_v35 }
 0x37f   : > { %v2024_v37 = vadd.f32 1e-05, %v2008_v36 }
 0x380   : > { %v1979_v39 = vpop.xlane.xlu1 %1978  ;;  %v1981_v10 = vpop.xlane.xlu0 %1980 }
 0x381   : > { %3884 = vrsqrt.f32 %v2024_v37  ;;  %v2009_v40 = vmul.f32 0.03125, %v1979_v39  ;;  %v2010_v41 = vmul.f32 0.03125, %v1981_v10  ;;  %v4712_v37 = vrot.slane %v2128_v4, %v2147_v5 }
 0x383   : > { %v2025_v43 = vadd.f32 1e-05, %v2009_v40  ;;  %v2026_v44 = vadd.f32 1e-05, %v2010_v41 }
 0x384   : > { %v1983_v45 = vpop.xlane.xlu1 %1982  ;;  %v1985_v46 = vpop.xlane.xlu0 %1984 }
 0x385   : > { %3886 = vrsqrt.f32 %v2025_v43  ;;  %v2011_v47 = vmul.f32 0.03125, %v1983_v45  ;;  %v2012_v50 = vmul.f32 0.03125, %v1985_v46 }
 0x386   : > { %3888 = vrsqrt.f32 %v2026_v44 }
 0x387   : > { %v2027_v51 = vadd.f32 1e-05, %v2011_v47  ;;  %v2028_v52 = vadd.f32 1e-05, %v2012_v50 }
 0x388   : > { %v1987_v53 = vpop.xlane.xlu1 %1986  ;;  %v1989_v54 = vpop.xlane.xlu0 %1988 }
 0x389   : > { %3890 = vrsqrt.f32 %v2027_v51  ;;  %v2013_v56 = vmul.f32 0.03125, %v1987_v53  ;;  %v2014_v57 = vmul.f32 0.03125, %v1989_v54 }
 0x38a   : > { %3892 = vrsqrt.f32 %v2028_v52 }
 0x38b   : > { %v2029_v60 = vadd.f32 1e-05, %v2013_v56  ;;  %v2030_v61 = vadd.f32 1e-05, %v2014_v57 }
 0x38c   : > { %v1991_v62 = vpop.xlane.xlu1 %1990  ;;  %v1993_v63 = vpop.xlane.xlu0 %1992 }
 0x38d   : > { %3894 = vrsqrt.f32 %v2029_v60  ;;  %v2015_v3 = vmul.f32 0.03125, %v1991_v62  ;;  %v2016_v6 = vmul.f32 0.03125, %v1993_v63 }
 0x38e   : > { %v3885_v0 = vpop.eup %3884  ;;  %3896 = vrsqrt.f32 %v2030_v61 }
 0x38f   : > { %v2031_v14 = vadd.f32 1e-05, %v2015_v3  ;;  %v2032_v15 = vadd.f32 1e-05, %v2016_v6  ;;  %v2056_v16 = vmul.f32 %v3885_v0, %v4601_v20 }
 0x390   : > { %v1995_v18 = vpop.xlane.xlu1 %1994  ;;  %v1997_v19 = vpop.xlane.xlu0 %1996 }
 0x391   : > { %3898 = vrsqrt.f32 %v2031_v14  ;;  %v2017_v24 = vmul.f32 0.03125, %v1995_v18  ;;  %v2018_v25 = vmul.f32 0.03125, %v1997_v19  ;;  %v2076_v26 = vmul.f32 %v4701_v1, %v2056_v16 }
 0x392   : > { %v3887_v27 = vpop.eup %3886  ;;  %3900 = vrsqrt.f32 %v2032_v15 }
 0x393   : > { %v3889_v8 = vpop.eup %3888  ;;  %v2033_v9 = vadd.f32 1e-05, %v2017_v24  ;;  %v2034_v32 = vadd.f32 1e-05, %v2018_v25  ;;  %v2096_v20 = vadd.f32 %v4707_v21, %v2076_v26  ;;  %v2057_v34 = vmul.f32 %v3887_v27, %v4608_v28 }
 0x394   : > { %v1999_v35 = vpop.xlane.xlu1 %1998  ;;  %v2001_v36 = vpop.xlane.xlu0 %2000  ;;  %v2058_v39 = vmul.f32 %v3889_v8, %v4611_v29 }
 0x395   : > { %3902 = vrsqrt.f32 %v2033_v9  ;;  %v2019_v10 = vmul.f32 0.03125, %v1999_v35  ;;  %v2020_v40 = vmul.f32 0.03125, %v2001_v36  ;;  %v2112_v41 = vmax.f32 %v2096_v20, 0.0 }
 0x396   : > { %v3891_v43 = vpop.eup %3890  ;;  %3904 = vrsqrt.f32 %v2034_v32  ;;  %v2077_v44 = vmul.f32 %v4701_v1, %v2057_v34  ;;  %v2078_v45 = vmul.f32 %v4701_v1, %v2058_v39 }
 0x397   : > { %v3893_v46 = vpop.eup %3892  ;;  %v2035_v47 = vadd.f32 1e-05, %v2019_v10  ;;  %v2036_v50 = vadd.f32 1e-05, %v2020_v40  ;;  %v2129_v28 = vmul.f32 0.5, %v2112_v41  ;;  %v2059_v51 = vmul.f32 %v3891_v43, %v4620_v17 }
 0x398   : > { %v2003_v52 = vpop.xlane.xlu1 %2002  ;;  %v2005_v53 = vpop.xlane.xlu0 %2004  ;;  %v2097_v29 = vadd.f32 %v4707_v21, %v2077_v44  ;;  %v2098_v54 = vadd.f32 %v4707_v21, %v2078_v45  ;;  %v2060_v55 = vmul.f32 %v3893_v46, %v4623_v38 }
 0x399   : > { %3906 = vrsqrt.f32 %v2035_v47  ;;  %v2021_v56 = vmul.f32 0.03125, %v2003_v52  ;;  %v2022_v57 = vmul.f32 0.03125, %v2005_v53  ;;  %v4722_v60 = vadd.f32 %v4712_v37, %v2129_v28 }
 0x39a   : > { %v3895_v61 = vpop.eup %3894  ;;  %3908 = vrsqrt.f32 %v2036_v50  ;;  %v2113_v62 = vmax.f32 %v2097_v29, 0.0  ;;  %v2114_v63 = vmax.f32 %v2098_v54, 0.0  ;;  %v2079_v17 = vmul.f32 %v4701_v1, %v2059_v51 }
 0x39b   : > { %v3897_v2 = vpop.eup %3896  ;;  %v2037_v3 = vadd.f32 1e-05, %v2021_v56  ;;  %v2038_v6 = vadd.f32 1e-05, %v2022_v57  ;;  %2165 = vadd.xlane.f32.xlu0 %v4722_v60  ;;  %v2080_v7 = vmul.f32 %v4701_v1, %v2060_v55  ;;  %v2061_v38 = vmul.f32 %v3895_v61, %v4632_v48 }
 0x39c   : > { %v2007_v0 = vpop.xlane.xlu1 %2006  ;;  %v2130_v14 = vmul.f32 0.5, %v2113_v62  ;;  %v2131_v15 = vmul.f32 0.5, %v2114_v63  ;;  %v2099_v16 = vadd.f32 %v4707_v21, %v2079_v17  ;;  %v2062_v18 = vmul.f32 %v3897_v2, %v4635_v49 }
 0x39d   : > { %3910 = vrsqrt.f32 %v2037_v3  ;;  %v2023_v19 = vmul.f32 0.03125, %v2007_v0  ;;  %v2100_v4 = vadd.f32 %v4707_v21, %v2080_v7  ;;  %v2081_v5 = vmul.f32 %v4701_v1, %v2061_v38 }
 0x39e   : > { %v3899_v24 = vpop.eup %3898  ;;  %3912 = vrsqrt.f32 %v2038_v6  ;;  %v4733_v25 = vadd.f32 %v4712_v37, %v2130_v14  ;;  %v4736_v48 = vadd.f32 %v4712_v37, %v2131_v15  ;;  %v2115_v26 = vmax.f32 %v2099_v16, 0.0 }
 0x39f   : > { %v3901_v27 = vpop.eup %3900  ;;  %v2039_v8 = vadd.f32 1e-05, %v2023_v19  ;;  %v2116_v9 = vmax.f32 %v2100_v4, 0.0  ;;  %v2101_v49 = vadd.f32 %v4707_v21, %v2081_v5  ;;  %v2082_v32 = vmul.f32 %v4701_v1, %v2062_v18 }
 0x3a0   : > { %2167 = vadd.xlane.f32.xlu1 %v4733_v25  ;;  %2169 = vadd.xlane.f32.xlu0 %v4736_v48  ;;  %v2132_v20 = vmul.f32 0.5, %v2115_v26  ;;  %v2063_v34 = vmul.f32 %v3899_v24, %v4644_v58  ;;  %v2064_v35 = vmul.f32 %v3901_v27, %v4647_v59 }
 0x3a1   : > { %3914 = vrsqrt.f32 %v2039_v8  ;;  %v2133_v36 = vmul.f32 0.5, %v2116_v9  ;;  %v2117_v39 = vmax.f32 %v2101_v49, 0.0  ;;  %v2102_v10 = vadd.f32 %v4707_v21, %v2082_v32 }
 0x3a2   : > { %v3903_v40 = vpop.eup %3902  ;;  %v4746_v41 = vadd.f32 %v4712_v37, %v2132_v20  ;;  %v2083_v43 = vmul.f32 %v4701_v1, %v2063_v34  ;;  %v2084_v44 = vmul.f32 %v4701_v1, %v2064_v35 }
 0x3a3   : > { %v3905_v45 = vpop.eup %3904  ;;  %v4751_v46 = vadd.f32 %v4712_v37, %v2133_v36  ;;  %v2134_v58 = vmul.f32 0.5, %v2117_v39  ;;  %v2118_v47 = vmax.f32 %v2102_v10, 0.0  ;;  %v2065_v59 = vmul.f32 %v3903_v40, %v4656_v11 }
 0x3a4   : > { %2171 = vadd.xlane.f32.xlu1 %v4746_v41  ;;  %v2103_v50 = vadd.f32 %v4707_v21, %v2083_v43  ;;  %v2104_v28 = vadd.f32 %v4707_v21, %v2084_v44  ;;  %v2066_v51 = vmul.f32 %v3905_v45, %v4659_v12 }
 0x3a5   : > { %2173 = vadd.xlane.f32.xlu0 %v4751_v46  ;;  %v4760_v52 = vadd.f32 %v4712_v37, %v2134_v58  ;;  %v2135_v53 = vmul.f32 0.5, %v2118_v47  ;;  %v2085_v29 = vmul.f32 %v4701_v1, %v2065_v59 }
 0x3a6   : > { %v3907_v54 = vpop.eup %3906  ;;  %v2119_v55 = vmax.f32 %v2103_v50, 0.0  ;;  %v2120_v56 = vmax.f32 %v2104_v28, 0.0  ;;  %v2086_v11 = vmul.f32 %v4701_v1, %v2066_v51  ;;  %v2428_v51 = vld [vmem:[%s5233_s30 + $0x78] sm:$0xff] }
 0x3a7   : > { %v3909_v57 = vpop.eup %3908  ;;  %v4765_v61 = vadd.f32 %v4712_v37, %v2135_v53  ;;  %v2105_v62 = vadd.f32 %v4707_v21, %v2085_v29  ;;  %v2067_v12 = vmul.f32 %v3907_v54, %v4668_v22  ;;  %v2749_v53 = vld [vmem:[%s5216_s9 + $0x70] sm:$0xff]  ;;  %3674 = vmatprep.subr.mxu0 %v2428_v51 }
 0x3a8   : > { %2175 = vadd.xlane.f32.xlu1 %v4760_v52  ;;  %v2136_v63 = vmul.f32 0.5, %v2119_v55  ;;  %v2137_v17 = vmul.f32 0.5, %v2120_v56  ;;  %v2106_v2 = vadd.f32 %v4707_v21, %v2086_v11  ;;  %v2068_v3 = vmul.f32 %v3909_v57, %v4671_v23  ;;  %3675 = vmatpush3.msra.mxu0 %v2428_v51 }
 0x3a9   : > { %2177 = vadd.xlane.f32.xlu0 %v4765_v61  ;;  %v2121_v6 = vmax.f32 %v2105_v62, 0.0  ;;  %v2087_v7 = vmul.f32 %v4701_v1, %v2067_v12 }
 0x3aa   : > { %v3911_v38 = vpop.eup %3910  ;;  %v4775_v0 = vadd.f32 %v4712_v37, %v2136_v63  ;;  %v4778_v14 = vadd.f32 %v4712_v37, %v2137_v17  ;;  %v2122_v22 = vmax.f32 %v2106_v2, 0.0  ;;  %v2088_v15 = vmul.f32 %v4701_v1, %v2068_v3 }
 0x3ab   : > { %v3913_v16 = vpop.eup %3912  ;;  %v2138_v18 = vmul.f32 0.5, %v2121_v6  ;;  %v2107_v19 = vadd.f32 %v4707_v21, %v2087_v7  ;;  %v2069_v23 = vmul.f32 %v3911_v38, %v4680_v30 }
 0x3ac   : > { %2179 = vadd.xlane.f32.xlu1 %v4775_v0  ;;  %v2139_v4 = vmul.f32 0.5, %v2122_v22  ;;  %v2108_v5 = vadd.f32 %v4707_v21, %v2088_v15  ;;  %v2070_v24 = vmul.f32 %v3913_v16, %v4683_v31 }
 0x3ad   : > { %2181 = vadd.xlane.f32.xlu0 %v4778_v14  ;;  %v4788_v26 = vadd.f32 %v4712_v37, %v2138_v18  ;;  %v2123_v27 = vmax.f32 %v2107_v19, 0.0  ;;  %v2089_v8 = vmul.f32 %v4701_v1, %v2069_v23  ;;  %v4851_v18 = vpop.f32.mrf.mxu1 }
 0x3ae   : > { %v3915_v9 = vpop.eup %3914  ;;  %v4792_v49 = vadd.f32 %v4712_v37, %v2139_v4  ;;  %v2124_v30 = vmax.f32 %v2108_v5, 0.0  ;;  %v2090_v32 = vmul.f32 %v4701_v1, %v2070_v24 }
 0x3af   : > { %v2140_v20 = vmul.f32 0.5, %v2123_v27  ;;  %v2109_v34 = vadd.f32 %v4707_v21, %v2089_v8  ;;  %v2071_v31 = vmul.f32 %v3915_v9, %v4691_v33 }
 0x3b0   : > { %2183 = vadd.xlane.f32.xlu1 %v4788_v26  ;;  %v2141_v35 = vmul.f32 0.5, %v2124_v30  ;;  %v2110_v36 = vadd.f32 %v4707_v21, %v2090_v32  ;;  %v4865_v30 = vpop.f32.mrf.mxu1 }
 0x3b1   : > { %2185 = vadd.xlane.f32.xlu0 %v4792_v49  ;;  %v4801_v39 = vadd.f32 %v4712_v37, %v2140_v20  ;;  %v2125_v10 = vmax.f32 %v2109_v34, 0.0  ;;  %v2091_v40 = vmul.f32 %v4701_v1, %v2071_v31 }
 0x3b2   : > { %v4805_v43 = vadd.f32 %v4712_v37, %v2141_v35  ;;  %v2126_v44 = vmax.f32 %v2110_v36, 0.0 }
 0x3b3   : > { %v2142_v45 = vmul.f32 0.5, %v2125_v10  ;;  %v2111_v33 = vadd.f32 %v4707_v21, %v2091_v40  ;;  %v2750_v21 = vld [vmem:[%s5216_s9 + $0x78] sm:$0xff]  ;;  %v2427_v10 = vld [vmem:[%s5233_s30 + $0x70] sm:$0xff] }
 0x3b4   : > { %2187 = vadd.xlane.f32.xlu1 %v4801_v39  ;;  %v2143_v58 = vmul.f32 0.5, %v2126_v44  ;;  %3730 = vmatprep.subr.mxu1 %v2750_v21 }
 0x3b5   : > { %2189 = vadd.xlane.f32.xlu0 %v4805_v43  ;;  %v4811_v47 = vadd.f32 %v4712_v37, %v2142_v45  ;;  %v2127_v59 = vmax.f32 %v2111_v33, 0.0  ;;  %3731 = vmatpush3.msra.mxu1 %v2750_v21  ;;  %v4888_v33 = vpop.f32.mrf.mxu1 }
 0x3b6   : > { %v4814_v50 = vadd.f32 %v4712_v37, %v2143_v58  ;;  %3732 = vmatprep.subr.mxu1 %v2749_v53  ;;  %3676 = vmatprep.subr.mxu0 %v2427_v10 }
 0x3b7   : > { %v2144_v1 = vmul.f32 0.5, %v2127_v59  ;;  %3733 = vmatpush3.msra.mxu1 %v2749_v53  ;;  %3677 = vmatpush3.msra.mxu0 %v2427_v10  ;;  %v2746_v53 = vld [vmem:[%s5216_s9 + $0x58] sm:$0xff] }
 0x3b8   : > { %2191 = vadd.xlane.f32.xlu1 %v4811_v47 }
 0x3b9   : > { %2193 = vadd.xlane.f32.xlu0 %v4814_v50  ;;  %v4819_v28 = vadd.f32 %v4712_v37, %v2144_v1 }
 0x3bc   : > { %2195 = vadd.xlane.f32.xlu1 %v4819_v28 }
 0x424   : > { %v2166_v37 = vpop.xlane.xlu0 %2165 }
 0x425   : > { %v2197_v29 = vmul.f32 0.03125, %v2166_v37 }
 0x427   : > { %v2213_v54 = vsub.f32 %v4722_v60, %v2197_v29 }
 0x429   : > { %v2168_v55 = vpop.xlane.xlu1 %2167  ;;  %v2170_v56 = vpop.xlane.xlu0 %2169  ;;  %v4833_v11 = vmul.f32 %v4597_v13, %v2213_v54  ;;  %v2425_v54 = vld [vmem:[%s5233_s30 + $0x60] sm:$0xff] }
 0x42a   : > { %v2198_v57 = vmul.f32 0.03125, %v2168_v55  ;;  %v2199_v62 = vmul.f32 0.03125, %v2170_v56 }
 0x42b   : > { %v2245_v12 = vmul.f32 %v4833_v11, %v4833_v11 }
 0x42c   : > { %v2214_v63 = vsub.f32 %v4733_v25, %v2198_v57  ;;  %v2215_v17 = vsub.f32 %v4736_v48, %v2199_v62  ;;  %v4911_v62 = vpop.f32.mrf.mxu1 }
 0x42d   : > { %v2172_v2 = vpop.xlane.xlu1 %2171  ;;  %2261 = vadd.xlane.f32.xlu0 %v2245_v12 }
 0x42e   : > { %v2200_v3 = vmul.f32 0.03125, %v2172_v2  ;;  %v2174_v6 = vpop.xlane.xlu0 %2173  ;;  %v4840_v60 = vmul.f32 %v4597_v13, %v2214_v63  ;;  %v4843_v7 = vmul.f32 %v4597_v13, %v2215_v17  ;;  %v2424_v17 = vld [vmem:[%s5233_s30 + $0x58] sm:$0xff] }
 0x42f   : > { %v2201_v38 = vmul.f32 0.03125, %v2174_v6 }
 0x430   : > { %v2216_v22 = vsub.f32 %v4746_v41, %v2200_v3  ;;  %v2246_v15 = vmul.f32 %v4840_v60, %v4840_v60  ;;  %v2247_v25 = vmul.f32 %v4843_v7, %v4843_v7 }
 0x431   : > { %v2217_v48 = vsub.f32 %v4751_v46, %v2201_v38  ;;  %v2176_v16 = vpop.xlane.xlu1 %2175 }
 0x432   : > { %v2202_v19 = vmul.f32 0.03125, %v2176_v16  ;;  %v2178_v23 = vpop.xlane.xlu0 %2177  ;;  %2263 = vadd.xlane.f32.xlu1 %v2246_v15  ;;  %2265 = vadd.xlane.f32.xlu0 %v2247_v25  ;;  %v4854_v4 = vmul.f32 %v4597_v13, %v2216_v22  ;;  %v2423_v22 = vld [vmem:[%s5233_s30 + $0x50] sm:$0xff]  ;;  %v4937_v16 = vpop.f32.mrf.mxu1 }
 0x433   : > { %v2203_v5 = vmul.f32 0.03125, %v2178_v23  ;;  %v4857_v41 = vmul.f32 %v4597_v13, %v2217_v48 }
 0x434   : > { %v2218_v24 = vsub.f32 %v4760_v52, %v2202_v19  ;;  %v2248_v27 = vmul.f32 %v4854_v4, %v4854_v4 }
 0x435   : > { %v2219_v46 = vsub.f32 %v4765_v61, %v2203_v5  ;;  %v2180_v8 = vpop.xlane.xlu1 %2179  ;;  %v2249_v9 = vmul.f32 %v4857_v41, %v4857_v41  ;;  %v2748_v61 = vld [vmem:[%s5216_s9 + $0x68] sm:$0xff] }
 0x436   : > { %v2204_v32 = vmul.f32 0.03125, %v2180_v8  ;;  %v2182_v20 = vpop.xlane.xlu0 %2181  ;;  %2267 = vadd.xlane.f32.xlu1 %v2248_v27  ;;  %v4868_v34 = vmul.f32 %v4597_v13, %v2218_v24  ;;  %3734 = vmatprep.subr.mxu1 %v2748_v61 }
 0x437   : > { %v2205_v31 = vmul.f32 0.03125, %v2182_v20  ;;  %2269 = vadd.xlane.f32.xlu0 %v2249_v9  ;;  %v4871_v52 = vmul.f32 %v4597_v13, %v2219_v46  ;;  %3735 = vmatpush3.msra.mxu1 %v2748_v61  ;;  %v2743_v46 = vld [vmem:[%s5216_s9 + $0x40] sm:$0xff] }
 0x438   : > { %v2220_v35 = vsub.f32 %v4775_v0, %v2204_v32  ;;  %v2250_v36 = vmul.f32 %v4868_v34, %v4868_v34  ;;  %v2747_v0 = vld [vmem:[%s5216_s9 + $0x60] sm:$0xff] }
 0x439   : > { %v2221_v40 = vsub.f32 %v4778_v14, %v2205_v31  ;;  %v2184_v44 = vpop.xlane.xlu1 %2183  ;;  %v2251_v45 = vmul.f32 %v4871_v52, %v4871_v52  ;;  %v2426_v14 = vld [vmem:[%s5233_s30 + $0x68] sm:$0xff]  ;;  %3736 = vmatprep.subr.mxu1 %v2747_v0  ;;  %v2421_v61 = vld [vmem:[%s5233_s30 + $0x40] sm:$0xff] }
 0x43a   : > { %v2206_v58 = vmul.f32 0.03125, %v2184_v44  ;;  %v2186_v59 = vpop.xlane.xlu0 %2185  ;;  %2271 = vadd.xlane.f32.xlu1 %v2250_v36  ;;  %v4891_v1 = vmul.f32 %v4597_v13, %v2220_v35  ;;  %3678 = vmatprep.subr.mxu0 %v2426_v14  ;;  %v4960_v35 = vpop.f32.mrf.mxu1 }
 0x43b   : > { %v2207_v21 = vmul.f32 0.03125, %v2186_v59  ;;  %2273 = vadd.xlane.f32.xlu0 %v2251_v45  ;;  %v4897_v51 = vmul.f32 %v4597_v13, %v2221_v40  ;;  %3679 = vmatpush3.msra.mxu0 %v2426_v14  ;;  %v2420_v45 = vld [vmem:[%s5233_s30 + $0x38] sm:$0xff]  ;;  %v2419_v14 = vld [vmem:[%s5233_s30 + $0x30] sm:$0xff] }
 0x43c   : > { %v2222_v37 = vsub.f32 %v4788_v26, %v2206_v58  ;;  %v2252_v29 = vmul.f32 %v4891_v1, %v4891_v1  ;;  %3737 = vmatpush3.msra.mxu1 %v2747_v0  ;;  %3680 = vmatprep.subr.mxu0 %v2425_v54  ;;  %v2741_v58 = vld [vmem:[%s5216_s9 + $0x30] sm:$0xff]  ;;  %v4982_v59 = vpop.f32.mrf.mxu1 }
 0x43d   : > { %v2223_v55 = vsub.f32 %v4792_v49, %v2207_v21  ;;  %v2188_v56 = vpop.xlane.xlu1 %2187  ;;  %v2253_v57 = vmul.f32 %v4897_v51, %v4897_v51  ;;  %3738 = vmatprep.subr.mxu1 %v2746_v53  ;;  %v2745_v49 = vld [vmem:[%s5216_s9 + $0x50] sm:$0xff]  ;;  %3681 = vmatpush3.msra.mxu0 %v2425_v54  ;;  %v2740_v21 = vld [vmem:[%s5216_s9 + $0x28] sm:$0xff]  ;;  %v5004_v54 = vld [vmem:[%s5217_s10 + $0x6] ss:$0 sm:$0xff] }
 0x43e   : > { %v2208_v26 = vmul.f32 0.03125, %v2188_v56  ;;  %v2190_v12 = vpop.xlane.xlu0 %2189  ;;  %2275 = vadd.xlane.f32.xlu1 %v2252_v29  ;;  %v4914_v63 = vmul.f32 %v4597_v13, %v2222_v37  ;;  %3739 = vmatpush3.msra.mxu1 %v2746_v53  ;;  %v2739_v37 = vld [vmem:[%s5216_s9 + $0x20] sm:$0xff]  ;;  %v1608_v29 = vpop.f32.mrf.mxu1 }
 0x43f   : > { %v2209_v2 = vmul.f32 0.03125, %v2190_v12  ;;  %2277 = vadd.xlane.f32.xlu0 %v2253_v57  ;;  %v4923_v3 = vmul.f32 %v4597_v13, %v2223_v55  ;;  %3682 = vmatprep.subr.mxu0 %v2424_v17  ;;  %v1579_v55 = vadd.f32 %v5004_v54, %v4865_v30  ;;  %v2417_v56 = vld [vmem:[%s5233_s30 + $0x20] sm:$0xff]  ;;  %v2738_v57 = vld [vmem:[%s5216_s9 + $0x18] sm:$0xff]  ;;  %v1648_v12 = vmax.f32 %v4546_v42, 0.0  ;;  %v2736_v42 = vld [vmem:[%s5216_s9 + $0x8] sm:$0xff] }
 0x440   : > { %v2224_v6 = vsub.f32 %v4801_v39, %v2208_v26  ;;  %v2254_v38 = vmul.f32 %v4914_v63, %v4914_v63  ;;  %3740 = vmatprep.subr.mxu1 %v2745_v49  ;;  %3683 = vmatpush3.msra.mxu0 %v2424_v17  ;;  %v2744_v39 = vld [vmem:[%s5216_s9 + $0x48] sm:$0xff]  ;;  %v2416_v30 = vld [vmem:[%s5233_s30 + $0x18] sm:$0xff]  ;;  %v2737_v26 = vld [vmem:[%s5216_s9 + $0x10] sm:$0xff]  ;;  %v1584_v17 = vadd.f32 %v5004_v54, %v4851_v18 }
 0x441   : > { %v2225_v15 = vsub.f32 %v4805_v43, %v2209_v2  ;;  %v2192_v25 = vpop.xlane.xlu1 %2191  ;;  %v2255_v48 = vmul.f32 %v4923_v3, %v4923_v3  ;;  %3741 = vmatpush3.msra.mxu1 %v2745_v49  ;;  %v2422_v43 = vld [vmem:[%s5233_s30 + $0x48] sm:$0xff]  ;;  %3684 = vmatprep.subr.mxu0 %v2423_v22  ;;  %v3555_v49 = vpop.f32.mrf.mxu1  ;;  %v1240_v2 = vld [vmem:[%s4244_s3 + $0x18] sm:$0xff] }
 0x442   : > { %v2210_v19 = vmul.f32 0.03125, %v2192_v25  ;;  %v2194_v23 = vpop.xlane.xlu0 %2193  ;;  %2279 = vadd.xlane.f32.xlu1 %v2254_v38  ;;  %v4940_v5 = vmul.f32 %v4597_v13, %v2224_v6  ;;  %3742 = vmatprep.subr.mxu1 %v2744_v39  ;;  %v1649_v6 = vmax.f32 %v1579_v55, 0.0  ;;  %v1589_v38 = vadd.f32 %v5004_v54, %v4911_v62  ;;  %v1242_v18 = vld [vmem:[%s4244_s3 + $0x28] sm:$0xff] }
 0x443   : > { %v2211_v24 = vmul.f32 0.03125, %v2194_v23  ;;  %2281 = vadd.xlane.f32.xlu0 %v2255_v48  ;;  %v4946_v27 = vmul.f32 %v4597_v13, %v2225_v15  ;;  %3685 = vmatpush3.msra.mxu0 %v2423_v22  ;;  %v2415_v22 = vld [vmem:[%s5233_s30 + $0x10] sm:$0xff]  ;;  %v2414_v62 = vld [vmem:[%s5233_s30 + $0x8] sm:$0xff]  ;;  %v2735_v15 = vld [vmem:[%s5216_s9] sm:$0xff]  ;;  %v1680_v25 = vadd.f32 %v1648_v12, %v1240_v2  ;;  %v1650_v48 = vmax.f32 %v1584_v17, 0.0 }
 0x444   : > { %v2226_v8 = vsub.f32 %v4811_v47, %v2210_v19  ;;  %v2256_v9 = vmul.f32 %v4940_v5, %v4940_v5  ;;  %3743 = vmatpush3.msra.mxu1 %v2744_v39  ;;  %3686 = vmatprep.subr.mxu0 %v2422_v43  ;;  %v1594_v39 = vadd.f32 %v5004_v54, %v4888_v33  ;;  %v1618_v19 = vpop.f32.mrf.mxu1  ;;  %v1244_v23 = vld [vmem:[%s4244_s3 + $0x38] sm:$0xff]  ;;  %v1258_v12 = vld [vmem:[%s4244_s3 + $0xa8] sm:$0xff] }
 0x445   : > { %v2227_v32 = vsub.f32 %v4814_v50, %v2211_v24  ;;  %v2196_v20 = vpop.xlane.xlu1 %2195  ;;  %v2257_v31 = vmul.f32 %v4946_v27, %v4946_v27  ;;  %3744 = vmatprep.subr.mxu1 %v2743_v46  ;;  %v2742_v50 = vld [vmem:[%s5216_s9 + $0x38] sm:$0xff]  ;;  %3687 = vmatpush3.msra.mxu0 %v2422_v43  ;;  %v1681_v43 = vadd.f32 %v1649_v6, %v1242_v18  ;;  %v1651_v24 = vmax.f32 %v1589_v38, 0.0 }
 0x446   : > { %v2212_v47 = vmul.f32 0.03125, %v2196_v20  ;;  %2283 = vadd.xlane.f32.xlu1 %v2256_v9  ;;  %v4963_v36 = vmul.f32 %v4597_v13, %v2226_v8  ;;  %3745 = vmatpush3.msra.mxu1 %v2743_v46  ;;  %v1599_v46 = vadd.f32 %v5004_v54, %v4960_v35  ;;  %v2413_v8 = vld [vmem:[%s5233_s30] sm:$0xff]  ;;  %v1246_v9 = vld [vmem:[%s4244_s3 + $0x48] sm:$0xff]  ;;  %v1682_v33 = vadd.f32 %v1650_v48, %v1244_v23 }
 0x447   : > { %2285 = vadd.xlane.f32.xlu0 %v2257_v31  ;;  %v4969_v10 = vmul.f32 %v4597_v13, %v2227_v32  ;;  %3688 = vmatprep.subr.mxu0 %v2421_v61  ;;  %v1652_v32 = vmax.f32 %v1594_v39, 0.0  ;;  %v1604_v20 = vadd.f32 %v5004_v54, %v4937_v16  ;;  %v3558_v31 = vpop.f32.mrf.mxu1  ;;  %v1683_v35 = vadd.f32 %v1651_v24, %v1246_v9  ;;  %v1264_v39 = vld [vmem:[%s4244_s3 + $0xd8] sm:$0xff] }
 0x448   : > { %v2228_v40 = vsub.f32 %v4819_v28, %v2212_v47  ;;  %v2258_v44 = vmul.f32 %v4963_v36, %v4963_v36  ;;  %3746 = vmatprep.subr.mxu1 %v2742_v50  ;;  %3689 = vmatpush3.msra.mxu0 %v2421_v61  ;;  %v1248_v61 = vld [vmem:[%s4244_s3 + $0x58] sm:$0xff]  ;;  %v1653_v47 = vmax.f32 %v1599_v46, 0.0  ;;  %v1624_v55 = vadd.f32 %v5004_v54, %v3555_v49 }
 0x449   : > { %v2259_v0 = vmul.f32 %v4969_v10, %v4969_v10  ;;  %3747 = vmatpush3.msra.mxu1 %v2742_v50  ;;  %3690 = vmatprep.subr.mxu0 %v2420_v45  ;;  %v1609_v50 = vadd.f32 %v5004_v54, %v1608_v29  ;;  %v1628_v16 = vpop.f32.mrf.mxu1  ;;  %v1634_v6 = vadd.f32 %v5004_v54, %v3558_v31 }
 0x44a   : > { %2287 = vadd.xlane.f32.xlu1 %v2258_v44  ;;  %v4985_v28 = vmul.f32 %v4597_v13, %v2228_v40  ;;  %3748 = vmatprep.subr.mxu1 %v2741_v58  ;;  %v2418_v13 = vld [vmem:[%s5233_s30 + $0x28] sm:$0xff]  ;;  %v1684_v44 = vadd.f32 %v1652_v32, %v1248_v61  ;;  %v1658_v2 = vmax.f32 %v1624_v55, 0.0 }
 0x44b   : > { %2289 = vadd.xlane.f32.xlu0 %v2259_v0  ;;  %3691 = vmatpush3.msra.mxu0 %v2420_v45  ;;  %v1250_v40 = vld [vmem:[%s4244_s3 + $0x68] sm:$0xff]  ;;  %v1654_v45 = vmax.f32 %v1604_v20, 0.0  ;;  %v1614_v0 = vadd.f32 %v5004_v54, %v4982_v59 }
 0x44c   : > { %v2260_v53 = vmul.f32 %v4985_v28, %v4985_v28  ;;  %3749 = vmatpush3.msra.mxu1 %v2741_v58  ;;  %3692 = vmatprep.subr.mxu0 %v2419_v14  ;;  %v1252_v58 = vld [vmem:[%s4244_s3 + $0x78] sm:$0xff] }
 0x44d   : > { %3750 = vmatprep.subr.mxu1 %v2740_v21  ;;  %3693 = vmatpush3.msra.mxu0 %v2419_v14  ;;  %v1685_v14 = vadd.f32 %v1653_v47, %v1250_v40  ;;  %v1656_v29 = vmax.f32 %v1614_v0, 0.0 }
 0x44e   : > { %2291 = vadd.xlane.f32.xlu1 %v2260_v53  ;;  %3751 = vmatpush3.msra.mxu1 %v2740_v21  ;;  %v1655_v21 = vmax.f32 %v1609_v50, 0.0  ;;  %v1619_v53 = vadd.f32 %v5004_v54, %v1618_v19 }
 0x44f   : > { %3694 = vmatprep.subr.mxu0 %v2418_v13  ;;  %3752 = vmatprep.subr.mxu1 %v2739_v37 }
 0x450   : > { %3695 = vmatpush3.msra.mxu0 %v2418_v13  ;;  %3753 = vmatpush3.msra.mxu1 %v2739_v37  ;;  %v1254_v13 = vld [vmem:[%s4244_s3 + $0x88] sm:$0xff]  ;;  %v1686_v37 = vadd.f32 %v1654_v45, %v1252_v58 }
 0x451   : > { %3696 = vmatprep.subr.mxu0 %v2417_v56  ;;  %3754 = vmatprep.subr.mxu1 %v2738_v57  ;;  %v1687_v59 = vadd.f32 %v1655_v21, %v1254_v13 }
 0x452   : > { %3697 = vmatpush3.msra.mxu0 %v2417_v56  ;;  %3755 = vmatpush3.msra.mxu1 %v2738_v57  ;;  %v3561_v56 = vpop.f32.mrf.mxu1  ;;  %v1256_v57 = vld [vmem:[%s4244_s3 + $0x98] sm:$0xff] }
 0x453   : > { %3698 = vmatprep.subr.mxu0 %v2416_v30  ;;  %3756 = vmatprep.subr.mxu1 %v2737_v26  ;;  %v1688_v17 = vadd.f32 %v1656_v29, %v1256_v57  ;;  %v1644_v48 = vadd.f32 %v5004_v54, %v3561_v56 }
 0x454   : > { %3699 = vmatpush3.msra.mxu0 %v2416_v30  ;;  %3757 = vmatpush3.msra.mxu1 %v2737_v26  ;;  %v1657_v30 = vmax.f32 %v1619_v53, 0.0  ;;  %v1629_v26 = vadd.f32 %v5004_v54, %v1628_v16  ;;  %v1638_v38 = vpop.f32.mrf.mxu1 }
 0x455   : > { %3700 = vmatprep.subr.mxu0 %v2415_v22  ;;  %3758 = vmatprep.subr.mxu1 %v2736_v42  ;;  %v1639_v18 = vadd.f32 %v5004_v54, %v1638_v38  ;;  %v1662_v46 = vmax.f32 %v1644_v48, 0.0 }
 0x456   : > { %3701 = vmatpush3.msra.mxu0 %v2415_v22  ;;  %3759 = vmatpush3.msra.mxu1 %v2736_v42  ;;  %v1260_v22 = vld [vmem:[%s4244_s3 + $0xb8] sm:$0xff]  ;;  %v1689_v49 = vadd.f32 %v1657_v30, %v1258_v12  ;;  %v1659_v42 = vmax.f32 %v1629_v26, 0.0  ;;  %v5073_v26 = vld [vmem:[%s5217_s10 + $0x3] ss:$0 sm:$0xff] }
 0x457   : > { %3702 = vmatprep.subr.mxu0 %v2414_v62  ;;  %3760 = vmatprep.subr.mxu1 %v2735_v15  ;;  %v1661_v23 = vmax.f32 %v1639_v18, 0.0 }
 0x458   : > { %3703 = vmatpush3.msra.mxu0 %v2414_v62  ;;  %3761 = vmatpush3.msra.mxu1 %v2735_v15  ;;  %v1262_v62 = vld [vmem:[%s4244_s3 + $0xc8] sm:$0xff]  ;;  %v1690_v15 = vadd.f32 %v1658_v2, %v1260_v22 }
 0x459   : > { %3704 = vmatprep.subr.mxu0 %v2413_v8  ;;  %3763 = vmatmul.mubr.f32.vlgmr.msra.gmra.mxu1 %v1680_v25  ;;  %v1660_v25 = vmax.f32 %v1634_v6, 0.0  ;;  %v1691_v19 = vadd.f32 %v1659_v42, %v1262_v62  ;;  %v5079_v6 = vld [vmem:[%s5217_s10 + $0x4] ss:$0 sm:$0xff] }
 0x45a   : > { %3705 = vmatpush3.msra.mxu0 %v2413_v8  ;;  %3765 = vmatprep.mubr.f32.mxu1 %v1681_v43  ;;  %v1266_v43 = vld [vmem:[%s4244_s3 + $0xe8] sm:$0xff]  ;;  %v1268_v8 = vld [vmem:[%s4244_s3 + $0xf8] sm:$0xff] }
 0x45b   : > { %v1692_v24 = vadd.f32 %v1660_v25, %v1264_v39  ;;  %v1693_v9 = vadd.f32 %v1661_v23, %v1266_v43 }
 0x45d   : > { %3766 = vmatmul.mubr.f32.gmra.mxu1 %v1682_v33  ;;  %v1694_v33 = vadd.f32 %v1662_v46, %v1268_v8 }
 0x45e   : > { %3768 = vmatprep.mubr.f32.mxu1 %v1683_v35 }
 0x461   : > { %3769 = vmatmul.mubr.f32.gmra.mxu1 %v1684_v44 }
 0x462   : > { %3771 = vmatprep.mubr.f32.mxu1 %v1685_v14 }
 0x465   : > { %3772 = vmatmul.mubr.f32.gmra.mxu1 %v1686_v37 }
 0x466   : > { %3774 = vmatprep.mubr.f32.mxu1 %v1687_v59 }
 0x469   : > { %3775 = vmatmul.mubr.f32.gmra.mxu1 %v1688_v17 }
 0x46a   : > { %3777 = vmatprep.mubr.f32.mxu1 %v1689_v49 }
 0x46d   : > { %3778 = vmatmul.mubr.f32.gmra.mxu1 %v1690_v15 }
 0x46e   : > { %3780 = vmatprep.mubr.f32.mxu1 %v1691_v19 }
 0x471   : > { %3781 = vmatmul.mubr.f32.gmra.mxu1 %v1692_v24 }
 0x472   : > { %3783 = vmatprep.mubr.f32.mxu1 %v1693_v9 }
 0x475   : > { %3784 = vmatmul.mubr.f32.gmra.mxu1 %v1694_v33 }
 0x4b6   : > { %v2262_v32 = vpop.xlane.xlu0 %2261 }
 0x4b7   : > { %v2293_v20 = vmul.f32 0.03125, %v2262_v32 }
 0x4b9   : > { %v2309_v31 = vadd.f32 1e-05, %v2293_v20 }
 0x4bb   : > { %3916 = vrsqrt.f32 %v2309_v31  ;;  %v2264_v54 = vpop.xlane.xlu1 %2263  ;;  %v2266_v61 = vpop.xlane.xlu0 %2265 }
 0x4bc   : > { %v2294_v35 = vmul.f32 0.03125, %v2264_v54  ;;  %v2295_v47 = vmul.f32 0.03125, %v2266_v61 }
 0x4be   : > { %v2310_v50 = vadd.f32 1e-05, %v2294_v35  ;;  %v2311_v40 = vadd.f32 1e-05, %v2295_v47 }
 0x4bf   : > { %v2268_v44 = vpop.xlane.xlu1 %2267 }
 0x4c0   : > { %3918 = vrsqrt.f32 %v2310_v50  ;;  %v2296_v45 = vmul.f32 0.03125, %v2268_v44  ;;  %v2270_v0 = vpop.xlane.xlu0 %2269 }
 0x4c1   : > { %3920 = vrsqrt.f32 %v2311_v40  ;;  %v2297_v16 = vmul.f32 0.03125, %v2270_v0 }
 0x4c2   : > { %v2312_v58 = vadd.f32 1e-05, %v2296_v45 }
 0x4c3   : > { %v2313_v14 = vadd.f32 1e-05, %v2297_v16  ;;  %v2272_v21 = vpop.xlane.xlu1 %2271 }
 0x4c4   : > { %3922 = vrsqrt.f32 %v2312_v58  ;;  %v2298_v53 = vmul.f32 0.03125, %v2272_v21  ;;  %v2274_v13 = vpop.xlane.xlu0 %2273 }
 0x4c5   : > { %3924 = vrsqrt.f32 %v2313_v14  ;;  %v2299_v37 = vmul.f32 0.03125, %v2274_v13 }
 0x4c6   : > { %v2314_v29 = vadd.f32 1e-05, %v2298_v53 }
 0x4c7   : > { %v2315_v55 = vadd.f32 1e-05, %v2299_v37  ;;  %v2276_v56 = vpop.xlane.xlu1 %2275 }
 0x4c8   : > { %v3917_v57 = vpop.eup %3916  ;;  %3926 = vrsqrt.f32 %v2314_v29  ;;  %v2300_v59 = vmul.f32 0.03125, %v2276_v56  ;;  %v2278_v30 = vpop.xlane.xlu0 %2277 }
 0x4c9   : > { %3928 = vrsqrt.f32 %v2315_v55  ;;  %v2301_v12 = vmul.f32 0.03125, %v2278_v30  ;;  %v2341_v17 = vmul.f32 %v3917_v57, %v4833_v11 }
 0x4ca   : > { %v2316_v2 = vadd.f32 1e-05, %v2300_v59 }
 0x4cb   : > { %v2317_v38 = vadd.f32 1e-05, %v2301_v12  ;;  %v2280_v22 = vpop.xlane.xlu1 %2279  ;;  %v2361_v49 = vmul.f32 %v5073_v26, %v2341_v17 }
 0x4cc   : > { %3930 = vrsqrt.f32 %v2316_v2  ;;  %v2302_v42 = vmul.f32 0.03125, %v2280_v22  ;;  %v2282_v18 = vpop.xlane.xlu0 %2281 }
 0x4cd   : > { %v3919_v62 = vpop.eup %3918  ;;  %3932 = vrsqrt.f32 %v2317_v38  ;;  %v2303_v15 = vmul.f32 0.03125, %v2282_v18  ;;  %v2381_v25 = vadd.f32 %v5079_v6, %v2361_v49 }
 0x4ce   : > { %v3921_v48 = vpop.eup %3920  ;;  %v2342_v11 = vmul.f32 %v3919_v62, %v4840_v60  ;;  %v2318_v39 = vadd.f32 1e-05, %v2302_v42 }
 0x4cf   : > { %v2319_v19 = vadd.f32 1e-05, %v2303_v15  ;;  %v2284_v23 = vpop.xlane.xlu1 %2283  ;;  %v2397_v43 = vmax.f32 %v2381_v25, 0.0  ;;  %v2343_v24 = vmul.f32 %v3921_v48, %v4843_v7 }
 0x4d0   : > { %3934 = vrsqrt.f32 %v2318_v39  ;;  %v2304_v46 = vmul.f32 0.03125, %v2284_v23  ;;  %v2286_v8 = vpop.xlane.xlu0 %2285  ;;  %v2362_v9 = vmul.f32 %v5073_v26, %v2342_v11 }
 0x4d1   : > { %v3923_v33 = vpop.eup %3922  ;;  %3936 = vrsqrt.f32 %v2319_v19  ;;  %v2305_v32 = vmul.f32 0.03125, %v2286_v8  ;;  %3706 = vmatprep.mubr.f32.mxu0 %v2397_v43  ;;  %v2363_v20 = vmul.f32 %v5073_v26, %v2343_v24 }
 0x4d2   : > { %v3925_v31 = vpop.eup %3924  ;;  %v2320_v54 = vadd.f32 1e-05, %v2304_v46  ;;  %v2382_v60 = vadd.f32 %v5079_v6, %v2362_v9  ;;  %v2344_v61 = vmul.f32 %v3923_v33, %v4854_v4 }
 0x4d3   : > { %v2321_v35 = vadd.f32 1e-05, %v2305_v32  ;;  %v2288_v47 = vpop.xlane.xlu1 %2287  ;;  %v2383_v7 = vadd.f32 %v5079_v6, %v2363_v20  ;;  %v2345_v50 = vmul.f32 %v3925_v31, %v4857_v41 }
 0x4d4   : > { %3938 = vrsqrt.f32 %v2320_v54  ;;  %v2306_v40 = vmul.f32 0.03125, %v2288_v47  ;;  %v2290_v44 = vpop.xlane.xlu0 %2289  ;;  %v2398_v45 = vmax.f32 %v2382_v60, 0.0  ;;  %v2364_v0 = vmul.f32 %v5073_v26, %v2344_v61 }
 0x4d5   : > { %v3927_v16 = vpop.eup %3926  ;;  %3940 = vrsqrt.f32 %v2321_v35  ;;  %v2307_v58 = vmul.f32 0.03125, %v2290_v44  ;;  %v2399_v14 = vmax.f32 %v2383_v7, 0.0  ;;  %v2365_v21 = vmul.f32 %v5073_v26, %v2345_v50 }
 0x4d6   : > { %v3929_v53 = vpop.eup %3928  ;;  %v2322_v4 = vadd.f32 1e-05, %v2306_v40  ;;  %3707 = vmatmul.mubr.f32.vlgmr.msra.gmra.mxu0 %v2398_v45  ;;  %v2384_v13 = vadd.f32 %v5079_v6, %v2364_v0  ;;  %v2346_v37 = vmul.f32 %v3927_v16, %v4868_v34 }
 0x4d7   : > { %v2323_v41 = vadd.f32 1e-05, %v2307_v58  ;;  %v2292_v29 = vpop.xlane.xlu1 %2291  ;;  %3709 = vmatprep.mubr.f32.mxu0 %v2399_v14  ;;  %v2385_v55 = vadd.f32 %v5079_v6, %v2365_v21  ;;  %v2347_v56 = vmul.f32 %v3929_v53, %v4871_v52 }
 0x4d8   : > { %3942 = vrsqrt.f32 %v2322_v4  ;;  %v2308_v57 = vmul.f32 0.03125, %v2292_v29  ;;  %v2400_v59 = vmax.f32 %v2384_v13, 0.0  ;;  %v2366_v30 = vmul.f32 %v5073_v26, %v2346_v37  ;;  %v3652_v13 = vpop.f32.mrf.mxu1 }
 0x4d9   : > { %v3931_v12 = vpop.eup %3930  ;;  %3944 = vrsqrt.f32 %v2323_v41  ;;  %v2401_v17 = vmax.f32 %v2385_v55, 0.0  ;;  %v2367_v2 = vmul.f32 %v5073_v26, %v2347_v56 }
 0x4da   : > { %v3933_v38 = vpop.eup %3932  ;;  %v2324_v22 = vadd.f32 1e-05, %v2308_v57  ;;  %3710 = vmatmul.mubr.f32.gmra.mxu0 %v2400_v59  ;;  %v2386_v34 = vadd.f32 %v5079_v6, %v2366_v30  ;;  %v2348_v49 = vmul.f32 %v3931_v12, %v4891_v1  ;;  %v2511_v37 = vpop.f32.mrf.mxu1 }
 0x4db   : > { %3712 = vmatprep.mubr.f32.mxu0 %v2401_v17  ;;  %v2387_v52 = vadd.f32 %v5079_v6, %v2367_v2  ;;  %v2349_v42 = vmul.f32 %v3933_v38, %v4897_v51 }
 0x4dc   : > { %3946 = vrsqrt.f32 %v2324_v22  ;;  %v2402_v18 = vmax.f32 %v2386_v34, 0.0  ;;  %v2368_v62 = vmul.f32 %v5073_v26, %v2348_v49  ;;  %v3655_v41 = vpop.f32.mrf.mxu1 }
 0x4dd   : > { %v3935_v15 = vpop.eup %3934  ;;  %v2403_v25 = vmax.f32 %v2387_v52, 0.0  ;;  %v2369_v48 = vmul.f32 %v5073_v26, %v2349_v42 }
 0x4de   : > { %v3937_v11 = vpop.eup %3936  ;;  %3713 = vmatmul.mubr.f32.gmra.mxu0 %v2402_v18  ;;  %v2388_v39 = vadd.f32 %v5079_v6, %v2368_v62  ;;  %v2350_v19 = vmul.f32 %v3935_v15, %v4914_v63  ;;  %v2521_v29 = vpop.f32.mrf.mxu1 }
 0x4df   : > { %3715 = vmatprep.mubr.f32.mxu0 %v2403_v25  ;;  %v2389_v1 = vadd.f32 %v5079_v6, %v2369_v48  ;;  %v2351_v23 = vmul.f32 %v3937_v11, %v4923_v3  ;;  %v5145_v11 = vld [vmem:[%s5234_s20] ss:$0 sm:$0xff] }
 0x4e0   : > { %v2404_v51 = vmax.f32 %v2388_v39, 0.0  ;;  %v2370_v43 = vmul.f32 %v5073_v26, %v2350_v19  ;;  %v3658_v55 = vpop.f32.mrf.mxu1 }
 0x4e1   : > { %v3939_v24 = vpop.eup %3938  ;;  %v2405_v46 = vmax.f32 %v2389_v1, 0.0  ;;  %v2371_v8 = vmul.f32 %v5073_v26, %v2351_v23 }
 0x4e2   : > { %v3941_v9 = vpop.eup %3940  ;;  %3716 = vmatmul.mubr.f32.gmra.mxu0 %v2404_v51  ;;  %v2390_v33 = vadd.f32 %v5079_v6, %v2370_v43  ;;  %v2352_v32 = vmul.f32 %v3939_v24, %v4940_v5  ;;  %v2531_v56 = vpop.f32.mrf.mxu1 }
 0x4e3   : > { %3718 = vmatprep.mubr.f32.mxu0 %v2405_v46  ;;  %v2391_v63 = vadd.f32 %v5079_v6, %v2371_v8  ;;  %v2353_v20 = vmul.f32 %v3941_v9, %v4946_v27 }
 0x4e4   : > { %v2406_v31 = vmax.f32 %v2390_v33, 0.0  ;;  %v2372_v3 = vmul.f32 %v5073_v26, %v2352_v32 }
 0x4e5   : > { %v3943_v54 = vpop.eup %3942  ;;  %v2407_v60 = vmax.f32 %v2391_v63, 0.0  ;;  %v2373_v61 = vmul.f32 %v5073_v26, %v2353_v20 }
 0x4e6   : > { %v3945_v35 = vpop.eup %3944  ;;  %3719 = vmatmul.mubr.f32.gmra.mxu0 %v2406_v31  ;;  %v2392_v47 = vadd.f32 %v5079_v6, %v2372_v3  ;;  %v2354_v7 = vmul.f32 %v3943_v54, %v4963_v36 }
 0x4e7   : > { %3721 = vmatprep.mubr.f32.mxu0 %v2407_v60  ;;  %v2393_v5 = vadd.f32 %v5079_v6, %v2373_v61  ;;  %v2355_v50 = vmul.f32 %v3945_v35, %v4969_v10 }
 0x4e8   : > { %v2408_v40 = vmax.f32 %v2392_v47, 0.0  ;;  %v2374_v27 = vmul.f32 %v5073_v26, %v2354_v7 }
 0x4e9   : > { %v3947_v44 = vpop.eup %3946  ;;  %v2409_v45 = vmax.f32 %v2393_v5, 0.0  ;;  %v2375_v0 = vmul.f32 %v5073_v26, %v2355_v50 }
 0x4ea   : > { %3722 = vmatmul.mubr.f32.gmra.mxu0 %v2408_v40  ;;  %v2394_v16 = vadd.f32 %v5079_v6, %v2374_v27  ;;  %v2356_v58 = vmul.f32 %v3947_v44, %v4985_v28  ;;  %v3661_v28 = vpop.f32.mrf.mxu1 }
 0x4eb   : > { %3724 = vmatprep.mubr.f32.mxu0 %v2409_v45  ;;  %v2395_v36 = vadd.f32 %v5079_v6, %v2375_v0 }
 0x4ec   : > { %v2410_v14 = vmax.f32 %v2394_v16, 0.0  ;;  %v2376_v21 = vmul.f32 %v5073_v26, %v2356_v58  ;;  %v2541_v57 = vpop.f32.mrf.mxu1 }
 0x4ed   : > { %v2411_v53 = vmax.f32 %v2395_v36, 0.0 }
 0x4ee   : > { %3725 = vmatmul.mubr.f32.gmra.mxu0 %v2410_v14  ;;  %v2396_v10 = vadd.f32 %v5079_v6, %v2376_v21  ;;  %v3664_v59 = vpop.f32.mrf.mxu1 }
 0x4ef   : > { %3727 = vmatprep.mubr.f32.mxu0 %v2411_v53 }
 0x4f0   : > { %v2412_v4 = vmax.f32 %v2396_v10, 0.0  ;;  %v5128_v30 = vpop.f32.mrf.mxu1 }
 0x4f2   : > { %3728 = vmatmul.mubr.f32.gmra.mxu0 %v2412_v4  ;;  %v5130_v12 = vpop.f32.mrf.mxu1 }
 0x4f4   : > { %v5132_v26 = vpop.f32.mrf.mxu1 }
 0x4f6   : > { %v5134_v17 = vpop.f32.mrf.mxu1 }
 0x4f8   : > { %v5136_v6 = vpop.f32.mrf.mxu1 }
 0x4fa   : > { %v5138_v2 = vpop.f32.mrf.mxu1 }
 0x4fc   : > { %v5140_v38 = vpop.f32.mrf.mxu1 }
 0x519   : > { %v3764_v22 = vpop.f32.mrf.mxu1 }
 0x51b   : > { %v2817_v34 = vpop.f32.mrf.mxu1 }
 0x51d   : > { %v3767_v49 = vpop.f32.mrf.mxu1 }
 0x51f   : > { %v2827_v52 = vpop.f32.mrf.mxu1 }
 0x521   : > { %v3770_v42 = vpop.f32.mrf.mxu1 }
 0x523   : > { %v2837_v18 = vpop.f32.mrf.mxu1 }
 0x525   : > { %v3773_v62 = vpop.f32.mrf.mxu1 }
 0x527   : > { %v2847_v25 = vpop.f32.mrf.mxu1 }
 0x529   : > { %v3776_v51 = vpop.f32.mrf.mxu1 }
 0x52b   : > { %v2857_v20 = vpop.f32.mrf.mxu1 }
 0x52d   : > { %v3779_v5 = vpop.f32.mrf.mxu1 }
 0x52f   : > { %v2867_v36 = vpop.f32.mrf.mxu1 }
 0x596   : > { %v3708_v15 = vpop.f32.mrf.mxu0 }
 0x597   : > { %v2662_v48 = vadd.f32 %v3708_v15, %v3652_v13 }
 0x598   : > { %v2656_v39 = vpop.f32.mrf.mxu0 }
 0x599   : > { %v2897_v19 = vadd.f32 %v3764_v22, %v2662_v48  ;;  %v2657_v1 = vadd.f32 %v2656_v39, %v2511_v37 }
 0x59a   : > { %v3711_v23 = vpop.f32.mrf.mxu0 }
 0x59b   : > { %v2920_v43 = vadd.f32 %v5145_v11, %v2897_v19  ;;  %v2896_v24 = vadd.f32 %v2817_v34, %v2657_v1  ;;  %v2672_v46 = vadd.f32 %v3711_v23, %v3655_v41 }
 0x59c   : > { %v2666_v8 = vpop.f32.mrf.mxu0 }
 0x59d   : > { %3948 = vtanh.f32 %v2920_v43  ;;  %v2919_v9 = vadd.f32 %v5145_v11, %v2896_v24  ;;  %v2899_v33 = vadd.f32 %v3767_v49, %v2672_v46  ;;  %v2667_v32 = vadd.f32 %v2666_v8, %v2521_v29 }
 0x59e   : > { %v3714_v63 = vpop.f32.mrf.mxu0 }
 0x59f   : > { %3950 = vtanh.f32 %v2919_v9  ;;  %v2922_v31 = vadd.f32 %v5145_v11, %v2899_v33  ;;  %v2898_v3 = vadd.f32 %v2827_v52, %v2667_v32  ;;  %v2682_v54 = vadd.f32 %v3714_v63, %v3658_v55  ;;  %v3782_v55 = vpop.f32.mrf.mxu1 }
 0x5a0   : > { %v2676_v60 = vpop.f32.mrf.mxu0 }
 0x5a1   : > { %3952 = vtanh.f32 %v2922_v31  ;;  %v2921_v61 = vadd.f32 %v5145_v11, %v2898_v3  ;;  %v2901_v35 = vadd.f32 %v3770_v42, %v2682_v54  ;;  %v2677_v47 = vadd.f32 %v2676_v60, %v2531_v56 }
 0x5a2   : > { %v3717_v7 = vpop.f32.mrf.mxu0 }
 0x5a3   : > { %3954 = vtanh.f32 %v2921_v61  ;;  %v2924_v50 = vadd.f32 %v5145_v11, %v2901_v35  ;;  %v2900_v40 = vadd.f32 %v2837_v18, %v2677_v47  ;;  %v2692_v27 = vadd.f32 %v3717_v7, %v3661_v28  ;;  %v2877_v18 = vpop.f32.mrf.mxu1 }
 0x5a4   : > { %v2686_v44 = vpop.f32.mrf.mxu0 }
 0x5a5   : > { %3956 = vtanh.f32 %v2924_v50  ;;  %v2923_v45 = vadd.f32 %v5145_v11, %v2900_v40  ;;  %v2903_v0 = vadd.f32 %v3773_v62, %v2692_v27  ;;  %v2687_v16 = vadd.f32 %v2686_v44, %v2541_v57  ;;  %v3785_v23 = vpop.f32.mrf.mxu1 }
 0x5a6   : > { %v3720_v58 = vpop.f32.mrf.mxu0 }
 0x5a7   : > { %3958 = vtanh.f32 %v2923_v45  ;;  %v2926_v14 = vadd.f32 %v5145_v11, %v2903_v0  ;;  %v2902_v21 = vadd.f32 %v2847_v25, %v2687_v16  ;;  %v2702_v53 = vadd.f32 %v3720_v58, %v3664_v59  ;;  %v2887_v63 = vpop.f32.mrf.mxu1 }
 0x5a8   : > { %v2696_v10 = vpop.f32.mrf.mxu0 }
 0x5a9   : > { %3960 = vtanh.f32 %v2926_v14  ;;  %v2925_v4 = vadd.f32 %v5145_v11, %v2902_v21  ;;  %v2905_v13 = vadd.f32 %v3776_v51, %v2702_v53  ;;  %v2697_v37 = vadd.f32 %v2696_v10, %v5128_v30 }
 0x5aa   : > { %v3949_v41 = vpop.eup %3948  ;;  %v3723_v29 = vpop.f32.mrf.mxu0 }
 0x5ab   : > { %2952 = vst [vmem:[%s4249_s7 + $0x8] sm:$0xff] %v3949_v41  ;;  %3962 = vtanh.f32 %v2925_v4  ;;  %v2928_v56 = vadd.f32 %v5145_v11, %v2905_v13  ;;  %v2904_v28 = vadd.f32 %v2857_v20, %v2697_v37  ;;  %v2712_v57 = vadd.f32 %v3723_v29, %v5130_v12 }
 0x5ac   : > { %v3951_v59 = vpop.eup %3950  ;;  %v2706_v22 = vpop.f32.mrf.mxu0 }
 0x5ad   : > { %2951 = vst [vmem:[%s4249_s7] sm:$0xff] %v3951_v59  ;;  %3964 = vtanh.f32 %v2928_v56  ;;  %v2927_v34 = vadd.f32 %v5145_v11, %v2904_v28  ;;  %v2907_v49 = vadd.f32 %v3779_v5, %v2712_v57  ;;  %v2707_v30 = vadd.f32 %v2706_v22, %v5132_v26 }
 0x5ae   : > { %v3953_v52 = vpop.eup %3952  ;;  %v3726_v42 = vpop.f32.mrf.mxu0 }
 0x5af   : > { %2954 = vst [vmem:[%s4249_s7 + $0x18] sm:$0xff] %v3953_v52  ;;  %3966 = vtanh.f32 %v2927_v34  ;;  %v2930_v62 = vadd.f32 %v5145_v11, %v2907_v49  ;;  %v2906_v15 = vadd.f32 %v2867_v36, %v2707_v30  ;;  %v2722_v12 = vadd.f32 %v3726_v42, %v5134_v17 }
 0x5b0   : > { %v3955_v25 = vpop.eup %3954  ;;  %v2716_v48 = vpop.f32.mrf.mxu0 }
 0x5b1   : > { %2953 = vst [vmem:[%s4249_s7 + $0x10] sm:$0xff] %v3955_v25  ;;  %3968 = vtanh.f32 %v2930_v62  ;;  %v2929_v39 = vadd.f32 %v5145_v11, %v2906_v15  ;;  %v2909_v19 = vadd.f32 %v3782_v55, %v2722_v12  ;;  %v2717_v26 = vadd.f32 %v2716_v48, %v5136_v6 }
 0x5b2   : > { %v3957_v1 = vpop.eup %3956  ;;  %v3729_v51 = vpop.f32.mrf.mxu0 }
 0x5b3   : > { %2956 = vst [vmem:[%s4249_s7 + $0x28] sm:$0xff] %v3957_v1  ;;  %3970 = vtanh.f32 %v2929_v39  ;;  %v2932_v43 = vadd.f32 %v5145_v11, %v2909_v19  ;;  %v2908_v24 = vadd.f32 %v2877_v18, %v2717_v26  ;;  %v2732_v17 = vadd.f32 %v3729_v51, %v5138_v2 }
 0x5b4   : > { %v3959_v46 = vpop.eup %3958  ;;  %v2726_v8 = vpop.f32.mrf.mxu0 }
 0x5b5   : > { %2955 = vst [vmem:[%s4249_s7 + $0x20] sm:$0xff] %v3959_v46  ;;  %3972 = vtanh.f32 %v2932_v43  ;;  %v2931_v9 = vadd.f32 %v5145_v11, %v2908_v24  ;;  %v2911_v6 = vadd.f32 %v3785_v23, %v2732_v17  ;;  %v2727_v33 = vadd.f32 %v2726_v8, %v5140_v38 }
 0x5b6   : > { %v3961_v32 = vpop.eup %3960 }
 0x5b7   : > { %2958 = vst [vmem:[%s4249_s7 + $0x38] sm:$0xff] %v3961_v32  ;;  %3974 = vtanh.f32 %v2931_v9  ;;  %v2934_v20 = vadd.f32 %v5145_v11, %v2911_v6  ;;  %v2910_v2 = vadd.f32 %v2887_v63, %v2727_v33 }
 0x5b8   : > { %v3963_v31 = vpop.eup %3962 }
 0x5b9   : > { %2957 = vst [vmem:[%s4249_s7 + $0x30] sm:$0xff] %v3963_v31  ;;  %3976 = vtanh.f32 %v2934_v20  ;;  %v2933_v3 = vadd.f32 %v5145_v11, %v2910_v2 }
 0x5ba   : > { %v3965_v54 = vpop.eup %3964 }
 0x5bb   : > { %2960 = vst [vmem:[%s4249_s7 + $0x48] sm:$0xff] %v3965_v54  ;;  %3978 = vtanh.f32 %v2933_v3 }
 0x5bc   : > { %v3967_v38 = vpop.eup %3966 }
 0x5bd   : > { %2959 = vst [vmem:[%s4249_s7 + $0x40] sm:$0xff] %v3967_v38 }
 0x5be   : > { %v3969_v60 = vpop.eup %3968 }
 0x5bf   : > { %2962 = vst [vmem:[%s4249_s7 + $0x58] sm:$0xff] %v3969_v60 }
 0x5c0   : > { %v3971_v61 = vpop.eup %3970 }
 0x5c1   : > { %2961 = vst [vmem:[%s4249_s7 + $0x50] sm:$0xff] %v3971_v61 }
 0x5c2   : > { %v3973_v35 = vpop.eup %3972 }
 0x5c3   : > { %2964 = vst [vmem:[%s4249_s7 + $0x68] sm:$0xff] %v3973_v35 }
 0x5c4   : > { %v3975_v47 = vpop.eup %3974 }
 0x5c5   : > { %2963 = vst [vmem:[%s4249_s7 + $0x60] sm:$0xff] %v3975_v47 }
 0x5c6   : > { %v3977_v7 = vpop.eup %3976 }
 0x5c7   : > { %2966 = vst [vmem:[%s4249_s7 + $0x78] sm:$0xff] %v3977_v7 }
 0x5c8   : > { %v3979_v5 = vpop.eup %3978 }
 0x5c9   : > { %2965 = vst [vmem:[%s4249_s7 + $0x70] sm:$0xff] %v3979_v5 }
 0x5ca PF: > { %s22_s27 = sadd.s32 1, %s4035_s27   ;;  %s5235_s23 = sld [smem:[#allocation5_spill]] }
 0x5cb   : > { %p19_p0 = scmp.ge.s32.totalorder %s22_s27, 11   ;;  %s5236_s24 = sld [smem:[#allocation6_spill]] }
 0x5cc   : > { %s5237_s25 = sld [smem:[#allocation7_spill]]  ;;  %s5239_s21 = smov %s4015_s22 }
 0x5cd   : > { %s5238_s26 = sld [smem:[#allocation8_spill]]  ;;  %s5240_s22 = smov %s4154_s16 }
 0x5ce   :  { %21 = sbr.rel (!%p19_p0) target bundleno = 8 (0x8), region = 162 }

</bundles_post_ra>
